<compile_context>
chip_gen: v7x
topology: tpu7x:2x2x1
jax: 0.10.0
libtpu: 0.0.40
codegen_flags: <defaults>
</compile_context>

<pallas_src>
import functools

import jax
import jax.numpy as jnp
from jax.experimental import pallas as pl
from jax.experimental.pallas import tpu as pltpu


def attention_kernel(enc_ref, dec_ref, weT_ref, be_ref, wdT_ref, bd_ref,
                     wf_ref, bf_ref, awe_ref, alpha_ref, *, n_valid, mxu_dtype):
    tb, n_pad, e = enc_ref.shape
    a = weT_ref.shape[1]

    enc = enc_ref[...]                       # (TB, Np, E) f32
    enc_mx = enc.astype(mxu_dtype)           # MXU operand dtype (bf16 on v6e/v7x)

    # attn1: one big (TB*Np, E) @ (E, A) contraction; weights pre-transposed in the
    # wrapper so the kernel never does a .T (no per-step XLU transpose).
    attn1 = jnp.dot(enc_mx.reshape(tb * n_pad, e), weT_ref[...],
                    preferred_element_type=jnp.float32).reshape(tb, n_pad, a)

    # attn2 for the whole batch tile at once: (TB, D) @ (D, A); fold both biases in.
    attn2 = (jnp.dot(dec_ref[...].astype(mxu_dtype), wdT_ref[...],
                     preferred_element_type=jnp.float32)
             + bd_ref[...] + be_ref[...])                       # (TB, A)

    pre = jnp.maximum(attn1 + attn2[:, None, :], 0.0)           # (TB, Np, A)

    # full_attn (A -> 1): VPU multiply + lane reduce instead of a 1-column MXU matmul.
    score = jnp.sum(pre * wf_ref[...], axis=-1) + bf_ref[...]   # (TB, Np)

    # Mask padded pixel columns out of the softmax (padding exists only to keep the
    # alpha store lane-dense).
    if n_valid < n_pad:
        col = jax.lax.broadcasted_iota(jnp.int32, (tb, n_pad), 1)
        score = jnp.where(col < n_valid, score, -1e30)

    # Softmax over the (lane-major) pixel axis; approx reciprocal rides the EUP slot.
    m = jnp.max(score, axis=-1, keepdims=True)
    ex = jnp.exp(score - m)
    alpha = ex * pl.reciprocal(jnp.sum(ex, axis=-1, keepdims=True), approx=True)

    # Attention-weighted encoding as a batched MXU matmul: (TB,1,Np) @ (TB,Np,E).
    awe = jnp.einsum('bqn,bne->bqe',
                     alpha[:, None, :].astype(mxu_dtype), enc_mx,
                     preferred_element_type=jnp.float32).reshape(tb, e)

    awe_ref[...] = awe.astype(awe_ref.dtype)
    alpha_ref[...] = alpha.astype(alpha_ref.dtype)   # (TB, Np): lane-dense store


def attention_forward(encoder_out, decoder_hidden, params, *, batch_tile=None,
                      mxu_dtype=jnp.float32):
    """encoder_out (B,N,E), decoder_hidden (B,D) -> (awe (B,E), alpha (B,N))."""
    B, N, E = encoder_out.shape
    _, D = decoder_hidden.shape
    we, be, wd, bd, wf, bf = params
    A = we.shape[0]

    # One-time layout plumbing (wrapper side, outside the grid loop):
    # pre-transposed weights, biases as 2-D rows, full_attn weight as a row vector.
    weT = we.T.astype(mxu_dtype)                 # (E, A)
    wdT = wd.T.astype(mxu_dtype)                 # (D, A)
    be2 = be.reshape(1, A).astype(jnp.float32)
    bd2 = bd.reshape(1, A).astype(jnp.float32)
    wfr = wf.reshape(1, A).astype(jnp.float32)
    bf2 = bf.reshape(1, 1).astype(jnp.float32)

    # Lane-dense pixel axis: pad N to a multiple of 128 so the alpha store is an
    # unmasked dense vst; padded columns are masked out of the softmax in-kernel.
    n_pad = pl.cdiv(N, 128) * 128
    enc_p = (encoder_out if n_pad == N
             else jnp.pad(encoder_out, ((0, 0), (0, n_pad - N), (0, 0))))

    # Batch tiling: each grid step feeds TB*Np rows to the MXU instead of N rows
    # per batch element (amortizes per-step pipeline overhead).
    tb = batch_tile if batch_tile is not None else min(B, 128)
    grid = (pl.cdiv(B, tb),)

    grid_spec = pltpu.PrefetchScalarGridSpec(
        num_scalar_prefetch=0,
        grid=grid,
        in_specs=[
            pl.BlockSpec((tb, n_pad, E), lambda b: (b, 0, 0)),   # encoder_out tile
            pl.BlockSpec((tb, D),        lambda b: (b, 0)),      # decoder_hidden tile
            pl.BlockSpec((E, A),         lambda b: (0, 0)),      # We^T (grid-invariant)
            pl.BlockSpec((1, A),         lambda b: (0, 0)),      # b_enc
            pl.BlockSpec((D, A),         lambda b: (0, 0)),      # Wd^T (grid-invariant)
            pl.BlockSpec((1, A),         lambda b: (0, 0)),      # b_dec
            pl.BlockSpec((1, A),         lambda b: (0, 0)),      # W_full as a row
            pl.BlockSpec((1, 1),         lambda b: (0, 0)),      # b_full
        ],
        out_specs=[
            pl.BlockSpec((tb, E),     lambda b: (b, 0)),         # awe
            pl.BlockSpec((tb, n_pad), lambda b: (b, 0)),         # alpha (lane-dense)
        ],
    )

    kernel = functools.partial(attention_kernel, n_valid=N, mxu_dtype=mxu_dtype)
    # TODO(synk): at real sizes on v7x (64 MiB VMEM) set vmem_limit_bytes explicitly
    # and single-buffer the invariant weight specs (pipeline_mode=pl.Buffered(1));
    # on v6e/v7x pass mxu_dtype=jnp.bfloat16 for ~2x MXU throughput.
    awe, alpha_p = pl.pallas_call(
        kernel,
        out_shape=(jax.ShapeDtypeStruct((B, E), jnp.float32),
                   jax.ShapeDtypeStruct((B, n_pad), jnp.float32)),
        grid_spec=grid_spec,
        compiler_params=pltpu.CompilerParams(
            dimension_semantics=("parallel",)),   # batch axis shards across TCs (v7x)
    )(enc_p, decoder_hidden, weT, be2, wdT, bd2, wfr, bf2)

    return awe, alpha_p[:, :N]


def init_params(key, encoder_dim, decoder_dim, attention_dim):
    ks = jax.random.split(key, 6)

    def lin(kw, kb, out_f, in_f):
        bound = 1.0 / jnp.sqrt(in_f)
        w = jax.random.uniform(kw, (out_f, in_f), jnp.float32, -bound, bound)
        b = jax.random.uniform(kb, (out_f,), jnp.float32, -bound, bound)
        return w, b

    we, be = lin(ks[0], ks[1], attention_dim, encoder_dim)
    wd, bd = lin(ks[2], ks[3], attention_dim, decoder_dim)
    wf, bf = lin(ks[4], ks[5], 1, attention_dim)
    return (we, be, wd, bd, wf, bf)


def reference_forward(encoder_out, decoder_hidden, params):
    we, be, wd, bd, wf, bf = params
    attn1 = jnp.einsum('bne,ae->bna', encoder_out, we) + be
    attn2 = jnp.einsum('bd,ad->ba', decoder_hidden, wd) + bd
    pre = jax.nn.relu(attn1 + attn2[:, None, :])
    score = jnp.einsum('bna,oa->bno', pre, wf) + bf        # (B, N, 1)
    alpha = jax.nn.softmax(score, axis=1)
    awe = jnp.sum(encoder_out * alpha, axis=1)
    return awe, alpha[..., 0]


if __name__ == "__main__":
    B, N = 16, 8
    encoder_dim, decoder_dim, attention_dim = 32, 32, 32

    key = jax.random.PRNGKey(0)
    k_enc, k_dec, k_par = jax.random.split(key, 3)

    encoder_out = jax.random.normal(k_enc, (B, N, encoder_dim), jnp.float32)
    decoder_hidden = jax.random.normal(k_dec, (B, decoder_dim), jnp.float32)
    params = init_params(k_par, encoder_dim, decoder_dim, attention_dim)

    awe, alpha = attention_forward(encoder_out, decoder_hidden, params, batch_tile=8)
    jax.block_until_ready((awe, alpha))

    awe_ref, alpha_ref = reference_forward(encoder_out, decoder_hidden, params)
    # approx=True reciprocal in the softmax -> slightly looser tolerance than exact.
    assert jnp.allclose(awe, awe_ref, atol=2e-3, rtol=2e-3), \
        float(jnp.max(jnp.abs(awe - awe_ref)))
    assert jnp.allclose(alpha, alpha_ref, atol=2e-3, rtol=2e-3), \
        float(jnp.max(jnp.abs(alpha - alpha_ref)))

    print("KERNEL_OK")
</pallas_src>

<mosaic_0001>
module attributes {stable_mosaic.version = 11 : i64} {
  func.func @attention_kernel(%arg0: i32, %arg1: memref<8x128x32xf32, #tpu.memory_space<vmem>>, %arg2: memref<8x32xf32, #tpu.memory_space<vmem>>, %arg3: memref<32x32xf32, #tpu.memory_space<vmem>>, %arg4: memref<1x32xf32, #tpu.memory_space<vmem>>, %arg5: memref<32x32xf32, #tpu.memory_space<vmem>>, %arg6: memref<1x32xf32, #tpu.memory_space<vmem>>, %arg7: memref<1x32xf32, #tpu.memory_space<vmem>>, %arg8: memref<1x1xf32, #tpu.memory_space<vmem>>, %arg9: memref<8x32xf32, #tpu.memory_space<vmem>>, %arg10: memref<8x128xf32, #tpu.memory_space<vmem>>) attributes {dimension_semantics = [#tpu.dimension_semantics<parallel>], iteration_bounds = array<i64: 2>, scalar_prefetch = 0 : i64, scratch_operands = 0 : i64, tpu.core_type = #tpu.core_type<tc>, window_params = [{transform_indices = @transform_0, window_bounds = array<i64: 8, 128, 32>}, {transform_indices = @transform_1, window_bounds = array<i64: 8, 32>}, {pipeline_mode = #tpu.pipeline_mode<synchronous>, transform_indices = @transform_2, window_bounds = array<i64: 32, 32>}, {pipeline_mode = #tpu.pipeline_mode<synchronous>, transform_indices = @transform_3, window_bounds = array<i64: 1, 32>}, {pipeline_mode = #tpu.pipeline_mode<synchronous>, transform_indices = @transform_4, window_bounds = array<i64: 32, 32>}, {pipeline_mode = #tpu.pipeline_mode<synchronous>, transform_indices = @transform_5, window_bounds = array<i64: 1, 32>}, {pipeline_mode = #tpu.pipeline_mode<synchronous>, transform_indices = @transform_6, window_bounds = array<i64: 1, 32>}, {pipeline_mode = #tpu.pipeline_mode<synchronous>, transform_indices = @transform_7, window_bounds = array<i64: 1, 1>}, {transform_indices = @transform_8, window_bounds = array<i64: 8, 32>}, {transform_indices = @transform_9, window_bounds = array<i64: 8, 128>}]} {
    %c0 = arith.constant 0 : index
    %c0_0 = arith.constant 0 : index
    %c0_1 = arith.constant 0 : index
    %0 = vector.load %arg1[%c0, %c0_0, %c0_1] : memref<8x128x32xf32, #tpu.memory_space<vmem>>, vector<8x128x32xf32>
    %1 = vector.shape_cast %0 : vector<8x128x32xf32> to vector<1024x32xf32>
    %c0_2 = arith.constant 0 : index
    %c0_3 = arith.constant 0 : index
    %2 = vector.load %arg3[%c0_2, %c0_3] : memref<32x32xf32, #tpu.memory_space<vmem>>, vector<32x32xf32>
    %cst = arith.constant dense<0.000000e+00> : vector<1024x32xf32>
    %3 = tpu.matmul %1, %2, %cst {dimension_numbers = #tpu.dot_dimension_numbers<[1], [0], [0], [1], [0, 0, 1, 1], [], []>} : vector<1024x32xf32>, vector<32x32xf32>, vector<1024x32xf32> -> vector<1024x32xf32>
    %4 = vector.shape_cast %3 : vector<1024x32xf32> to vector<8x128x32xf32>
    %c0_4 = arith.constant 0 : index
    %c0_5 = arith.constant 0 : index
    %5 = vector.load %arg2[%c0_4, %c0_5] : memref<8x32xf32, #tpu.memory_space<vmem>>, vector<8x32xf32>
    %c0_6 = arith.constant 0 : index
    %c0_7 = arith.constant 0 : index
    %6 = vector.load %arg5[%c0_6, %c0_7] : memref<32x32xf32, #tpu.memory_space<vmem>>, vector<32x32xf32>
    %cst_8 = arith.constant dense<0.000000e+00> : vector<8x32xf32>
    %7 = tpu.matmul %5, %6, %cst_8 {dimension_numbers = #tpu.dot_dimension_numbers<[1], [0], [0], [1], [0, 0, 1, 1], [], []>} : vector<8x32xf32>, vector<32x32xf32>, vector<8x32xf32> -> vector<8x32xf32>
    %c0_9 = arith.constant 0 : index
    %c0_10 = arith.constant 0 : index
    %8 = vector.load %arg6[%c0_9, %c0_10] : memref<1x32xf32, #tpu.memory_space<vmem>>, vector<1x32xf32>
    %9 = vector.broadcast %8 : vector<1x32xf32> to vector<8x32xf32>
    %10 = arith.addf %7, %9 : vector<8x32xf32>
    %c0_11 = arith.constant 0 : index
    %c0_12 = arith.constant 0 : index
    %11 = vector.load %arg4[%c0_11, %c0_12] : memref<1x32xf32, #tpu.memory_space<vmem>>, vector<1x32xf32>
    %12 = vector.broadcast %11 : vector<1x32xf32> to vector<8x32xf32>
    %13 = arith.addf %10, %12 : vector<8x32xf32>
    %14 = vector.shape_cast %13 : vector<8x32xf32> to vector<8x1x32xf32>
    %15 = vector.broadcast %14 : vector<8x1x32xf32> to vector<8x128x32xf32>
    %16 = arith.addf %4, %15 : vector<8x128x32xf32>
    %cst_13 = arith.constant 0.000000e+00 : f32
    %17 = vector.broadcast %cst_13 : f32 to vector<8x128x32xf32>
    %18 = arith.maximumf %16, %17 : vector<8x128x32xf32>
    %c0_14 = arith.constant 0 : index
    %c0_15 = arith.constant 0 : index
    %19 = vector.load %arg7[%c0_14, %c0_15] : memref<1x32xf32, #tpu.memory_space<vmem>>, vector<1x32xf32>
    %20 = vector.shape_cast %19 : vector<1x32xf32> to vector<1x1x32xf32>
    %21 = vector.broadcast %20 : vector<1x1x32xf32> to vector<8x128x32xf32>
    %22 = arith.mulf %18, %21 : vector<8x128x32xf32>
    %cst_16 = arith.constant dense<0.000000e+00> : vector<8x128xf32>
    %23 = vector.multi_reduction <add>, %22, %cst_16 [2] : vector<8x128x32xf32> to vector<8x128xf32>
    %c0_17 = arith.constant 0 : index
    %c0_18 = arith.constant 0 : index
    %24 = vector.load %arg8[%c0_17, %c0_18] : memref<1x1xf32, #tpu.memory_space<vmem>>, vector<1x1xf32>
    %25 = vector.broadcast %24 : vector<1x1xf32> to vector<8x128xf32>
    %26 = arith.addf %23, %25 : vector<8x128xf32>
    %27 = tpu.iota {dimensions = array<i32: 1>} : vector<8x128xi32>
    %c8_i32 = arith.constant 8 : i32
    %28 = vector.broadcast %c8_i32 : i32 to vector<8x128xi32>
    %29 = arith.cmpi slt, %27, %28 : vector<8x128xi32>
    %cst_19 = arith.constant -1.000000e+30 : f32
    %30 = vector.broadcast %cst_19 : f32 to vector<8x128xf32>
    %31 = arith.select %29, %26, %30 : vector<8x128xi1>, vector<8x128xf32>
    %cst_20 = arith.constant dense<0xFF800000> : vector<8xf32>
    %32 = vector.multi_reduction <maximumf>, %31, %cst_20 [1] : vector<8x128xf32> to vector<8xf32>
    %33 = vector.shape_cast %32 : vector<8xf32> to vector<8x1xf32>
    %34 = vector.broadcast %33 : vector<8x1xf32> to vector<8x128xf32>
    %35 = arith.subf %31, %34 : vector<8x128xf32>
    %36 = math.exp %35 : vector<8x128xf32>
    %cst_21 = arith.constant dense<0.000000e+00> : vector<8xf32>
    %37 = vector.multi_reduction <add>, %36, %cst_21 [1] : vector<8x128xf32> to vector<8xf32>
    %38 = vector.shape_cast %37 : vector<8xf32> to vector<8x1xf32>
    %39 = tpu.reciprocal %38 {approx = true} : vector<8x1xf32> -> vector<8x1xf32>
    %40 = vector.broadcast %39 : vector<8x1xf32> to vector<8x128xf32>
    %41 = arith.mulf %36, %40 : vector<8x128xf32>
    %42 = vector.shape_cast %41 : vector<8x128xf32> to vector<8x1x128xf32>
    "tpu.trace_start"() <{level = 10 : i32, message = "bqn,bne->bqe"}> : () -> ()
    %cst_22 = arith.constant dense<0.000000e+00> : vector<8x1x32xf32>
    %43 = tpu.matmul %42, %0, %cst_22 {dimension_numbers = #tpu.dot_dimension_numbers<[2], [1], [1], [2], [0, 0, 0, 1, 1, 2], [0], [0]>} : vector<8x1x128xf32>, vector<8x128x32xf32>, vector<8x1x32xf32> -> vector<8x1x32xf32>
    "tpu.trace_stop"() : () -> ()
    %44 = vector.shape_cast %43 : vector<8x1x32xf32> to vector<8x32xf32>
    %c0_23 = arith.constant 0 : index
    %c0_24 = arith.constant 0 : index
    %45 = vector.load %arg9[%c0_23, %c0_24] : memref<8x32xf32, #tpu.memory_space<vmem>>, vector<8x32xf32>
    tpu.vector_store %arg9[%c0_23, %c0_24], %44 {strides = array<i32>} : memref<8x32xf32, #tpu.memory_space<vmem>>, vector<8x32xf32>,
    %c0_25 = arith.constant 0 : index
    %c0_26 = arith.constant 0 : index
    %46 = vector.load %arg10[%c0_25, %c0_26] : memref<8x128xf32, #tpu.memory_space<vmem>>, vector<8x128xf32>
    tpu.vector_store %arg10[%c0_25, %c0_26], %41 {strides = array<i32>} : memref<8x128xf32, #tpu.memory_space<vmem>>, vector<8x128xf32>,
    return
  }
  func.func @transform_0(%arg0: i32) -> (i32, i32, i32) {
    %c0_i32 = arith.constant 0 : i32
    %c0_i32_0 = arith.constant 0 : i32
    %c0_i32_1 = arith.constant 0 : i32
    return %arg0, %c0_i32, %c0_i32_0 : i32, i32, i32
  }
  func.func @transform_1(%arg0: i32) -> (i32, i32) {
    %c0_i32 = arith.constant 0 : i32
    %c0_i32_0 = arith.constant 0 : i32
    return %arg0, %c0_i32 : i32, i32
  }
  func.func @transform_2(%arg0: i32) -> (i32, i32) {
    %c0_i32 = arith.constant 0 : i32
    %c0_i32_0 = arith.constant 0 : i32
    %c0_i32_1 = arith.constant 0 : i32
    return %c0_i32, %c0_i32_0 : i32, i32
  }
  func.func @transform_3(%arg0: i32) -> (i32, i32) {
    %c0_i32 = arith.constant 0 : i32
    %c0_i32_0 = arith.constant 0 : i32
    %c0_i32_1 = arith.constant 0 : i32
    return %c0_i32, %c0_i32_0 : i32, i32
  }
  func.func @transform_4(%arg0: i32) -> (i32, i32) {
    %c0_i32 = arith.constant 0 : i32
    %c0_i32_0 = arith.constant 0 : i32
    %c0_i32_1 = arith.constant 0 : i32
    return %c0_i32, %c0_i32_0 : i32, i32
  }
  func.func @transform_5(%arg0: i32) -> (i32, i32) {
    %c0_i32 = arith.constant 0 : i32
    %c0_i32_0 = arith.constant 0 : i32
    %c0_i32_1 = arith.constant 0 : i32
    return %c0_i32, %c0_i32_0 : i32, i32
  }
  func.func @transform_6(%arg0: i32) -> (i32, i32) {
    %c0_i32 = arith.constant 0 : i32
    %c0_i32_0 = arith.constant 0 : i32
    %c0_i32_1 = arith.constant 0 : i32
    return %c0_i32, %c0_i32_0 : i32, i32
  }
  func.func @transform_7(%arg0: i32) -> (i32, i32) {
    %c0_i32 = arith.constant 0 : i32
    %c0_i32_0 = arith.constant 0 : i32
    %c0_i32_1 = arith.constant 0 : i32
    return %c0_i32, %c0_i32_0 : i32, i32
  }
  func.func @transform_8(%arg0: i32) -> (i32, i32) {
    %c0_i32 = arith.constant 0 : i32
    %c0_i32_0 = arith.constant 0 : i32
    return %arg0, %c0_i32 : i32, i32
  }
  func.func @transform_9(%arg0: i32) -> (i32, i32) {
    %c0_i32 = arith.constant 0 : i32
    %c0_i32_0 = arith.constant 0 : i32
    return %arg0, %c0_i32 : i32, i32
  }
}

</mosaic_0001>

<bundles_post_ra>
// kernel: tpu_custom_call.1
= control target key start
LH: loop header
LB: loop body
LE: loop exit
PB: predicated region body
PF: predicated region fallthrough
CT: control target
= control target key end

     0   :  { %s7896_s0 = inlined_call_operand.vmem [shape: f32[16,128,32], index: 0, kind: input, shape index: {}]   ;;  %s7897_s1 = inlined_call_operand.vmem [shape: f32[16,32], index: 1, kind: input, shape index: {}]   ;;  %s7898_s2 = inlined_call_operand.vmem [shape: f32[32,32], index: 2, kind: input, shape index: {}]   ;;  %s7899_s3 = inlined_call_operand.vmem [shape: f32[1,32], index: 3, kind: input, shape index: {}]   ;;  %s7900_s4 = inlined_call_operand.vmem [shape: f32[32,32], index: 4, kind: input, shape index: {}]   ;;  %s7901_s5 = inlined_call_operand.vmem [shape: f32[1,32], index: 5, kind: input, shape index: {}]   ;;  %s7902_s6 = inlined_call_operand.vmem [shape: f32[1,32], index: 6, kind: input, shape index: {}]   ;;  %s7903_s7 = inlined_call_operand.<no memory space> [shape: f32[1,1], index: 7, kind: input, shape index: {}]   ;;  %s7904_s8 = inlined_call_operand.hbm [shape: f32[16,32], index: 8, kind: output, shape index: {0}]   ;;  %s7905_s9 = inlined_call_operand.hbm [shape: f32[16,128], index: 9, kind: output, shape index: {1}]  }
   0x1   :  { %v15_v0 = vstv %s7903_s7 }
   0x2   :  { %16 = vst [vmem:[#allocation2] sm:$0x1] %v15_v0 }
   0x3   :  { %17 = vsyncpa [#allocation4], 0 }
   0x4   :  { %19 = vsyncpa [#allocation4 + $0x1], 0 }
   0x5   :  { %20 = vsyncpa [#allocation6], 0 }
   0x6   :  { %22 = vsyncpa [#allocation6 + $0x1], 0  ;;  %s5688_s11 = smov 0   ;;  %s5690_s12 = smov 0  }
   0x7   :  { %s5692_s13 = smov 0   ;;  %s5694_s14 = smov 0  }
   0x8 LB: > { %s5709_s7 = sadd.s32 4294967295, %s5626_s14   ;;  %s4280_s15 = sadd.s32 4294967294, %s5626_s14   ;;  %s5626_s14 = sphi %s5694_s14, %s8044_s14   ;;  %s5622_s13 = sphi %s5692_s13, %s8043_s13   ;;  %s5618_s12 = sphi %s5690_s12, %s8042_s12   ;;  %s5614_s11 = sphi %s5688_s11, %s8041_s11  }
   0x9   : > { %s5713_s16 = sadd.s32 1, %s5626_s14   ;;  %s213_s17 = sadd.s32 1, %s5622_s13 }
   0xa   : > { %s210_s18 = ssub.s32 %s5626_s14, %s5713_s16  ;;  %p223_p0 = scmp.ne.s32.totalorder %s5622_s13, %s5618_s12 }
   0xb   : > { %p211_p1 = scmp.eq.s32.totalorder %s210_s18, 0  ;;  %p224_p2 = scmp.eq.s32.totalorder %s5709_s7, 1 }
   0xc   : > { %p229_p3 = scmp.ne.s32.totalorder %s5618_s12, %s5614_s11  ;;  %p230_p4 = scmp.eq.s32.totalorder %s4280_s15, 1 }
   0xd   : > { %s5724_s19 = scalar_select %p211_p1, %s5622_s13, %s213_s17  }
   0xe   : > { %p5726_p5 = por %p224_p2, %p223_p0  ;;  %p5730_p6 = por %p230_p4, %p229_p3 }
   0xf   : > { %p4283_p7 = scmp.ge.s32.totalorder %s5626_s14, 1  ;;  %p309_p8 = scmp.lt.s32.totalorder %s5626_s14, 3 }
  0x11   : > { %p310_p9 = pnand %p4283_p7, %p309_p8 }
  0x13   : > { %313 = sbr.rel (%p310_p9) target bundleno = 1451 (0x5ab), region = 52 }
  0x1a   : > { %v494_v1 = vld [vmem:[%s7898_s2] sm:$0xff]  ;;  %v495_v2 = vld [vmem:[%s7898_s2 + $0x8] sm:$0xff]  ;;  %v496_v3 = vld [vmem:[%s7898_s2 + $0x10] sm:$0xff]  ;;  %s4286_s28 = sshll.u32 %s5709_s7, 3  ;;  %vm7943_vm0 = vcmask 261120   ;;  %v7906_v19 = vmov 0.0|0.0  }
  0x1b   : > { %v5194_v4 = vpack.c.bf16 %v495_v2, %v494_v1  ;;  %v497_v5 = vld [vmem:[%s7898_s2 + $0x18] sm:$0xff]  ;;  %p356_p10 = scmp.lt.s32.totalorder %s4286_s28, 15  ;;  %v1589_v7 = vld [vmem:[%s7900_s4] sm:$0xff]  ;;  %v1590_v8 = vld [vmem:[%s7900_s4 + $0x8] sm:$0xff]  ;;  %p362_p11 = scmp.lt.s32.totalorder %s5709_s7, 1  ;;  %vm7938_vm1 = vmmov 0  }
  0x1c   : > { %v5198_v6 = vpack.c.bf16 %v497_v5, %v496_v3  ;;  %v5203_v13 = vpack.c.bf16 %v1590_v8, %v1589_v7  ;;  %v1591_v14 = vld [vmem:[%s7900_s4 + $0x10] sm:$0xff]  ;;  %v1592_v23 = vld [vmem:[%s7900_s4 + $0x18] sm:$0xff]  ;;  %v7909_v7 = vmov 0.0   ;;  %v4420_v63 = vld [vmem:[%s7899_s3] ss:$0 sm:$0xff]  ;;  %vm2824_vm2 = vcmask 130112  }
  0x1d   : > { %5195 = vmatprep.subr.bf16.mxu0 %v5194_v4  ;;  %5400 = vmatprep.subr.bf16.mxu1 %v5194_v4  ;;  %s8046_s28 = smov (!%p356_p10, %s4286_s28), 15  ;;  %v5206_v29 = vpack.c.bf16 %v1592_v23, %v1591_v14  ;;  %vm2831_vm3 = vcmask 195712   ;;  %vm2838_vm4 = vcmask 261312   ;;  %vm2845_vm5 = vcmask 326912  }
  0x1e   : > { %5197 = vmatpush3.bf16.msra.mxu0 %v5194_v4  ;;  %5402 = vmatpush3.bf16.msra.mxu1 %v5194_v4  ;;  %s4429_s10 = sshll.u32 %s8046_s28, 7  ;;  %vm2852_vm6 = vcmask 392512   ;;  %vm2859_vm7 = vcmask 458112   ;;  %vm2866_vm8 = vcmask 523712   ;;  %vm2873_vm9 = vcmask 589312   ;;  %s5633_s28 = smov [#allocation5]  }
  0x1f   : > { %5199 = vmatprep.subr.bf16.mxu0 %v5198_v6  ;;  %5401 = vmatprep.subr.bf16.mxu1 %v5198_v6  ;;  %s5758_s25 = scalar_lea.vmem %s7896_s0, %s4429_s10  ;;  %vm2880_vm10 = vcmask 654912   ;;  %vm7942_vm11 = vcmask 720512   ;;  %vm2894_vm12 = vcmask 786112   ;;  %vm2901_vm13 = vcmask 851712   ;;  %s5536_s29 = sshll.u32 %s5633_s28, 4  ;;  %s5537_s29 = int_to_ptr.vmem [resolvable:$false] %s5536_s29 }
  0x20   : > { %v5761_v9 = vld [vmem:[%s5758_s25] sm:$0xff]  ;;  %v5767_v11 = vld [vmem:[%s5758_s25 + $0x8] sm:$0xff]  ;;  %v5782_v16 = vld [vmem:[%s5758_s25 + $0x10] sm:$0xff]  ;;  %s5835_s30 = scalar_select %p362_p11, %s5709_s7, 1  ;;  %vm7940_vm14 = vcmask 917312   ;;  %vm2915_vm15 = vcmask 982912  }
  0x21   : > { %v5764_v10 = vld [vmem:[%s5758_s25 + $0x3c0] sm:$0xff]  ;;  %v5770_v12 = vld [vmem:[%s5758_s25 + $0x3c8] sm:$0xff]  ;;  %4711 = vmatprep.mubr.msk.f32.mxu0 %vm7943_vm0, %v5761_v9  ;;  %v5785_v17 = vld [vmem:[%s5758_s25 + $0x3d0] sm:$0xff] }
  0x22   : > { %5201 = vmatpush3.bf16.msra.mxu0 %v5198_v6  ;;  %5403 = vmatpush3.bf16.msra.mxu1 %v5198_v6  ;;  %v5389_v15 = vpack.c.bf16 %v5770_v12, %v5764_v10  ;;  %v5788_v18 = vld [vmem:[%s5758_s25 + $0x3d8] sm:$0xff]  ;;  %v5794_v21 = vld [vmem:[%s5758_s25 + $0x3e0] sm:$0xff]  ;;  %v5797_v22 = vld [vmem:[%s5758_s25 + $0x3e8] sm:$0xff]  ;;  %s4289_s10 = sshll.u32 %s5835_s30, 3  ;;  %v5209_v6 = vpack.c.bf16 %v5767_v11, %v5761_v9  ;;  %s5538_s30 = scalar_lea.vmem %s5537_s29, 256 }
  0x23   : > { %4891 = vmatprep.mubr.msk.f32.mxu1 %vm7943_vm0, %v5764_v10  ;;  %5202 = vmatprep.subr.bf16.mxu1 %v7906_v19  ;;  %v5392_v20 = vpack.c.bf16 %v5788_v18, %v5785_v17  ;;  %v5395_v24 = vpack.c.bf16 %v5797_v22, %v5794_v21  ;;  %v5813_v25 = vld [vmem:[%s5758_s25 + $0x18] sm:$0xff]  ;;  %v5816_v26 = vld [vmem:[%s5758_s25 + $0x3f0] sm:$0xff]  ;;  %v5824_v28 = vld [vmem:[%s5758_s25 + $0x20] sm:$0xff]  ;;  %s365_s18 = scalar_lea.vmem %s7897_s1, %s4289_s10  ;;  %s7607_s10 = sand.u32 1, %s5618_s12  }
  0x24   : > { %5376 = vmatprep.subr.bf16.mxu0 %v7906_v19  ;;  %v5819_v27 = vld [vmem:[%s5758_s25 + $0x3f8] sm:$0xff]  ;;  %v5830_v31 = vld [vmem:[%s5758_s25 + $0x28] sm:$0xff]  ;;  %v5842_v32 = vld [vmem:[%s5758_s25 + $0x30] sm:$0xff]  ;;  %v5212_v9 = vpack.c.bf16 %v5813_v25, %v5782_v16  ;;  %s4284_s15 = sshll.u32 %s7607_s10, 3  ;;  %s4151_s26 = scalar_lea.sflag [#allocation6], %s7607_s10 }
  0x25   : > { %4712 = vmatmul.mubr.msk.f32.vlgmr.msra.gmra.mrb[0].mxu0 %vm7943_vm0, %v5767_v11  ;;  %4892 = vmatmul.mubr.msk.f32.vlgmr.msra.gmra.mrb[0].mxu1 %vm7943_vm0, %v5770_v12  ;;  %v5398_v30 = vpack.c.bf16 %v5819_v27, %v5816_v26  ;;  %v5845_v33 = vld [vmem:[%s5758_s25 + $0x80] sm:$0xff]  ;;  %v5848_v34 = vld [vmem:[%s5758_s25 + $0x88] sm:$0xff]  ;;  %v5857_v36 = vld [vmem:[%s5758_s25 + $0x90] sm:$0xff]  ;;  %v5215_v14 = vpack.c.bf16 %v5830_v31, %v5824_v28  ;;  %s7613_s17 = scalar_lea.vmem [#allocation5], %s4284_s15 }
  0x26   : > { %5204 = vmatpush3.bf16.msra.mxu1 %v5203_v13  ;;  %4714 = vmatprep.mubr.msk.f32.mxu0 %vm7943_vm0, %v5782_v16  ;;  %7949 = vst [vmem:[#allocation9_spill] sm:$0xff] %v5845_v33  ;;  %7950 = vst [vmem:[#allocation10_spill] sm:$0xff] %v5848_v34  ;;  %v5860_v37 = vld [vmem:[%s5758_s25 + $0x98] sm:$0xff]  ;;  %v5863_v38 = vld [vmem:[%s5758_s25 + $0xa0] sm:$0xff]  ;;  %s4177_s24 = sshll.u32 %s7613_s17, 4  ;;  %s4178_s24 = int_to_ptr.vmem [resolvable:$true] %s4177_s24 }
  0x27   : > { %4894 = vmatprep.mubr.msk.f32.mxu1 %vm7943_vm0, %v5785_v17  ;;  %5205 = vmatprep.subr.bf16.mxu1 %v7906_v19  ;;  %7951 = vst [vmem:[#allocation11_spill] sm:$0xff] %v5857_v36  ;;  %7952 = vst [vmem:[#allocation12_spill] sm:$0xff] %v5860_v37  ;;  %v5868_v40 = vld [vmem:[%s5758_s25 + $0xa8] sm:$0xff]  ;;  %v5871_v41 = vld [vmem:[%s5758_s25 + $0xb0] sm:$0xff]  ;;  %s5532_s27 = scalar_lea.vmem %s4178_s24, 128  ;;  %p5539_p1 = scmp.lt.s32.totalorder %s4178_s24, %s5537_s29 }
  0x28   : > { %7953 = vst [vmem:[#allocation13_spill] sm:$0xff] %v5863_v38  ;;  %7954 = vst [vmem:[#allocation14_spill] sm:$0xff] %v5868_v40  ;;  %v5874_v42 = vld [vmem:[%s5758_s25 + $0xb8] sm:$0xff]  ;;  %v5885_v46 = vld [vmem:[%s5758_s25 + $0xc0] sm:$0xff]  ;;  %p5533_p12 = scmp.ne.s32.totalorder %s4178_s24, %s5532_s27  ;;  %p5540_p2 = scmp.lt.s32.totalorder %s5538_s30, %s5532_s27 }
  0x29   : > { %4715 = vmatmul.mubr.msk.f32.gmra.mrb[2].mxu0 %vm7943_vm0, %v5813_v25  ;;  %4895 = vmatmul.mubr.msk.f32.gmra.mrb[2].mxu1 %vm7943_vm0, %v5788_v18  ;;  %7955 = vst [vmem:[#allocation15_spill] sm:$0xff] %v5871_v41  ;;  %7956 = vst [vmem:[#allocation16_spill] sm:$0xff] %v5874_v42  ;;  %v5877_v43 = vld [vmem:[%s5758_s25 + $0x38] sm:$0xff]  ;;  %v5888_v47 = vld [vmem:[%s5758_s25 + $0xc8] sm:$0xff] }
  0x2a   : > { %4717 = vmatprep.mubr.msk.f32.mxu0 %vm7943_vm0, %v5824_v28  ;;  %4897 = vmatprep.mubr.msk.f32.mxu1 %vm7943_vm0, %v5794_v21  ;;  %7957 = vst [vmem:[#allocation17_spill] sm:$0xff] %v5885_v46  ;;  %7958 = vst [vmem:[#allocation18_spill] sm:$0xff] %v5888_v47  ;;  %v5891_v48 = vld [vmem:[%s5758_s25 + $0xd0] sm:$0xff]  ;;  %v5899_v49 = vld [vmem:[%s5758_s25 + $0x40] sm:$0xff]  ;;  %v5218_v25 = vpack.c.bf16 %v5877_v43, %v5842_v32  ;;  %p5534_p13 = pnand %p5533_p12, %p5726_p5  ;;  %p5541_p3 = por %p5540_p2, %p5539_p1 }
  0x2b   : > { %5207 = vmatpush3.bf16.msra.mxu1 %v5206_v29  ;;  %7959 = vst [vmem:[#allocation19_spill] sm:$0xff] %v5891_v48  ;;  %v5904_v51 = vld [vmem:[%s5758_s25 + $0xd8] sm:$0xff]  ;;  %v5907_v52 = vld [vmem:[%s5758_s25 + $0xe0] sm:$0xff]  ;;  %v5910_v53 = vld [vmem:[%s5758_s25 + $0xe8] sm:$0xff] }
  0x2c   : > { %5208 = vmatprep.subr.bf16.mxu1 %v7906_v19  ;;  %7960 = vst [vmem:[#allocation20_spill] sm:$0xff] %v5904_v51  ;;  %7961 = vst [vmem:[#allocation21_spill] sm:$0xff] %v5907_v52  ;;  %v5921_v56 = vld [vmem:[%s5758_s25 + $0xf0] sm:$0xff]  ;;  %v5924_v57 = vld [vmem:[%s5758_s25 + $0xf8] sm:$0xff]  ;;  %p5535_p0 = pneg %p5534_p13 }
  0x2d   : > { %4718 = vmatmul.mubr.msk.f32.gmra.mrb[4].mxu0 %vm7943_vm0, %v5830_v31  ;;  %4898 = vmatmul.mubr.msk.f32.gmra.mrb[4].mxu1 %vm7943_vm0, %v5797_v22  ;;  %7962 = vst [vmem:[#allocation22_spill] sm:$0xff] %v5910_v53  ;;  %7963 = vst [vmem:[#allocation23_spill] sm:$0xff] %v5921_v56  ;;  %v5927_v58 = vld [vmem:[%s5758_s25 + $0x100] sm:$0xff]  ;;  %v5935_v60 = vld [vmem:[%s5758_s25 + $0x108] sm:$0xff] }
  0x2e   : > { %4720 = vmatprep.mubr.msk.f32.mxu0 %vm7943_vm0, %v5842_v32  ;;  %4900 = vmatprep.mubr.msk.f32.mxu1 %vm7943_vm0, %v5816_v26  ;;  %7964 = vst [vmem:[#allocation24_spill] sm:$0xff] %v5924_v57  ;;  %7965 = vst [vmem:[#allocation25_spill] sm:$0xff] %v5927_v58  ;;  %v5938_v61 = vld [vmem:[%s5758_s25 + $0x110] sm:$0xff]  ;;  %v5941_v62 = vld [vmem:[%s5758_s25 + $0x118] sm:$0xff]  ;;  %p5542_p4 = pnand %p5541_p3, %p5535_p0 }
  0x2f   : > { %7966 = vst [vmem:[#allocation26_spill] sm:$0xff] %v5935_v60  ;;  %7967 = vst [vmem:[#allocation27_spill] sm:$0xff] %v5938_v61  ;;  %v5948_v1 = vld [vmem:[%s5758_s25 + $0x120] sm:$0xff]  ;;  %v5951_v2 = vld [vmem:[%s5758_s25 + $0x128] sm:$0xff] }
  0x30   : > { %7968 = vst [vmem:[#allocation28_spill] sm:$0xff] %v5941_v62  ;;  %7969 = vst [vmem:[#allocation29_spill] sm:$0xff] %v5948_v1  ;;  %v5960_v4 = vld [vmem:[%s5758_s25 + $0x130] sm:$0xff]  ;;  %v5963_v5 = vld [vmem:[%s5758_s25 + $0x138] sm:$0xff] }
  0x31   : > { %7970 = vst [vmem:[#allocation30_spill] sm:$0xff] %v5951_v2  ;;  %4721 = vmatmul.mubr.msk.f32.gmra.mrb[6].mxu0 %vm7943_vm0, %v5877_v43  ;;  %4901 = vmatmul.mubr.msk.f32.gmra.mrb[6].mxu1 %vm7943_vm0, %v5819_v27  ;;  %7971 = vst [vmem:[#allocation31_spill] sm:$0xff] %v5960_v4  ;;  %v375_v8 = vld [vmem:[%s5758_s25 + $0x48] sm:$0xff]  ;;  %v1588_v13 = vld [vmem:[%s365_s18] sm:$0xff] }
  0x32   : > { %7972 = vst [vmem:[#allocation32_spill] sm:$0xff] %v5963_v5  ;;  %4723 = vmatprep.mubr.msk.f32.mxu0 %vm7943_vm0, %v5899_v49  ;;  %4911 = vmatprep.mubr.msk.f32.mxu1 %vm7938_vm1, %v7909_v7  ;;  %v376_v23 = vld [vmem:[%s5758_s25 + $0x50] sm:$0xff]  ;;  %v377_v11 = vld [vmem:[%s5758_s25 + $0x58] sm:$0xff]  ;;  %v378_v29 = vld [vmem:[%s5758_s25 + $0x60] sm:$0xff]  ;;  %v5221_v28 = vpack.c.bf16 %v375_v8, %v5899_v49 }
  0x33   : > { %v380_v16 = vld [vmem:[%s5758_s25 + $0x70] sm:$0xff]  ;;  %v5224_v31 = vpack.c.bf16 %v377_v11, %v376_v23  ;;  %v406_v49 = vld [vmem:[%s5758_s25 + $0x140] sm:$0xff]  ;;  %v437_v10 = vld [vmem:[%s5758_s25 + $0x238] sm:$0xff] }
  0x34   : > { %v438_v12 = vld [vmem:[%s5758_s25 + $0x240] sm:$0xff]  ;;  %v440_v17 = vld [vmem:[%s5758_s25 + $0x250] sm:$0xff]  ;;  %v441_v18 = vld [vmem:[%s5758_s25 + $0x258] sm:$0xff] }
  0x35   : > { %4724 = vmatmul.mubr.msk.f32.gmra.mrb[8].mxu0 %vm7943_vm0, %v375_v8  ;;  %4912 = vmatmul.mubr.msk.f32.vlgmr.msra.gmra.mrb[8].mxu1 %vm7943_vm0, %v1588_v13  ;;  %v379_v13 = vld [vmem:[%s5758_s25 + $0x68] sm:$0xff]  ;;  %v444_v22 = vld [vmem:[%s5758_s25 + $0x270] sm:$0xff]  ;;  %v446_v26 = vld [vmem:[%s5758_s25 + $0x280] sm:$0xff] }
  0x36   : > { %4726 = vmatprep.mubr.msk.f32.mxu0 %vm7943_vm0, %v376_v23  ;;  %5210 = vmatpush3.bf16.msra.mxu1 %v5209_v6  ;;  %v381_v6 = vld [vmem:[%s5758_s25 + $0x78] sm:$0xff]  ;;  %v5227_v32 = vpack.c.bf16 %v379_v13, %v378_v29  ;;  %v407_v8 = vld [vmem:[%s5758_s25 + $0x148] sm:$0xff]  ;;  %v5631_v23 = vmov 0  }
  0x37   : > { %5211 = vmatprep.subr.bf16.mxu1 %v7906_v19  ;;  %4946 = vmatprep.mubr.msk.f32.mxu1 %vm7938_vm1, %v7909_v7  ;;  %v5230_v43 = vpack.c.bf16 %v381_v6, %v380_v16  ;;  %v443_v21 = vld [vmem:[%s5758_s25 + $0x268] sm:$0xff] }
  0x38   : > { %5453 = vset.pattern.permute.xlu1 %v5631_v23  ;;  %5454 = vset.pattern.permute.xlu0 %v5631_v23  ;;  %v419_v23 = vld [vmem:[%s5758_s25 + $0x1a8] sm:$0xff] }
  0x39   : > { %4727 = vmatmul.mubr.msk.f32.gmra.mrb[10].mxu0 %vm7943_vm0, %v377_v11  ;;  %v409_v11 = vld [vmem:[%s5758_s25 + $0x158] sm:$0xff]  ;;  %v447_v27 = vld [vmem:[%s5758_s25 + $0x288] sm:$0xff] }
  0x3a   : > { %4729 = vmatprep.mubr.msk.f32.mxu0 %vm7943_vm0, %v378_v29  ;;  %5213 = vmatpush3.bf16.msra.mxu1 %v5212_v9  ;;  %v4422_v9 = vld [vmem:[#allocation2] ss:$0 sm:$0xff] }
  0x3b   : > { %5214 = vmatprep.subr.bf16.mxu1 %v7906_v19  ;;  %2553 = vperm.xlu1 %5453, %v4422_v9   ;;  %v410_v29 = vld [vmem:[%s5758_s25 + $0x160] sm:$0xff]  ;;  %v420_v9 = vld [vmem:[%s5758_s25 + $0x1b0] sm:$0xff] }
  0x3d   : > { %4730 = vmatmul.mubr.msk.f32.gmra.mrb[12].mxu0 %vm7943_vm0, %v379_v13  ;;  %v411_v13 = vld [vmem:[%s5758_s25 + $0x168] sm:$0xff] }
  0x3e   : > { %4732 = vmatprep.mubr.msk.f32.mxu0 %vm7943_vm0, %v380_v16  ;;  %5216 = vmatpush3.bf16.msra.mxu1 %v5215_v14  ;;  %v408_v14 = vld [vmem:[%s5758_s25 + $0x150] sm:$0xff] }
  0x3f   : > { %5217 = vmatprep.subr.bf16.mxu1 %v7906_v19  ;;  %v412_v16 = vld [vmem:[%s5758_s25 + $0x170] sm:$0xff] }
  0x41   : > { %4733 = vmatmul.mubr.msk.f32.gmra.mrb[14].mxu0 %vm7943_vm0, %v381_v6  ;;  %v414_v6 = vld [vmem:[%s5758_s25 + $0x180] sm:$0xff] }
  0x42   : > { %4735 = vmatprep.mubr.msk.f32.mxu0 %vm7943_vm0, %v5845_v33  ;;  %5219 = vmatpush3.bf16.msra.mxu1 %v5218_v25  ;;  %v413_v25 = vld [vmem:[%s5758_s25 + $0x178] sm:$0xff] }
  0x43   : > { %5220 = vmatprep.subr.bf16.mxu1 %v7906_v19 }
  0x45   : > { %4736 = vmatmul.mubr.msk.f32.gmra.mrb[16].mxu0 %vm7943_vm0, %v5848_v34 }
  0x46   : > { %4738 = vmatprep.mubr.msk.f32.mxu0 %vm7943_vm0, %v5857_v36  ;;  %5222 = vmatpush3.bf16.msra.mxu1 %v5221_v28  ;;  %v415_v28 = vld [vmem:[%s5758_s25 + $0x188] sm:$0xff] }
  0x47   : > { %5223 = vmatprep.subr.bf16.mxu1 %v7906_v19 }
  0x49   : > { %4739 = vmatmul.mubr.msk.f32.gmra.mrb[18].mxu0 %vm7943_vm0, %v5860_v37 }
  0x4a   : > { %4741 = vmatprep.mubr.msk.f32.mxu0 %vm7943_vm0, %v5863_v38  ;;  %5225 = vmatpush3.bf16.msra.mxu1 %v5224_v31  ;;  %v416_v31 = vld [vmem:[%s5758_s25 + $0x190] sm:$0xff] }
  0x4b   : > { %5226 = vmatprep.subr.bf16.mxu1 %v7906_v19 }
  0x4d   : > { %4742 = vmatmul.mubr.msk.f32.gmra.mrb[20].mxu0 %vm7943_vm0, %v5868_v40 }
  0x4e   : > { %4744 = vmatprep.mubr.msk.f32.mxu0 %vm7943_vm0, %v5871_v41  ;;  %5228 = vmatpush3.bf16.msra.mxu1 %v5227_v32  ;;  %v6074_v32 = vld [vmem:[%s5758_s25 + $0x380] sm:$0xff] }
  0x4f   : > { %5229 = vmatprep.subr.bf16.mxu1 %v7906_v19 }
  0x51   : > { %4745 = vmatmul.mubr.msk.f32.gmra.mrb[22].mxu0 %vm7943_vm0, %v5874_v42 }
  0x52   : > { %4747 = vmatprep.mubr.msk.f32.mxu0 %vm7943_vm0, %v5885_v46  ;;  %5231 = vmatpush3.bf16.msra.mxu1 %v5230_v43  ;;  %v6077_v43 = vld [vmem:[%s5758_s25 + $0x388] sm:$0xff] }
  0x53   : > { %5232 = vmatprep.subr.bf16.mxu1 %v7906_v19 }
  0x55   : > { %4748 = vmatmul.mubr.msk.f32.gmra.mrb[24].mxu0 %vm7943_vm0, %v5888_v47 }
  0x56   : > { %4750 = vmatprep.mubr.msk.f32.mxu0 %vm7943_vm0, %v5891_v48 }
  0x59   : > { %4751 = vmatmul.mubr.msk.f32.gmra.mrb[26].mxu0 %vm7943_vm0, %v5904_v51 }
  0x5a   : > { %4753 = vmatprep.mubr.msk.f32.mxu0 %vm7943_vm0, %v5907_v52 }
  0x5d   : > { %4754 = vmatmul.mubr.msk.f32.gmra.mrb[28].mxu0 %vm7943_vm0, %v5910_v53 }
  0x5e   : > { %4756 = vmatprep.mubr.msk.f32.mxu0 %vm7943_vm0, %v5921_v56 }
  0x61   : > { %4757 = vmatmul.mubr.msk.f32.gmra.mrb[30].mxu0 %vm7943_vm0, %v5924_v57 }
  0x62   : > { %4759 = vmatprep.mubr.msk.f32.mxu0 %vm7943_vm0, %v5927_v58 }
  0x65   : > { %4760 = vmatmul.mubr.msk.f32.gmra.mrb[32].mxu0 %vm7943_vm0, %v5935_v60 }
  0x66   : > { %4762 = vmatprep.mubr.msk.f32.mxu0 %vm7943_vm0, %v5938_v61 }
  0x69   : > { %4763 = vmatmul.mubr.msk.f32.gmra.mrb[34].mxu0 %vm7943_vm0, %v5941_v62 }
  0x6a   : > { %4765 = vmatprep.mubr.msk.f32.mxu0 %vm7943_vm0, %v5948_v1 }
  0x6d   : > { %4766 = vmatmul.mubr.msk.f32.gmra.mrb[36].mxu0 %vm7943_vm0, %v5951_v2 }
  0x6e   : > { %4768 = vmatprep.mubr.msk.f32.mxu0 %vm7943_vm0, %v5960_v4 }
  0x71   : > { %4769 = vmatmul.mubr.msk.f32.gmra.mrb[38].mxu0 %vm7943_vm0, %v5963_v5 }
  0x72   : > { %4771 = vmatprep.mubr.msk.f32.mxu0 %vm7943_vm0, %v406_v49  ;;  %v5377_v49 = vpack.c.bf16 %v6077_v43, %v6074_v32 }
  0x74   : > { %5378 = vmatpush3.bf16.msra.mxu0 %v5377_v49 }
  0x75   : > { %4772 = vmatmul.mubr.msk.f32.gmra.mrb[40].mxu0 %vm7943_vm0, %v407_v8  ;;  %v417_v8 = vld [vmem:[%s5758_s25 + $0x198] sm:$0xff]  ;;  %5379 = vmatprep.subr.bf16.mxu0 %v7906_v19 }
  0x76   : > { %4774 = vmatprep.mubr.msk.f32.mxu0 %vm7943_vm0, %v408_v14  ;;  %v418_v14 = vld [vmem:[%s5758_s25 + $0x1a0] sm:$0xff] }
  0x79   : > { %4775 = vmatmul.mubr.msk.f32.gmra.mrb[42].mxu0 %vm7943_vm0, %v409_v11  ;;  %v421_v11 = vld [vmem:[%s5758_s25 + $0x1b8] sm:$0xff] }
  0x7a   : > { %4777 = vmatprep.mubr.msk.f32.mxu0 %vm7943_vm0, %v410_v29  ;;  %v422_v29 = vld [vmem:[%s5758_s25 + $0x1c0] sm:$0xff] }
  0x7d   : > { %4778 = vmatmul.mubr.msk.f32.gmra.mrb[44].mxu0 %vm7943_vm0, %v411_v13  ;;  %v423_v13 = vld [vmem:[%s5758_s25 + $0x1c8] sm:$0xff] }
  0x7e   : > { %4780 = vmatprep.mubr.msk.f32.mxu0 %vm7943_vm0, %v412_v16  ;;  %v424_v16 = vld [vmem:[%s5758_s25 + $0x1d0] sm:$0xff] }
  0x81   : > { %4781 = vmatmul.mubr.msk.f32.gmra.mrb[46].mxu0 %vm7943_vm0, %v413_v25  ;;  %v425_v25 = vld [vmem:[%s5758_s25 + $0x1d8] sm:$0xff] }
  0x82   : > { %4783 = vmatprep.mubr.msk.f32.mxu0 %vm7943_vm0, %v414_v6  ;;  %v6102_v6 = vld [vmem:[%s5758_s25 + $0x390] sm:$0xff] }
  0x85   : > { %4784 = vmatmul.mubr.msk.f32.gmra.mrb[48].mxu0 %vm7943_vm0, %v415_v28  ;;  %v6105_v28 = vld [vmem:[%s5758_s25 + $0x398] sm:$0xff] }
  0x86   : > { %4786 = vmatprep.mubr.msk.f32.mxu0 %vm7943_vm0, %v416_v31  ;;  %v426_v31 = vld [vmem:[%s5758_s25 + $0x1e0] sm:$0xff]  ;;  %v5380_v49 = vpack.c.bf16 %v6105_v28, %v6102_v6 }
  0x88   : > { %5381 = vmatpush3.bf16.msra.mxu0 %v5380_v49  ;;  %v431_v49 = vld [vmem:[%s5758_s25 + $0x208] sm:$0xff] }
  0x89   : > { %4787 = vmatmul.mubr.msk.f32.gmra.mrb[50].mxu0 %vm7943_vm0, %v417_v8  ;;  %v6112_v8 = vld [vmem:[%s5758_s25 + $0x3a0] sm:$0xff]  ;;  %5382 = vmatprep.subr.bf16.mxu0 %v7906_v19 }
  0x8a   : > { %4789 = vmatprep.mubr.msk.f32.mxu0 %vm7943_vm0, %v418_v14  ;;  %v6115_v14 = vld [vmem:[%s5758_s25 + $0x3a8] sm:$0xff] }
  0x8d   : > { %4790 = vmatmul.mubr.msk.f32.gmra.mrb[52].mxu0 %vm7943_vm0, %v419_v23  ;;  %v427_v23 = vld [vmem:[%s5758_s25 + $0x1e8] sm:$0xff] }
  0x8e   : > { %4792 = vmatprep.mubr.msk.f32.mxu0 %vm7943_vm0, %v420_v9  ;;  %v5383_v9 = vpack.c.bf16 %v6115_v14, %v6112_v8 }
  0x90   : > { %5384 = vmatpush3.bf16.msra.mxu0 %v5383_v9  ;;  %v433_v9 = vld [vmem:[%s5758_s25 + $0x218] sm:$0xff] }
  0x91   : > { %4793 = vmatmul.mubr.msk.f32.gmra.mrb[54].mxu0 %vm7943_vm0, %v421_v11  ;;  %v428_v11 = vld [vmem:[%s5758_s25 + $0x1f0] sm:$0xff]  ;;  %5385 = vmatprep.subr.bf16.mxu0 %v7906_v19 }
  0x92   : > { %4795 = vmatprep.mubr.msk.f32.mxu0 %vm7943_vm0, %v422_v29  ;;  %v6125_v29 = vld [vmem:[%s5758_s25 + $0x3b0] sm:$0xff] }
  0x95   : > { %4796 = vmatmul.mubr.msk.f32.gmra.mrb[56].mxu0 %vm7943_vm0, %v423_v13  ;;  %v6128_v13 = vld [vmem:[%s5758_s25 + $0x3b8] sm:$0xff] }
  0x96   : > { %4798 = vmatprep.mubr.msk.f32.mxu0 %vm7943_vm0, %v424_v16  ;;  %v429_v16 = vld [vmem:[%s5758_s25 + $0x1f8] sm:$0xff] }
  0x99   : > { %4799 = vmatmul.mubr.msk.f32.gmra.mrb[58].mxu0 %vm7943_vm0, %v425_v25  ;;  %v5386_v25 = vpack.c.bf16 %v6128_v13, %v6125_v29 }
  0x9a   : > { %4801 = vmatprep.mubr.msk.f32.mxu0 %vm7943_vm0, %v426_v31  ;;  %v430_v31 = vld [vmem:[%s5758_s25 + $0x200] sm:$0xff] }
  0x9b   : > { %5387 = vmatpush3.bf16.msra.mxu0 %v5386_v25  ;;  %v436_v25 = vld [vmem:[%s5758_s25 + $0x230] sm:$0xff] }
  0x9c   : > { %5388 = vmatprep.subr.bf16.mxu0 %v7906_v19 }
  0x9d   : > { %4802 = vmatmul.mubr.msk.f32.gmra.mrb[60].mxu0 %vm7943_vm0, %v427_v23  ;;  %v432_v23 = vld [vmem:[%s5758_s25 + $0x210] sm:$0xff] }
  0x9e   : > { %4804 = vmatprep.mubr.msk.f32.mxu0 %vm7943_vm0, %v428_v11  ;;  %v434_v11 = vld [vmem:[%s5758_s25 + $0x220] sm:$0xff] }
  0x9f   : > { %5390 = vmatpush3.bf16.msra.mxu0 %v5389_v15  ;;  %v439_v15 = vld [vmem:[%s5758_s25 + $0x248] sm:$0xff] }
  0xa0   : > { %5391 = vmatprep.subr.bf16.mxu0 %v7906_v19 }
  0xa1   : > { %4805 = vmatmul.mubr.msk.f32.gmra.mrb[62].mxu0 %vm7943_vm0, %v429_v16  ;;  %v435_v16 = vld [vmem:[%s5758_s25 + $0x228] sm:$0xff] }
  0xa2   : > { %4807 = vmatprep.mubr.msk.f32.mxu0 %vm7943_vm0, %v430_v31  ;;  %v449_v31 = vld [vmem:[%s5758_s25 + $0x298] sm:$0xff] }
  0xa3   : > { %5393 = vmatpush3.bf16.msra.mxu0 %v5392_v20  ;;  %v442_v20 = vld [vmem:[%s5758_s25 + $0x260] sm:$0xff] }
  0xa4   : > { %5394 = vmatprep.subr.bf16.mxu0 %v7906_v19 }
  0xa5   : > { %4808 = vmatmul.mubr.msk.f32.gmra.mrb[64].mxu0 %vm7943_vm0, %v431_v49  ;;  %v450_v49 = vld [vmem:[%s5758_s25 + $0x2a0] sm:$0xff] }
  0xa6   : > { %4810 = vmatprep.mubr.msk.f32.mxu0 %vm7943_vm0, %v432_v23  ;;  %v451_v23 = vld [vmem:[%s5758_s25 + $0x2a8] sm:$0xff] }
  0xa7   : > { %5396 = vmatpush3.bf16.msra.mxu0 %v5395_v24  ;;  %v445_v24 = vld [vmem:[%s5758_s25 + $0x278] sm:$0xff] }
  0xa8   : > { %5397 = vmatprep.subr.bf16.mxu0 %v7906_v19 }
  0xa9   : > { %4811 = vmatmul.mubr.msk.f32.gmra.mrb[66].mxu0 %vm7943_vm0, %v433_v9  ;;  %v452_v9 = vld [vmem:[%s5758_s25 + $0x2b0] sm:$0xff] }
  0xaa   : > { %4813 = vmatprep.mubr.msk.f32.mxu0 %vm7943_vm0, %v434_v11  ;;  %v453_v11 = vld [vmem:[%s5758_s25 + $0x2b8] sm:$0xff] }
  0xab   : > { %5399 = vmatpush3.bf16.msra.mxu0 %v5398_v30  ;;  %v448_v30 = vld [vmem:[%s5758_s25 + $0x290] sm:$0xff] }
  0xad   : > { %4814 = vmatmul.mubr.msk.f32.gmra.mrb[68].mxu0 %vm7943_vm0, %v435_v16  ;;  %v454_v16 = vld [vmem:[%s5758_s25 + $0x2c0] sm:$0xff] }
  0xae   : > { %4816 = vmatprep.mubr.msk.f32.mxu0 %vm7943_vm0, %v436_v25  ;;  %v455_v25 = vld [vmem:[%s5758_s25 + $0x2c8] sm:$0xff] }
  0xb1   : > { %4817 = vmatmul.mubr.msk.f32.gmra.mrb[70].mxu0 %vm7943_vm0, %v437_v10  ;;  %v456_v10 = vld [vmem:[%s5758_s25 + $0x2d0] sm:$0xff] }
  0xb2   : > { %4819 = vmatprep.mubr.msk.f32.mxu0 %vm7943_vm0, %v438_v12  ;;  %v457_v12 = vld [vmem:[%s5758_s25 + $0x2d8] sm:$0xff] }
  0xb5   : > { %4820 = vmatmul.mubr.msk.f32.gmra.mrb[72].mxu0 %vm7943_vm0, %v439_v15  ;;  %v458_v15 = vld [vmem:[%s5758_s25 + $0x2e0] sm:$0xff] }
  0xb6   : > { %4822 = vmatprep.mubr.msk.f32.mxu0 %vm7943_vm0, %v440_v17  ;;  %v459_v17 = vld [vmem:[%s5758_s25 + $0x2e8] sm:$0xff] }
  0xb9   : > { %4823 = vmatmul.mubr.msk.f32.gmra.mrb[74].mxu0 %vm7943_vm0, %v441_v18  ;;  %v460_v18 = vld [vmem:[%s5758_s25 + $0x2f0] sm:$0xff] }
  0xba   : > { %4825 = vmatprep.mubr.msk.f32.mxu0 %vm7943_vm0, %v442_v20  ;;  %v461_v20 = vld [vmem:[%s5758_s25 + $0x2f8] sm:$0xff] }
  0xbd   : > { %4826 = vmatmul.mubr.msk.f32.gmra.mrb[76].mxu0 %vm7943_vm0, %v443_v21  ;;  %v462_v21 = vld [vmem:[%s5758_s25 + $0x300] sm:$0xff] }
  0xbe   : > { %4828 = vmatprep.mubr.msk.f32.mxu0 %vm7943_vm0, %v444_v22  ;;  %v463_v22 = vld [vmem:[%s5758_s25 + $0x308] sm:$0xff] }
  0xc1   : > { %4829 = vmatmul.mubr.msk.f32.gmra.mrb[78].mxu0 %vm7943_vm0, %v445_v24  ;;  %v464_v24 = vld [vmem:[%s5758_s25 + $0x310] sm:$0xff] }
  0xc2   : > { %4831 = vmatprep.mubr.msk.f32.mxu0 %vm7943_vm0, %v446_v26  ;;  %v465_v26 = vld [vmem:[%s5758_s25 + $0x318] sm:$0xff] }
  0xc5   : > { %4832 = vmatmul.mubr.msk.f32.gmra.mrb[80].mxu0 %vm7943_vm0, %v447_v27  ;;  %v466_v27 = vld [vmem:[%s5758_s25 + $0x320] sm:$0xff] }
  0xc6   : > { %4834 = vmatprep.mubr.msk.f32.mxu0 %vm7943_vm0, %v448_v30  ;;  %v467_v30 = vld [vmem:[%s5758_s25 + $0x328] sm:$0xff] }
  0xc9   : > { %4835 = vmatmul.mubr.msk.f32.gmra.mrb[82].mxu0 %vm7943_vm0, %v449_v31  ;;  %v468_v31 = vld [vmem:[%s5758_s25 + $0x330] sm:$0xff] }
  0xca   : > { %4837 = vmatprep.mubr.msk.f32.mxu0 %vm7943_vm0, %v450_v49  ;;  %v469_v49 = vld [vmem:[%s5758_s25 + $0x338] sm:$0xff] }
  0xcd   : > { %4838 = vmatmul.mubr.msk.f32.gmra.mrb[84].mxu0 %vm7943_vm0, %v451_v23  ;;  %v470_v23 = vld [vmem:[%s5758_s25 + $0x340] sm:$0xff] }
  0xce   : > { %4840 = vmatprep.mubr.msk.f32.mxu0 %vm7943_vm0, %v452_v9  ;;  %v471_v9 = vld [vmem:[%s5758_s25 + $0x348] sm:$0xff] }
  0xd1   : > { %4841 = vmatmul.mubr.msk.f32.gmra.mrb[86].mxu0 %vm7943_vm0, %v453_v11  ;;  %v472_v11 = vld [vmem:[%s5758_s25 + $0x350] sm:$0xff] }
  0xd2   : > { %4843 = vmatprep.mubr.msk.f32.mxu0 %vm7943_vm0, %v454_v16  ;;  %v473_v16 = vld [vmem:[%s5758_s25 + $0x358] sm:$0xff] }
  0xd5   : > { %4844 = vmatmul.mubr.msk.f32.gmra.mrb[88].mxu0 %vm7943_vm0, %v455_v25  ;;  %v474_v25 = vld [vmem:[%s5758_s25 + $0x360] sm:$0xff] }
  0xd6   : > { %4846 = vmatprep.mubr.msk.f32.mxu0 %vm7943_vm0, %v456_v10 }
  0xd9   : > { %4847 = vmatmul.mubr.msk.f32.gmra.mrb[90].mxu0 %vm7943_vm0, %v457_v12 }
  0xda   : > { %4849 = vmatprep.mubr.msk.f32.mxu0 %vm7943_vm0, %v458_v15 }
  0xdd   : > { %4850 = vmatmul.mubr.msk.f32.gmra.mrb[92].mxu0 %vm7943_vm0, %v459_v17 }
  0xde   : > { %4852 = vmatprep.mubr.msk.f32.mxu0 %vm7943_vm0, %v460_v18  ;;  %v475_v18 = vld [vmem:[%s5758_s25 + $0x368] sm:$0xff] }
  0xe1   : > { %4853 = vmatmul.mubr.msk.f32.gmra.mrb[94].mxu0 %vm7943_vm0, %v461_v20  ;;  %v476_v20 = vld [vmem:[%s5758_s25 + $0x370] sm:$0xff] }
  0xe2   : > { %4855 = vmatprep.mubr.msk.f32.mxu0 %vm7943_vm0, %v462_v21 }
  0xe5   : > { %4856 = vmatmul.mubr.msk.f32.gmra.mrb[96].mxu0 %vm7943_vm0, %v463_v22 }
  0xe6   : > { %4858 = vmatprep.mubr.msk.f32.mxu0 %vm7943_vm0, %v464_v24 }
  0xe9   : > { %4859 = vmatmul.mubr.msk.f32.gmra.mrb[98].mxu0 %vm7943_vm0, %v465_v26 }
  0xea   : > { %4861 = vmatprep.mubr.msk.f32.mxu0 %vm7943_vm0, %v466_v27  ;;  %v477_v27 = vld [vmem:[%s5758_s25 + $0x378] sm:$0xff] }
  0xed   : > { %4862 = vmatmul.mubr.msk.f32.gmra.mrb[100].mxu0 %vm7943_vm0, %v467_v30 }
  0xee   : > { %4864 = vmatprep.mubr.msk.f32.mxu0 %vm7943_vm0, %v468_v31 }
  0xf1   : > { %4865 = vmatmul.mubr.msk.f32.gmra.mrb[102].mxu0 %vm7943_vm0, %v469_v49 }
  0xf2   : > { %4867 = vmatprep.mubr.msk.f32.mxu0 %vm7943_vm0, %v470_v23  ;;  %v5632_v23 = vmov 1966171168  }
  0xf5   : > { %4868 = vmatmul.mubr.msk.f32.gmra.mrb[104].mxu0 %vm7943_vm0, %v471_v9  ;;  %v1684_v9 = vunpack.c.l.s4 %v5632_v23 }
  0xf6   : > { %4870 = vmatprep.mubr.msk.f32.mxu0 %vm7943_vm0, %v472_v11  ;;  %v7908_v11 = vlaneseq }
  0xf7   : > { %v1685_v3 = vunpack.c.0.s8 %v1684_v9 }
  0xf8   : > { %v6240_v10 = vpop.f32.mrb[0].mxu1  ;;  %v6242_v12 = vpop.f32.mrb[0].mxu0 }
  0xf9   : > { %4871 = vmatmul.mubr.msk.f32.gmra.mrb[106].mxu0 %vm7943_vm0, %v473_v16  ;;  %v6245_v15 = vpop.f32.mrb[1].mxu1  ;;  %v6247_v17 = vpop.f32.mrb[1].mxu0 }
  0xfa   : > { %4873 = vmatprep.mubr.msk.f32.mxu0 %vm7943_vm0, %v474_v25 }
  0xfc   : > { %v6252_v21 = vpop.f32.mrb[2].mxu1  ;;  %v6254_v22 = vpop.f32.mrb[2].mxu0 }
  0xfd   : > { %4874 = vmatmul.mubr.msk.f32.gmra.mrb[108].mxu0 %vm7943_vm0, %v475_v18  ;;  %v6257_v24 = vpop.f32.mrb[3].mxu1  ;;  %v959_v26 = vpop.f32.mrb[3].mxu0 }
  0xfe   : > { %4876 = vmatprep.mubr.msk.f32.mxu0 %vm7943_vm0, %v476_v20 }
 0x100   : > { %v6261_v30 = vpop.f32.mrb[4].mxu1  ;;  %v4719_v31 = vpop.f32.mrb[4].mxu0 }
 0x101   : > { %7973 = vst [vmem:[#allocation33_spill] sm:$0xff] %v6261_v30  ;;  %4877 = vmatmul.mubr.msk.f32.gmra.mrb[110].mxu0 %vm7943_vm0, %v477_v27  ;;  %v6264_v49 = vpop.f32.mrb[5].mxu1  ;;  %v969_v16 = vpop.f32.mrb[5].mxu0  ;;  %v6275_v27 = vshrl.u32 %v7908_v11, 7 }
 0x102   : > { %4879 = vmatprep.mubr.msk.f32.mxu0 %vm7943_vm0, %v6074_v32  ;;  %v4418_v32 = vld [vmem:[%s7901_s5] ss:$0 sm:$0xff] }
 0x103   : > { %v6286_v9 = vsub.s32 %v1685_v3, %v6275_v27  ;;  %v6296_v3 = vsub.s32 0, %v6275_v27 }
 0x104   : > { %v6268_v25 = vpop.f32.mrb[6].mxu1  ;;  %v4722_v18 = vpop.f32.mrb[6].mxu0 }
 0x105   : > { %4880 = vmatmul.mubr.msk.f32.gmra.mrb[112].mxu0 %vm7943_vm0, %v6077_v43  ;;  %v6272_v20 = vpop.f32.mrb[7].mxu1  ;;  %v979_v0 = vpop.f32.mrb[7].mxu0  ;;  %7975 = vst [vmem:[#allocation35_spill] sm:$0xff] %v6286_v9 }
 0x106   : > { %7974 = vst [vmem:[#allocation34_spill] sm:$0xff] %v6272_v20  ;;  %4882 = vmatprep.mubr.msk.f32.mxu0 %vm7943_vm0, %v6102_v6 }
 0x108   : > { %v1669_v23 = vpop.f32.mrb[8].mxu1  ;;  %v4725_v43 = vpop.f32.mrb[8].mxu0 }
 0x109   : > { %v1670_v59 = vadd.f32 %v4418_v32, %v1669_v23  ;;  %4883 = vmatmul.mubr.msk.f32.gmra.mrb[114].mxu0 %vm7943_vm0, %v6105_v28  ;;  %v4913_v55 = vpop.f32.mrb[9].mxu1  ;;  %v989_v54 = vpop.f32.mrb[9].mxu0 }
 0x10a   : > { %4885 = vmatprep.mubr.msk.f32.mxu0 %vm7943_vm0, %v6112_v8 }
 0x10b   : > { %v1680_v6 = vadd.f32 %v4420_v63, %v1670_v59 }
 0x10c   : > { %v4728_v50 = vpop.f32.mrb[10].mxu0 }
 0x10d   : > { %v1682_v45 = vcombine.high %v1680_v6, %v1680_v6  ;;  %v1689_v44 = vrot.slane %v1680_v6, %v6286_v9  ;;  %4886 = vmatmul.mubr.msk.f32.gmra.mrb[116].mxu0 %vm7943_vm0, %v6115_v14  ;;  %v999_v32 = vpop.f32.mrb[11].mxu0 }
 0x10e   : > { %4888 = vmatprep.mubr.msk.f32.mxu0 %vm7943_vm0, %v6125_v29 }
 0x10f   : > { %v1696_v55 = vrot.slane %v1682_v45, %v6286_v9  ;;  %v1697_v28 = vcombine.high %v1689_v44, %v1689_v44  ;;  %v6302_v8 = vrot.slane %v1689_v44, %v6286_v9 }
 0x110   : > { %v4731_v59 = vpop.f32.mrb[12].mxu0 }
 0x111   : > { %v1698_v63 = vcombine.high %v1696_v55, %v1696_v55  ;;  %v1712_v23 = vrot.slane %v1696_v55, %v6286_v9  ;;  %v1719_v6 = vrot.slane %v1697_v28, %v6286_v9  ;;  %4889 = vmatmul.mubr.msk.f32.gmra.mrb[118].mxu0 %vm7943_vm0, %v6128_v13  ;;  %v1009_v14 = vpop.f32.mrb[13].mxu0  ;;  %v1734_v39 = vrot.slane %v6302_v8, %v6296_v3 }
 0x112   : > { %5191 = vmatprep.mubr.msk.f32.mxu0 %vm7938_vm1, %v7909_v7  ;;  %vm2922_vm1 = vcmask 1048512  }
 0x113   : > { %v6313_v45 = vrot.slane %v1698_v63, %v6286_v9  ;;  %v1728_v44 = vcombine.high %v1712_v23, %v1712_v23  ;;  %v1729_v29 = vcombine.high %v1719_v6, %v1719_v6  ;;  %v6316_v19 = vrot.slane %v1712_v23, %v6296_v3 }
 0x114   : > { %v1773_v55 = vadd.f32 %v1734_v39, %v959_v26  ;;  %v1776_v28 = vadd.f32 %v4719_v31, %v1734_v39  ;;  %v4734_v35 = vpop.f32.mrb[14].mxu0  ;;  %v1775_v4 = vadd.f32 %v1734_v39, %v969_v16  ;;  %v6328_v5 = vadd.f32 %v4722_v18, %v1734_v39  ;;  %v6344_v16 = vld [vmem:[%s7902_s6] ss:$0 sm:$0xff] }
 0x115   : > { %v6319_v13 = vrot.slane %v1729_v29, %v6296_v3  ;;  %v6323_v11 = vrot.slane %v6313_v45, %v6296_v3  ;;  %v6326_v7 = vrot.slane %v1728_v44, %v6296_v3  ;;  %v1019_v63 = vpop.f32.mrb[15].mxu0  ;;  %v6330_v1 = vadd.f32 %v1734_v39, %v979_v0 }
 0x116   : > { %v6332_v23 = vadd.f32 %v4725_v43, %v1734_v39  ;;  %v1779_v26 = vadd.f32 %v1734_v39, %v989_v54  ;;  %v1903_v31 = vmax.f32 %v1775_v4, 0.0  ;;  %v1782_v2 = vadd.f32 %v4728_v50, %v1734_v39 }
 0x117   : > { %v6334_v29 = vadd.f32 %v1734_v39, %v999_v32  ;;  %v6337_v62 = vrot.slane %v1719_v6, %v6296_v3  ;;  %v6339_v58 = vadd.f32 %v4731_v59, %v1734_v39  ;;  %v1783_v0 = vadd.f32 %v1734_v39, %v1009_v14 }
 0x118   : > { %v4737_v61 = vpop.f32.mrb[16].mxu0  ;;  %v6346_v18 = vadd.f32 %v4734_v35, %v1734_v39  ;;  %v1904_v54 = vmax.f32 %v1776_v28, 0.0  ;;  %v6348_v4 = vadd.f32 %v1734_v39, %v1019_v63  ;;  %v1771_v32 = vadd.f32 %v1734_v39, %v6247_v17 }
 0x119   : > { %v1029_v44 = vpop.f32.mrb[17].mxu0  ;;  %v6351_v50 = vadd.f32 %v4737_v61, %v6337_v62  ;;  %v2038_v59 = vmul.f32 %v6344_v16, %v1903_v31  ;;  %v1907_v60 = vmax.f32 %v1779_v26, 0.0  ;;  %v1772_v61 = vadd.f32 %v6242_v12, %v1734_v39 }
 0x11a   : > { %v6354_v43 = vadd.f32 %v6337_v62, %v1029_v44  ;;  %v1899_v14 = vmax.f32 %v1771_v32, 0.0  ;;  %v2039_v44 = vmul.f32 %v6344_v16, %v1904_v54  ;;  %v1774_v26 = vadd.f32 %v6254_v22, %v1734_v39 }
 0x11b   : > { %v2174_v28 = vsel %vm7943_vm0, %v2038_v59, 0.0  ;;  %v1900_v31 = vmax.f32 %v1772_v61, 0.0  ;;  %v1910_v52 = vmax.f32 %v1782_v2, 0.0  ;;  %v1911_v22 = vmax.f32 %v1783_v0, 0.0 }
 0x11c   : > { %v4740_v6 = vpop.f32.mrb[18].mxu0  ;;  %2175 = vadd.xlane.f32.xlu1 %v2174_v28  ;;  %v2034_v17 = vmul.f32 %v6344_v16, %v1899_v14  ;;  %v2177_v54 = vsel %vm7943_vm0, %v2039_v44, 0.0  ;;  %v1902_v44 = vmax.f32 %v1774_v26, 0.0  ;;  %v1905_v0 = vmax.f32 %v6330_v1, 0.0 }
 0x11d   : > { %v6359_v56 = vadd.f32 %v4740_v6, %v6337_v62  ;;  %v1039_v35 = vpop.f32.mrb[19].mxu0  ;;  %v1901_v6 = vmax.f32 %v1773_v55, 0.0  ;;  %v2035_v12 = vmul.f32 %v6344_v16, %v1900_v31  ;;  %v1912_v31 = vmax.f32 %v6339_v58, 0.0 }
 0x11e   : > { %v6363_v63 = vadd.f32 %v6337_v62, %v1039_v35  ;;  %v2042_v35 = vmul.f32 %v6344_v16, %v1907_v60  ;;  %v2162_v53 = vsel %vm7943_vm0, %v2034_v17, 0.0  ;;  %v2045_v17 = vmul.f32 %v6344_v16, %v1910_v52 }
 0x11f   : > { %2163 = vadd.xlane.f32.xlu0 %v2162_v53  ;;  %v2036_v2 = vmul.f32 %v6344_v16, %v1901_v6  ;;  %v2165_v28 = vsel %vm7943_vm0, %v2035_v12, 0.0  ;;  %v2037_v12 = vmul.f32 %v6344_v16, %v1902_v44  ;;  %v2046_v52 = vmul.f32 %v6344_v16, %v1911_v22 }
 0x120   : > { %v4743_v57 = vpop.f32.mrb[20].mxu0  ;;  %2178 = vadd.xlane.f32.xlu1 %v2177_v54  ;;  %v2195_v54 = vsel %vm7943_vm0, %v2045_v17, 0.0  ;;  %v1730_v58 = vcombine.high %v6313_v45, %v6313_v45  ;;  %v2047_v45 = vmul.f32 %v6344_v16, %v1912_v31 }
 0x121   : > { %v6370_v32 = vadd.f32 %v4743_v57, %v6337_v62  ;;  %v1049_v59 = vpop.f32.mrb[21].mxu0  ;;  %v2186_v57 = vsel %vm7943_vm0, %v2042_v35, 0.0  ;;  %v2168_v6 = vsel %vm7943_vm0, %v2036_v2, 0.0  ;;  %v1914_v2 = vmax.f32 %v6346_v18, 0.0 }
 0x122   : > { %v6377_v14 = vadd.f32 %v6337_v62, %v1049_v59  ;;  %v2171_v44 = vsel %vm7943_vm0, %v2037_v12, 0.0  ;;  %v2198_v22 = vsel %vm7943_vm0, %v2046_v52, 0.0  ;;  %v2201_v31 = vsel %vm7943_vm0, %v2047_v45, 0.0 }
 0x123   : > { %2166 = vadd.xlane.f32.xlu0 %v2165_v28 }
 0x124   : > { %v4746_v39 = vpop.f32.mrb[22].mxu0  ;;  %2187 = vadd.xlane.f32.xlu1 %v2186_v57  ;;  %v2040_v57 = vmul.f32 %v6344_v16, %v1905_v0  ;;  %v1913_v0 = vmax.f32 %v6348_v4, 0.0  ;;  %v1909_v4 = vmax.f32 %v6334_v29, 0.0 }
 0x125   : > { %v6382_v55 = vadd.f32 %v4746_v39, %v6337_v62  ;;  %v1059_v60 = vpop.f32.mrb[23].mxu0  ;;  %v1906_v39 = vmax.f32 %v6328_v5, 0.0  ;;  %v6416_v5 = vrot.slane %v1730_v58, %v6296_v3  ;;  %v2049_v58 = vmul.f32 %v6344_v16, %v1914_v2 }
 0x126   : > { %v6386_v61 = vadd.f32 %v6337_v62, %v1059_v60 }
 0x127   : > { %2169 = vadd.xlane.f32.xlu0 %v2168_v6  ;;  %v2041_v6 = vmul.f32 %v6344_v16, %v1906_v39  ;;  %v1891_v2 = vadd.f32 %v6416_v5, %v6245_v15  ;;  %v2207_v45 = vsel %vm7943_vm0, %v2049_v58, 0.0 }
 0x128   : > { %v4749_v53 = vpop.f32.mrb[24].mxu0  ;;  %2196 = vadd.xlane.f32.xlu1 %v2195_v54  ;;  %v2180_v54 = vsel %vm7943_vm0, %v2040_v57, 0.0 }
 0x129   : > { %v6393_v59 = vadd.f32 %v4749_v53, %v6337_v62  ;;  %v1069_v35 = vpop.f32.mrb[25].mxu0  ;;  %v1908_v53 = vmax.f32 %v6332_v23, 0.0  ;;  %v1727_v23 = vcombine.high %v6302_v8, %v6302_v8  ;;  %v2183_v8 = vsel %vm7943_vm0, %v2041_v6, 0.0 }
 0x12a   : > { %v6398_v26 = vadd.f32 %v6337_v62, %v1069_v35 }
 0x12b   : > { %2172 = vadd.xlane.f32.xlu0 %v2171_v44 }
 0x12c   : > { %v4752_v1 = vpop.f32.mrb[26].mxu0  ;;  %2199 = vadd.xlane.f32.xlu1 %v2198_v22  ;;  %v2048_v22 = vmul.f32 %v6344_v16, %v1913_v0 }
 0x12d   : > { %v6407_v60 = vadd.f32 %v4752_v1, %v6337_v62  ;;  %v1079_v28 = vpop.f32.mrb[27].mxu0  ;;  %v1916_v1 = vmax.f32 %v6351_v50, 0.0  ;;  %v1894_v50 = vadd.f32 %v6252_v21, %v6416_v5 }
 0x12e   : > { %v6412_v17 = vadd.f32 %v6337_v62, %v1079_v28  ;;  %v2043_v28 = vmul.f32 %v6344_v16, %v1908_v53  ;;  %v2044_v53 = vmul.f32 %v6344_v16, %v1909_v4  ;;  %v2204_v6 = vsel %vm7943_vm0, %v2048_v22, 0.0 }
 0x12f   : > { %2181 = vadd.xlane.f32.xlu0 %v2180_v54  ;;  %v2019_v54 = vmax.f32 %v1891_v2, 0.0  ;;  %v2051_v21 = vmul.f32 %v6344_v16, %v1916_v1  ;;  %v2022_v58 = vmax.f32 %v1894_v50, 0.0  ;;  %v1893_v1 = vadd.f32 %v6416_v5, %v6257_v24 }
 0x130   : > { %v4755_v18 = vpop.f32.mrb[28].mxu0  ;;  %2202 = vadd.xlane.f32.xlu1 %v2201_v31  ;;  %v2189_v15 = vsel %vm7943_vm0, %v2043_v28, 0.0  ;;  %v1918_v50 = vmax.f32 %v6359_v56, 0.0  ;;  %v1917_v56 = vmax.f32 %v6363_v63, 0.0 }
 0x131   : > { %v6422_v35 = vadd.f32 %v4755_v18, %v6337_v62  ;;  %v1089_v12 = vpop.f32.mrb[29].mxu0  ;;  %v6449_v18 = vrot.slane %v1727_v23, %v6296_v3  ;;  %v1892_v3 = vadd.f32 %v6240_v10, %v6416_v5  ;;  %v1915_v23 = vmax.f32 %v6354_v43, 0.0 }
 0x132   : > { %v6427_v52 = vadd.f32 %v6337_v62, %v1089_v12  ;;  %v2154_v28 = vmul.f32 %v6344_v16, %v2019_v54  ;;  %v2213_v2 = vsel %vm7943_vm0, %v2051_v21, 0.0  ;;  %v2157_v43 = vmul.f32 %v6344_v16, %v2022_v58 }
 0x133   : > { %2184 = vadd.xlane.f32.xlu0 %v2183_v8  ;;  %v2020_v8 = vmax.f32 %v1892_v3, 0.0  ;;  %v2050_v24 = vmul.f32 %v6344_v16, %v1915_v23  ;;  %v1920_v58 = vmax.f32 %v6370_v32, 0.0  ;;  %v1919_v32 = vmax.f32 %v6377_v14, 0.0 }
 0x134   : > { %v4758_v39 = vpop.f32.mrb[30].mxu0  ;;  %2208 = vadd.xlane.f32.xlu1 %v2207_v45  ;;  %v2531_v54 = vsel %vm7943_vm0, %v2157_v43, 0.0 }
 0x135   : > { %v6436_v57 = vadd.f32 %v4758_v39, %v6337_v62  ;;  %v1099_v44 = vpop.f32.mrb[31].mxu0  ;;  %v2192_v39 = vsel %vm7943_vm0, %v2044_v53, 0.0  ;;  %v2055_v43 = vmul.f32 %v6344_v16, %v1920_v58 }
 0x136   : > { %v6444_v29 = vadd.f32 %v6337_v62, %v1099_v44 }
 0x137   : > { %2190 = vadd.xlane.f32.xlu0 %v2189_v15  ;;  %v2021_v15 = vmax.f32 %v1893_v1, 0.0 }
 0x138   : > { %v4761_v0 = vpop.f32.mrb[32].mxu0  ;;  %2205 = vadd.xlane.f32.xlu1 %v2204_v6  ;;  %v2522_v6 = vsel %vm7943_vm0, %v2154_v28, 0.0 }
 0x139   : > { %v6455_v12 = vadd.f32 %v4761_v0, %v6449_v18  ;;  %v1109_v62 = vpop.f32.mrb[33].mxu0 }
 0x13a   : > { %v6458_v31 = vadd.f32 %v6449_v18, %v1109_v62  ;;  %v2155_v62 = vmul.f32 %v6344_v16, %v2020_v8  ;;  %v1922_v8 = vmax.f32 %v6382_v55, 0.0  ;;  %v1921_v55 = vmax.f32 %v6386_v61, 0.0 }
 0x13b   : > { %2193 = vadd.xlane.f32.xlu0 %v2192_v39 }
 0x13c   : > { %v4764_v4 = vpop.f32.mrb[34].mxu0  ;;  %2214 = vadd.xlane.f32.xlu1 %v2213_v2  ;;  %v2525_v28 = vsel %vm7943_vm0, %v2155_v62, 0.0  ;;  %v2053_v2 = vmul.f32 %v6344_v16, %v1918_v50  ;;  %v2052_v50 = vmul.f32 %v6344_v16, %v1917_v56  ;;  %v1924_v62 = vmax.f32 %v6393_v59, 0.0 }
 0x13d   : > { %v6467_v44 = vadd.f32 %v4764_v4, %v6449_v18  ;;  %v1119_v22 = vpop.f32.mrb[35].mxu0  ;;  %v2210_v4 = vsel %vm7943_vm0, %v2050_v24, 0.0  ;;  %v2057_v56 = vmul.f32 %v6344_v16, %v1922_v8  ;;  %v1923_v59 = vmax.f32 %v6398_v26, 0.0 }
 0x13e   : > { %v6473_v10 = vadd.f32 %v6449_v18, %v1119_v22  ;;  %v2156_v22 = vmul.f32 %v6344_v16, %v2021_v15  ;;  %v2219_v24 = vsel %vm7943_vm0, %v2053_v2, 0.0 }
 0x13f   : > { %2523 = vadd.xlane.f32.xlu0 %v2522_v6 }
 0x140   : > { %v4767_v45 = vpop.f32.mrb[36].mxu0  ;;  %2532 = vadd.xlane.f32.xlu1 %v2531_v54  ;;  %v2528_v15 = vsel %vm7943_vm0, %v2156_v22, 0.0  ;;  %v2225_v54 = vsel %vm7943_vm0, %v2055_v43, 0.0  ;;  %v2059_v22 = vmul.f32 %v6344_v16, %v1924_v62  ;;  %v2056_v43 = vmul.f32 %v6344_v16, %v1921_v55 }
 0x141   : > { %v6478_v53 = vadd.f32 %v4767_v45, %v6449_v18  ;;  %v1129_v0 = vpop.f32.mrb[37].mxu0  ;;  %v1934_v62 = vmax.f32 %v6467_v44, 0.0 }
 0x142   : > { %v6485_v21 = vadd.f32 %v6449_v18, %v1129_v0 }
 0x143   : > { %2526 = vadd.xlane.f32.xlu0 %v2525_v28 }
 0x144   : > { %v4770_v3 = vpop.f32.mrb[38].mxu0  ;;  %2211 = vadd.xlane.f32.xlu1 %v2210_v4  ;;  %v2216_v4 = vsel %vm7943_vm0, %v2052_v50, 0.0  ;;  %v2237_v50 = vsel %vm7943_vm0, %v2059_v22, 0.0  ;;  %v1935_v22 = vmax.f32 %v6485_v21, 0.0 }
 0x145   : > { %v6491_v23 = vadd.f32 %v4770_v3, %v6449_v18  ;;  %v1139_v39 = vpop.f32.mrb[39].mxu0 }
 0x146   : > { %v6496_v1 = vadd.f32 %v6449_v18, %v1139_v39  ;;  %v2054_v39 = vmul.f32 %v6344_v16, %v1919_v32  ;;  %v1932_v32 = vmax.f32 %v6455_v12, 0.0 }
 0x147   : > { %2529 = vadd.xlane.f32.xlu0 %v2528_v15  ;;  %v2231_v15 = vsel %vm7943_vm0, %v2057_v56, 0.0 }
 0x148   : > { %v4773_v63 = vpop.f32.mrb[40].mxu0  ;;  %2220 = vadd.xlane.f32.xlu1 %v2219_v24  ;;  %v1926_v24 = vmax.f32 %v6407_v60, 0.0 }
 0x149   : > { %v6503_v45 = vadd.f32 %v4773_v63, %v6449_v18  ;;  %v1149_v0 = vpop.f32.mrb[41].mxu0 }
 0x14a   : > { %v6508_v6 = vadd.f32 %v6449_v18, %v1149_v0  ;;  %v2222_v0 = vsel %vm7943_vm0, %v2054_v39, 0.0  ;;  %v1925_v39 = vmax.f32 %v6412_v17, 0.0 }
 0x14b   : > { %2226 = vadd.xlane.f32.xlu0 %v2225_v54  ;;  %v2228_v54 = vsel %vm7943_vm0, %v2056_v43, 0.0  ;;  %v2069_v43 = vmul.f32 %v6344_v16, %v1934_v62  ;;  %v1927_v62 = vmax.f32 %v6427_v52, 0.0 }
 0x14c   : > { %v4776_v14 = vpop.f32.mrb[42].mxu0  ;;  %2217 = vadd.xlane.f32.xlu1 %v2216_v4  ;;  %v2067_v4 = vmul.f32 %v6344_v16, %v1932_v32  ;;  %v1928_v32 = vmax.f32 %v6422_v35, 0.0 }
 0x14d   : > { %v6515_v3 = vadd.f32 %v4776_v14, %v6449_v18  ;;  %v1159_v58 = vpop.f32.mrb[43].mxu0  ;;  %v2058_v14 = vmul.f32 %v6344_v16, %v1923_v59 }
 0x14e   : > { %v6520_v28 = vadd.f32 %v6449_v18, %v1159_v58 }
 0x14f   : > { %2223 = vadd.xlane.f32.xlu0 %v2222_v0  ;;  %v2234_v56 = vsel %vm7943_vm0, %v2058_v14, 0.0 }
 0x150   : > { %v4779_v61 = vpop.f32.mrb[44].mxu0  ;;  %2232 = vadd.xlane.f32.xlu1 %v2231_v15  ;;  %v2060_v15 = vmul.f32 %v6344_v16, %v1925_v39  ;;  %v1942_v39 = vmax.f32 %v6515_v3, 0.0 }
 0x151   : > { %v6526_v2 = vadd.f32 %v4779_v61, %v6449_v18  ;;  %v1169_v63 = vpop.f32.mrb[45].mxu0  ;;  %v2061_v61 = vmul.f32 %v6344_v16, %v1926_v24  ;;  %v1938_v24 = vmax.f32 %v6491_v23, 0.0 }
 0x152   : > { %v6533_v8 = vadd.f32 %v6449_v18, %v1169_v63 }
 0x153   : > { %2238 = vadd.xlane.f32.xlu0 %v2237_v50  ;;  %v2243_v0 = vsel %vm7943_vm0, %v2061_v61, 0.0  ;;  %v2267_v50 = vsel %vm7943_vm0, %v2069_v43, 0.0  ;;  %v2062_v43 = vmul.f32 %v6344_v16, %v1927_v62  ;;  %v1944_v62 = vmax.f32 %v6526_v2, 0.0 }
 0x154   : > { %v4782_v26 = vpop.f32.mrb[46].mxu0  ;;  %2229 = vadd.xlane.f32.xlu1 %v2228_v54  ;;  %v2240_v54 = vsel %vm7943_vm0, %v2060_v15, 0.0 }
 0x155   : > { %v6539_v55 = vadd.f32 %v4782_v26, %v6449_v18  ;;  %v1179_v12 = vpop.f32.mrb[47].mxu0 }
 0x156   : > { %v6544_v58 = vadd.f32 %v6449_v18, %v1179_v12  ;;  %v2261_v18 = vsel %vm7943_vm0, %v2067_v4, 0.0  ;;  %v2070_v12 = vmul.f32 %v6344_v16, %v1935_v22  ;;  %v2063_v4 = vmul.f32 %v6344_v16, %v1928_v32 }
 0x157   : > { %2235 = vadd.xlane.f32.xlu0 %v2234_v56  ;;  %v1930_v22 = vmax.f32 %v6436_v57, 0.0  ;;  %v1941_v32 = vmax.f32 %v6520_v28, 0.0 }
 0x158   : > { %v4785_v60 = vpop.f32.mrb[48].mxu0  ;;  %2262 = vadd.xlane.f32.xlu1 %v2261_v18  ;;  %v2270_v56 = vsel %vm7943_vm0, %v2070_v12, 0.0  ;;  %v2249_v18 = vsel %vm7943_vm0, %v2063_v4, 0.0 }
 0x159   : > { %v6551_v59 = vadd.f32 %v4785_v60, %v6319_v13  ;;  %v1189_v44 = vpop.f32.mrb[49].mxu0  ;;  %v2065_v12 = vmul.f32 %v6344_v16, %v1930_v22  ;;  %v1943_v22 = vmax.f32 %v6533_v8, 0.0 }
 0x15a   : > { %v6556_v63 = vadd.f32 %v6319_v13, %v1189_v44  ;;  %v2073_v44 = vmul.f32 %v6344_v16, %v1938_v24  ;;  %v1929_v24 = vmax.f32 %v6444_v29, 0.0 }
 0x15b   : > { %2244 = vadd.xlane.f32.xlu0 %v2243_v0 }
 0x15c   : > { %v4788_v17 = vpop.f32.mrb[50].mxu0  ;;  %2268 = vadd.xlane.f32.xlu1 %v2267_v50  ;;  %v2279_v0 = vsel %vm7943_vm0, %v2073_v44, 0.0  ;;  %v2246_v50 = vsel %vm7943_vm0, %v2062_v43, 0.0  ;;  %v2064_v44 = vmul.f32 %v6344_v16, %v1929_v24  ;;  %v1946_v24 = vmax.f32 %v6539_v55, 0.0 }
 0x15d   : > { %v6563_v26 = vadd.f32 %v4788_v17, %v6319_v13  ;;  %v1199_v21 = vpop.f32.mrb[51].mxu0 }
 0x15e   : > { %v6568_v14 = vadd.f32 %v6319_v13, %v1199_v21  ;;  %v2077_v21 = vmul.f32 %v6344_v16, %v1942_v39  ;;  %v1931_v39 = vmax.f32 %v6458_v31, 0.0 }
 0x15f   : > { %2241 = vadd.xlane.f32.xlu0 %v2240_v54 }
 0x160   : > { %v4791_v35 = vpop.f32.mrb[52].mxu0  ;;  %2271 = vadd.xlane.f32.xlu1 %v2270_v56  ;;  %v2291_v54 = vsel %vm7943_vm0, %v2077_v21, 0.0  ;;  %v2255_v56 = vsel %vm7943_vm0, %v2065_v12, 0.0  ;;  %v2066_v21 = vmul.f32 %v6344_v16, %v1931_v39  ;;  %v1945_v39 = vmax.f32 %v6544_v58, 0.0 }
 0x161   : > { %v6575_v60 = vadd.f32 %v4791_v35, %v6319_v13  ;;  %v1209_v23 = vpop.f32.mrb[53].mxu0 }
 0x162   : > { %v6580_v61 = vadd.f32 %v6319_v13, %v1209_v23  ;;  %v2076_v23 = vmul.f32 %v6344_v16, %v1941_v32  ;;  %v1933_v32 = vmax.f32 %v6473_v10, 0.0 }
 0x163   : > { %2250 = vadd.xlane.f32.xlu0 %v2249_v18 }
 0x164   : > { %v4794_v52 = vpop.f32.mrb[54].mxu0  ;;  %2280 = vadd.xlane.f32.xlu1 %v2279_v0  ;;  %v2288_v18 = vsel %vm7943_vm0, %v2076_v23, 0.0  ;;  %v2252_v0 = vsel %vm7943_vm0, %v2064_v44, 0.0  ;;  %v2068_v23 = vmul.f32 %v6344_v16, %v1933_v32  ;;  %v1947_v32 = vmax.f32 %v6556_v63, 0.0 }
 0x165   : > { %v6587_v17 = vadd.f32 %v4794_v52, %v6319_v13  ;;  %v1219_v3 = vpop.f32.mrb[55].mxu0  ;;  %v1952_v63 = vmax.f32 %v6575_v60, 0.0  ;;  %v1951_v60 = vmax.f32 %v6580_v61, 0.0 }
 0x166   : > { %v6592_v15 = vadd.f32 %v6319_v13, %v1219_v3  ;;  %v2079_v3 = vmul.f32 %v6344_v16, %v1944_v62  ;;  %v1936_v62 = vmax.f32 %v6478_v53, 0.0 }
 0x167   : > { %2247 = vadd.xlane.f32.xlu0 %v2246_v50 }
 0x168   : > { %v4797_v57 = vpop.f32.mrb[56].mxu0  ;;  %2292 = vadd.xlane.f32.xlu1 %v2291_v54  ;;  %v2297_v50 = vsel %vm7943_vm0, %v2079_v3, 0.0  ;;  %v2258_v54 = vsel %vm7943_vm0, %v2066_v21, 0.0  ;;  %v2071_v3 = vmul.f32 %v6344_v16, %v1936_v62  ;;  %v2080_v21 = vmul.f32 %v6344_v16, %v1945_v39 }
 0x169   : > { %v6599_v35 = vadd.f32 %v4797_v57, %v6319_v13  ;;  %v1229_v28 = vpop.f32.mrb[57].mxu0 }
 0x16a   : > { %v6604_v4 = vadd.f32 %v6319_v13, %v1229_v28  ;;  %v2078_v28 = vmul.f32 %v6344_v16, %v1943_v22  ;;  %v1937_v22 = vmax.f32 %v6496_v1, 0.0  ;;  %v1940_v1 = vmax.f32 %v6503_v45, 0.0 }
 0x16b   : > { %2256 = vadd.xlane.f32.xlu0 %v2255_v56  ;;  %v2300_v62 = vsel %vm7943_vm0, %v2080_v21, 0.0  ;;  %v1939_v45 = vmax.f32 %v6508_v6, 0.0 }
 0x16c   : > { %v4800_v29 = vpop.f32.mrb[58].mxu0  ;;  %2289 = vadd.xlane.f32.xlu1 %v2288_v18  ;;  %v2294_v56 = vsel %vm7943_vm0, %v2078_v28, 0.0  ;;  %v2264_v18 = vsel %vm7943_vm0, %v2068_v23, 0.0  ;;  %v2082_v23 = vmul.f32 %v6344_v16, %v1947_v32 }
 0x16d   : > { %v6611_v52 = vadd.f32 %v4800_v29, %v6319_v13  ;;  %v1239_v2 = vpop.f32.mrb[59].mxu0 }
 0x16e   : > { %v6616_v43 = vadd.f32 %v6319_v13, %v1239_v2  ;;  %v2081_v2 = vmul.f32 %v6344_v16, %v1946_v24  ;;  %v2273_v24 = vsel %vm7943_vm0, %v2071_v3, 0.0  ;;  %v2087_v3 = vmul.f32 %v6344_v16, %v1952_v63 }
 0x16f   : > { %2253 = vadd.xlane.f32.xlu0 %v2252_v0 }
 0x170   : > { %v4803_v31 = vpop.f32.mrb[60].mxu0  ;;  %2298 = vadd.xlane.f32.xlu1 %v2297_v50  ;;  %v2072_v50 = vmul.f32 %v6344_v16, %v1937_v22  ;;  %v2306_v22 = vsel %vm7943_vm0, %v2082_v23, 0.0 }
 0x171   : > { %v6623_v57 = vadd.f32 %v4803_v31, %v6319_v13  ;;  %v1249_v8 = vpop.f32.mrb[61].mxu0 }
 0x172   : > { %v6628_v12 = vadd.f32 %v6319_v13, %v1249_v8  ;;  %v2276_v39 = vsel %vm7943_vm0, %v2072_v50, 0.0  ;;  %v2086_v50 = vmul.f32 %v6344_v16, %v1951_v60 }
 0x173   : > { %2259 = vadd.xlane.f32.xlu0 %v2258_v54 }
 0x174   : > { %v4806_v10 = vpop.f32.mrb[62].mxu0  ;;  %2295 = vadd.xlane.f32.xlu1 %v2294_v56  ;;  %v2075_v56 = vmul.f32 %v6344_v16, %v1940_v1  ;;  %v2321_v1 = vsel %vm7943_vm0, %v2087_v3, 0.0 }
 0x175   : > { %v6635_v29 = vadd.f32 %v4806_v10, %v6319_v13  ;;  %v1259_v55 = vpop.f32.mrb[63].mxu0 }
 0x176   : > { %v6640_v44 = vadd.f32 %v6319_v13, %v1259_v55  ;;  %v2303_v13 = vsel %vm7943_vm0, %v2081_v2, 0.0  ;;  %v2285_v32 = vsel %vm7943_vm0, %v2075_v56, 0.0 }
 0x177   : > { %2265 = vadd.xlane.f32.xlu0 %v2264_v18 }
 0x178   : > { %v4809_v53 = vpop.f32.mrb[64].mxu0  ;;  %2304 = vadd.xlane.f32.xlu1 %v2303_v13  ;;  %v2074_v13 = vmul.f32 %v6344_v16, %v1939_v45  ;;  %v2318_v45 = vsel %vm7943_vm0, %v2086_v50, 0.0 }
 0x179   : > { %v6647_v31 = vadd.f32 %v4809_v53, %v6316_v19  ;;  %v1269_v58 = vpop.f32.mrb[65].mxu0 }
 0x17a   : > { %v1835_v0 = vadd.f32 %v6316_v19, %v1269_v58  ;;  %v1948_v58 = vmax.f32 %v6551_v59, 0.0  ;;  %v1950_v59 = vmax.f32 %v6563_v26, 0.0  ;;  %v2282_v63 = vsel %vm7943_vm0, %v2074_v13, 0.0 }
 0x17b   : > { %2274 = vadd.xlane.f32.xlu0 %v2273_v24  ;;  %v1949_v26 = vmax.f32 %v6568_v14, 0.0  ;;  %v1954_v14 = vmax.f32 %v6587_v17, 0.0 }
 0x17c   : > { %v4812_v8 = vpop.f32.mrb[66].mxu0  ;;  %2301 = vadd.xlane.f32.xlu1 %v2300_v62  ;;  %v2083_v62 = vmul.f32 %v6344_v16, %v1948_v58 }
 0x17d   : > { %v6657_v28 = vadd.f32 %v4812_v8, %v6316_v19  ;;  %v1279_v10 = vpop.f32.mrb[67].mxu0  ;;  %v1962_v8 = vmax.f32 %v6635_v29, 0.0  ;;  %v1963_v29 = vmax.f32 %v1835_v0, 0.0 }
 0x17e   : > { %v1837_v54 = vadd.f32 %v6316_v19, %v1279_v10  ;;  %v2309_v60 = vsel %vm7943_vm0, %v2083_v62, 0.0 }
 0x17f   : > { %2277 = vadd.xlane.f32.xlu0 %v2276_v39  ;;  %v2097_v56 = vmul.f32 %v6344_v16, %v1962_v8  ;;  %v2098_v13 = vmul.f32 %v6344_v16, %v1963_v29 }
 0x180   : > { %v4815_v55 = vpop.f32.mrb[68].mxu0  ;;  %2307 = vadd.xlane.f32.xlu1 %v2306_v22  ;;  %v2085_v22 = vmul.f32 %v6344_v16, %v1950_v59 }
 0x181   : > { %v6667_v2 = vadd.f32 %v4815_v55, %v6316_v19  ;;  %v1289_v53 = vpop.f32.mrb[69].mxu0  ;;  %v2351_v58 = vsel %vm7943_vm0, %v2097_v56, 0.0  ;;  %v2354_v59 = vsel %vm7943_vm0, %v2098_v13, 0.0 }
 0x182   : > { %v6672_v18 = vadd.f32 %v6316_v19, %v1289_v53  ;;  %v2315_v8 = vsel %vm7943_vm0, %v2085_v22, 0.0 }
 0x183   : > { %2286 = vadd.xlane.f32.xlu0 %v2285_v32 }
 0x184   : > { %v4818_v6 = vpop.f32.mrb[70].mxu0  ;;  %2322 = vadd.xlane.f32.xlu1 %v2321_v1  ;;  %v2084_v1 = vmul.f32 %v6344_v16, %v1949_v26 }
 0x185   : > { %v6679_v21 = vadd.f32 %v4818_v6, %v6316_v19  ;;  %v1299_v61 = vpop.f32.mrb[71].mxu0  ;;  %v1965_v6 = vmax.f32 %v1837_v54, 0.0 }
 0x186   : > { %v1841_v24 = vadd.f32 %v6316_v19, %v1299_v61  ;;  %v2312_v29 = vsel %vm7943_vm0, %v2084_v1, 0.0  ;;  %v1955_v1 = vmax.f32 %v6604_v4, 0.0 }
 0x187   : > { %2283 = vadd.xlane.f32.xlu0 %v2282_v63  ;;  %v2100_v62 = vmul.f32 %v6344_v16, %v1965_v6 }
 0x188   : > { %v4821_v10 = vpop.f32.mrb[72].mxu0  ;;  %2319 = vadd.xlane.f32.xlu1 %v2318_v45  ;;  %v2089_v45 = vmul.f32 %v6344_v16, %v1954_v14 }
 0x189   : > { %v6689_v23 = vadd.f32 %v4821_v10, %v6316_v19  ;;  %v1309_v55 = vpop.f32.mrb[73].mxu0  ;;  %v1968_v10 = vmax.f32 %v6667_v2, 0.0  ;;  %v2360_v26 = vsel %vm7943_vm0, %v2100_v62, 0.0 }
 0x18a   : > { %v6693_v39 = vadd.f32 %v6316_v19, %v1309_v55  ;;  %v1953_v55 = vmax.f32 %v6592_v15, 0.0  ;;  %v1956_v15 = vmax.f32 %v6599_v35, 0.0  ;;  %v2327_v6 = vsel %vm7943_vm0, %v2089_v45, 0.0 }
 0x18b   : > { %2310 = vadd.xlane.f32.xlu0 %v2309_v60  ;;  %v2103_v22 = vmul.f32 %v6344_v16, %v1968_v10  ;;  %v1958_v45 = vmax.f32 %v6611_v52, 0.0 }
 0x18c   : > { %v4824_v53 = vpop.f32.mrb[74].mxu0  ;;  %2352 = vadd.xlane.f32.xlu1 %v2351_v58  ;;  %v2088_v58 = vmul.f32 %v6344_v16, %v1953_v55  ;;  %v2091_v10 = vmul.f32 %v6344_v16, %v1956_v15  ;;  %v1971_v62 = vmax.f32 %v6693_v39, 0.0 }
 0x18d   : > { %v6700_v3 = vadd.f32 %v4824_v53, %v6316_v19  ;;  %v1319_v0 = vpop.f32.mrb[75].mxu0  ;;  %v1969_v53 = vmax.f32 %v1841_v24, 0.0 }
 0x18e   : > { %v6704_v32 = vadd.f32 %v6316_v19, %v1319_v0 }
 0x18f   : > { %2316 = vadd.xlane.f32.xlu0 %v2315_v8  ;;  %v2104_v8 = vmul.f32 %v6344_v16, %v1969_v53  ;;  %v2090_v53 = vmul.f32 %v6344_v16, %v1955_v1  ;;  %v6774_v1 = vpop.permute.xlu1 %2553 }
 0x190   : > { %v4827_v61 = vpop.f32.mrb[76].mxu0  ;;  %2355 = vadd.xlane.f32.xlu1 %v2354_v59 }
 0x191   : > { %v6711_v50 = vadd.f32 %v4827_v61, %v6316_v19  ;;  %v1329_v54 = vpop.f32.mrb[77].mxu0  ;;  %v1972_v61 = vmax.f32 %v6689_v23, 0.0 }
 0x192   : > { %v6716_v63 = vadd.f32 %v6316_v19, %v1329_v54  ;;  %v2324_v54 = vsel %vm7943_vm0, %v2088_v58, 0.0  ;;  %v1957_v58 = vmax.f32 %v6616_v43, 0.0  ;;  %v7976_v43 = vlaneseq }
 0x193   : > { %2313 = vadd.xlane.f32.xlu0 %v2312_v29  ;;  %v2107_v29 = vmul.f32 %v6344_v16, %v1972_v61  ;;  %v2093_v61 = vmul.f32 %v6344_v16, %v1958_v45 }
 0x194   : > { %v4830_v17 = vpop.f32.mrb[78].mxu0  ;;  %2361 = vadd.xlane.f32.xlu1 %v2360_v26 }
 0x195   : > { %v6723_v56 = vadd.f32 %v4830_v17, %v6316_v19  ;;  %v1339_v2 = vpop.f32.mrb[79].mxu0  ;;  %v2372_v17 = vsel %vm7943_vm0, %v2104_v8, 0.0  ;;  %v1973_v8 = vmax.f32 %v6704_v32, 0.0  ;;  %v2092_v32 = vmul.f32 %v6344_v16, %v1957_v58 }
 0x196   : > { %v6727_v60 = vadd.f32 %v6316_v19, %v1339_v2  ;;  %v2369_v19 = vsel %vm7943_vm0, %v2103_v22, 0.0  ;;  %v2333_v2 = vsel %vm7943_vm0, %v2091_v10, 0.0  ;;  %v1974_v22 = vmax.f32 %v6700_v3, 0.0 }
 0x197   : > { %2328 = vadd.xlane.f32.xlu0 %v2327_v6  ;;  %v2106_v6 = vmul.f32 %v6344_v16, %v1971_v62 }
 0x198   : > { %v4833_v0 = vpop.f32.mrb[80].mxu0  ;;  %2370 = vadd.xlane.f32.xlu1 %v2369_v19  ;;  %v2109_v10 = vmul.f32 %v6344_v16, %v1974_v22  ;;  %v2108_v22 = vmul.f32 %v6344_v16, %v1973_v8 }
 0x199   : > { %v6734_v13 = vadd.f32 %v4833_v0, %v6323_v11  ;;  %v1349_v24 = vpop.f32.mrb[81].mxu0  ;;  %v2381_v0 = vsel %vm7943_vm0, %v2107_v29, 0.0  ;;  %v2339_v29 = vsel %vm7943_vm0, %v2093_v61, 0.0  ;;  %v2336_v61 = vsel %vm7943_vm0, %v2092_v32, 0.0 }
 0x19a   : > { %v6739_v14 = vadd.f32 %v6323_v11, %v1349_v24  ;;  %v2330_v24 = vsel %vm7943_vm0, %v2090_v53, 0.0  ;;  %v2387_v53 = vsel %vm7943_vm0, %v2109_v10, 0.0  ;;  %v1975_v10 = vmax.f32 %v6716_v63, 0.0 }
 0x19b   : > { %2325 = vadd.xlane.f32.xlu0 %v2324_v54 }
 0x19c   : > { %v4836_v35 = vpop.f32.mrb[82].mxu0  ;;  %2373 = vadd.xlane.f32.xlu1 %v2372_v17  ;;  %v1960_v17 = vmax.f32 %v6623_v57, 0.0  ;;  %v2110_v46 = vmul.f32 %v6344_v16, %v1975_v10 }
 0x19d   : > { %v6746_v59 = vadd.f32 %v4836_v35, %v6323_v11  ;;  %v1359_v23 = vpop.f32.mrb[83].mxu0  ;;  %v2378_v35 = vsel %vm7943_vm0, %v2106_v6, 0.0 }
 0x19e   : > { %v6751_v55 = vadd.f32 %v6323_v11, %v1359_v23  ;;  %v6781_v23 = vand.u32 127, %v7976_v43  ;;  %v2384_v43 = vsel %vm7943_vm0, %v2108_v22, 0.0  ;;  %v2390_v42 = vsel %vm7943_vm0, %v2110_v46, 0.0 }
 0x19f   : > { %2334 = vadd.xlane.f32.xlu0 %v2333_v2  ;;  %v1976_v2 = vmax.f32 %v6711_v50, 0.0 }
 0x1a0   : > { %v4839_v4 = vpop.f32.mrb[84].mxu0  ;;  %2382 = vadd.xlane.f32.xlu1 %v2381_v0  ;;  %7977 = vst [vmem:[#allocation36_spill] sm:$0xff] %v6781_v23  ;;  %v2840_v57 = vadd.s32 4294967264, %v6781_v23  ;;  %v2819_v6 = vadd.s32 4294967288, %v6781_v23  ;;  %v2826_v50 = vadd.s32 4294967280, %v6781_v23  ;;  %v2833_v22 = vadd.s32 4294967272, %v6781_v23 }
 0x1a1   : > { %v6758_v26 = vadd.f32 %v4839_v4, %v6323_v11  ;;  %v1369_v39 = vpop.f32.mrb[85].mxu0  ;;  %v2854_v10 = vadd.s32 4294967248, %v6781_v23 }
 0x1a2   : > { %v6763_v15 = vadd.f32 %v6323_v11, %v1369_v39  ;;  %v6821_v63 = vsub.s32 %v2819_v6, %v6275_v27 }
 0x1a3   : > { %2331 = vadd.xlane.f32.xlu0 %v2330_v24  ;;  %v1959_v24 = vmax.f32 %v6628_v12, 0.0  ;;  %v6815_v12 = vsub.s32 %v6781_v23, %v6275_v27 }
 0x1a4   : > { %v4842_v52 = vpop.f32.mrb[86].mxu0  ;;  %2379 = vadd.xlane.f32.xlu1 %v2378_v35 }
 0x1a5   : > { %v6770_v19 = vadd.f32 %v4842_v52, %v6323_v11  ;;  %v1379_v3 = vpop.f32.mrb[87].mxu0  ;;  %v2847_v52 = vadd.s32 4294967256, %v6781_v23 }
 0x1a6   : > { %v6777_v54 = vadd.f32 %v6323_v11, %v1379_v3  ;;  %v2095_v3 = vmul.f32 %v6344_v16, %v1960_v17  ;;  %v6818_v17 = vsub.s32 %v2840_v57, %v6275_v27 }
 0x1a7   : > { %2340 = vadd.xlane.f32.xlu0 %v2339_v29  ;;  %v2111_v29 = vmul.f32 %v6344_v16, %v1976_v2  ;;  %v2868_v2 = vadd.s32 4294967232, %v6781_v23 }
 0x1a8   : > { %v4845_v62 = vpop.f32.mrb[88].mxu0  ;;  %2388 = vadd.xlane.f32.xlu1 %v2387_v53  ;;  %v2345_v57 = vsel %vm7943_vm0, %v2095_v3, 0.0 }
 0x1a9   : > { %v6787_v4 = vadd.f32 %v4845_v62, %v6323_v11  ;;  %v1389_v45 = vpop.f32.mrb[89].mxu0  ;;  %v6796_v0 = vpop.xlane.xlu1 %2175 }
 0x1aa   : > { %v6792_v39 = vadd.f32 %v6323_v11, %v1389_v45  ;;  %v6824_v45 = vsub.s32 %v2847_v52, %v6275_v27  ;;  %v2393_v52 = vsel %vm7943_vm0, %v2111_v29, 0.0 }
 0x1ab   : > { %2337 = vadd.xlane.f32.xlu0 %v2336_v61  ;;  %v2094_v61 = vmul.f32 %v6344_v16, %v1959_v24 }
 0x1ac   : > { %v4848_v58 = vpop.f32.mrb[90].mxu0  ;;  %2385 = vadd.xlane.f32.xlu1 %v2384_v43  ;;  %v2164_v32 = vpop.xlane.xlu0 %2163  ;;  %v1980_v43 = vmax.f32 %v6734_v13, 0.0  ;;  %v6848_v13 = vsub.s32 %v2868_v2, %v6275_v27  ;;  %v1982_v2 = vmax.f32 %v6746_v59, 0.0 }
 0x1ad   : > { %v6805_v8 = vadd.f32 %v4848_v58, %v6323_v11  ;;  %v1399_v35 = vpop.f32.mrb[91].mxu0  ;;  %v6826_v53 = vpop.xlane.xlu1 %2178  ;;  %v1961_v58 = vmax.f32 %v6640_v44, 0.0  ;;  %v2556_v44 = vadd.f32 %v6774_v1, %v2164_v32  ;;  %v2896_v32 = vadd.s32 4294967200, %v6781_v23 }
 0x1ae   : > { %v6810_v62 = vadd.f32 %v6323_v11, %v1399_v35  ;;  %v6834_v35 = vsub.s32 %v2826_v50, %v6275_v27  ;;  %v2889_v50 = vadd.s32 4294967208, %v6781_v23  ;;  %v2115_v40 = vmul.f32 %v6344_v16, %v1980_v43 }
 0x1af   : > { %2346 = vadd.xlane.f32.xlu0 %v2345_v57  ;;  %v1964_v57 = vmax.f32 %v6647_v31, 0.0  ;;  %v2096_v47 = vmul.f32 %v6344_v16, %v1961_v58  ;;  %v1966_v31 = vmax.f32 %v6657_v28, 0.0  ;;  %v6879_v16 = vsub.s32 %v2854_v10, %v6275_v27 }
 0x1b0   : > { %v4851_v6 = vpop.f32.mrb[92].mxu0  ;;  %2394 = vadd.xlane.f32.xlu1 %v2393_v52  ;;  %v2167_v3 = vpop.xlane.xlu0 %2166  ;;  %v2342_v52 = vsel %vm7943_vm0, %v2094_v61, 0.0  ;;  %v6871_v59 = vsub.s32 %v2889_v50, %v6275_v27  ;;  %v6882_v28 = vsub.s32 %v2896_v32, %v6275_v27  ;;  %v2861_v43 = vadd.s32 4294967240, %v6781_v23 }
 0x1b1   : > { %v6839_v48 = vadd.f32 %v4851_v6, %v6323_v11  ;;  %v1409_v51 = vpop.f32.mrb[93].mxu0  ;;  %v6850_v29 = vpop.xlane.xlu1 %2187  ;;  %v6853_v6 = vsub.s32 %v2833_v22, %v6275_v27  ;;  %v2348_v50 = vsel %vm7943_vm0, %v2096_v47, 0.0  ;;  %v2405_v32 = vsel %vm7943_vm0, %v2115_v40, 0.0 }
 0x1b2   : > { %v6844_v24 = vadd.f32 %v6323_v11, %v1409_v51  ;;  %v2557_v51 = vadd.f32 %v6774_v1, %v2167_v3  ;;  %v2818_v3 = vrot.slane %v2556_v44, %v6815_v12  ;;  %v1967_v40 = vmax.f32 %v6672_v18, 0.0 }
 0x1b3   : > { %2343 = vadd.xlane.f32.xlu0 %v2342_v52 }
 0x1b4   : > { %v4854_v41 = vpop.f32.mrb[94].mxu0  ;;  %v2823_v61 = vrot.slane %v2557_v51, %v6821_v63  ;;  %2391 = vadd.xlane.f32.xlu1 %v2390_v42  ;;  %v2170_v46 = vpop.xlane.xlu0 %2169  ;;  %v1981_v51 = vmax.f32 %v6751_v55, 0.0  ;;  %v2903_v55 = vadd.s32 4294967192, %v6781_v23 }
 0x1b5   : > { %v6864_v22 = vadd.f32 %v4854_v41, %v6323_v11  ;;  %v1419_v38 = vpop.f32.mrb[95].mxu0  ;;  %v6873_v58 = vpop.xlane.xlu1 %2196  ;;  %v2558_v44 = vadd.f32 %v6774_v1, %v2170_v46 }
 0x1b6   : > { %v6876_v41 = vadd.f32 %v6323_v11, %v1419_v38  ;;  %v2825_v42 = vsel %vm2824_vm2, %v2823_v61, %v2818_v3  ;;  %v6891_v38 = vld [vmem:[%s7902_s6] ss:$0 sm:$0xff] }
 0x1b7   : > { %7978 = vst [vmem:[#allocation37_spill] sm:$0xff] %v6864_v22  ;;  %v2099_v11 = vmul.f32 %v6891_v38, %v1964_v57  ;;  %v2117_v61 = vmul.f32 %v6891_v38, %v1982_v2  ;;  %v2830_v47 = vrot.slane %v2558_v44, %v6834_v35  ;;  %2349 = vadd.xlane.f32.xlu0 %v2348_v50  ;;  %v2875_v44 = vadd.s32 4294967224, %v6781_v23 }
 0x1b8   : > { %v4857_v10 = vpop.f32.mrb[96].mxu0  ;;  %2406 = vadd.xlane.f32.xlu1 %v2405_v32  ;;  %v2101_v57 = vmul.f32 %v6891_v38, %v1966_v31  ;;  %v2173_v36 = vpop.xlane.xlu0 %2172  ;;  %v6912_v2 = vsub.s32 %v2861_v43, %v6275_v27  ;;  %v2561_v50 = vadd.f32 %v6774_v1, %v6826_v53  ;;  %v2116_v9 = vmul.f32 %v6891_v38, %v1981_v51 }
 0x1b9   : > { %v6897_v52 = vadd.f32 %v4857_v10, %v6326_v7  ;;  %v1429_v3 = vpop.f32.mrb[97].mxu0  ;;  %v2560_v10 = vadd.f32 %v6774_v1, %v6796_v0  ;;  %v6909_v37 = vpop.xlane.xlu1 %2199  ;;  %v2832_v31 = vsel %vm2831_vm3, %v2830_v47, %v2825_v42  ;;  %v2559_v32 = vadd.f32 %v6774_v1, %v2173_v36 }
 0x1ba   : > { %v6902_v46 = vadd.f32 %v6326_v7, %v1429_v3  ;;  %v2357_v18 = vsel %vm7943_vm0, %v2099_v11, 0.0  ;;  %v1992_v0 = vmax.f32 %v6839_v48, 0.0  ;;  %v2411_v33 = vsel %vm7943_vm0, %v2117_v61, 0.0 }
 0x1bb   : > { %v2837_v53 = vrot.slane %v2559_v32, %v6853_v6  ;;  %2358 = vadd.xlane.f32.xlu0 %v2357_v18  ;;  %v2363_v42 = vsel %vm7943_vm0, %v2101_v57, 0.0  ;;  %v6929_v36 = vsub.s32 %v2903_v55, %v6275_v27  ;;  %v2917_v48 = vadd.s32 4294967176, %v6781_v23 }
 0x1bc   : > { %v4860_v3 = vpop.f32.mrb[98].mxu0  ;;  %2412 = vadd.xlane.f32.xlu1 %v2411_v33  ;;  %v1970_v11 = vmax.f32 %v6679_v21, 0.0  ;;  %v2844_v61 = vrot.slane %v2560_v10, %v6818_v17  ;;  %v2182_v47 = vpop.xlane.xlu0 %2181  ;;  %v2102_v32 = vmul.f32 %v6891_v38, %v1967_v40  ;;  %v2851_v33 = vrot.slane %v2561_v50, %v6824_v45 }
 0x1bd   : > { %v6923_v43 = vadd.f32 %v4860_v3, %v6326_v7  ;;  %v1439_v34 = vpop.f32.mrb[99].mxu0  ;;  %v6934_v3 = vpop.xlane.xlu1 %2202  ;;  %v2839_v57 = vsel %vm2838_vm4, %v2837_v53, %v2832_v31  ;;  %v1993_v55 = vmax.f32 %v6876_v41, 0.0  ;;  %v2562_v18 = vadd.f32 %v6774_v1, %v2182_v47 }
 0x1be   : > { %v6937_v51 = vadd.f32 %v6326_v7, %v1439_v34  ;;  %v2846_v21 = vsel %vm2845_vm5, %v2844_v61, %v2839_v57  ;;  %v2408_v10 = vsel %vm7943_vm0, %v2116_v9, 0.0  ;;  %v2127_v40 = vmul.f32 %v6891_v38, %v1992_v0 }
 0x1bf   : > { %v2853_v50 = vsel %vm2852_vm6, %v2851_v33, %v2846_v21  ;;  %v2858_v31 = vrot.slane %v2562_v18, %v6879_v16  ;;  %2364 = vadd.xlane.f32.xlu0 %v2363_v42  ;;  %v6953_v41 = vsub.s32 %v2875_v44, %v6275_v27  ;;  %v2882_v53 = vadd.s32 4294967216, %v6781_v23 }
 0x1c0   : > { %v4863_v20 = vpop.f32.mrb[100].mxu0  ;;  %2409 = vadd.xlane.f32.xlu1 %v2408_v10  ;;  %v1978_v9 = vmax.f32 %v6723_v56, 0.0  ;;  %v2185_v61 = vpop.xlane.xlu0 %2184  ;;  %v6960_v47 = vsub.s32 %v2917_v48, %v6275_v27  ;;  %v2105_v57 = vmul.f32 %v6891_v38, %v1970_v11  ;;  %v2128_v56 = vmul.f32 %v6891_v38, %v1993_v55 }
 0x1c1   : > { %v6947_v30 = vadd.f32 %v4863_v20, %v6326_v7  ;;  %v1449_v34 = vpop.f32.mrb[101].mxu0  ;;  %v2564_v20 = vadd.f32 %v6774_v1, %v6850_v29  ;;  %v6962_v0 = vpop.xlane.xlu1 %2208  ;;  %v2860_v42 = vsel %vm2859_vm7, %v2858_v31, %v2853_v50  ;;  %v2563_v44 = vadd.f32 %v6774_v1, %v2185_v61 }
 0x1c2   : > { %v6965_v33 = vadd.f32 %v6326_v7, %v1449_v34  ;;  %v1996_v29 = vmax.f32 %v6897_v52, 0.0  ;;  %v2366_v21 = vsel %vm7943_vm0, %v2102_v32, 0.0  ;;  %v2441_v48 = vsel %vm7943_vm0, %v2127_v40, 0.0 }
 0x1c3   : > { %v1977_v50 = vmax.f32 %v6727_v60, 0.0  ;;  %v2865_v31 = vrot.slane %v2563_v44, %v6912_v2  ;;  %2367 = vadd.xlane.f32.xlu0 %v2366_v21  ;;  %v2910_v11 = vadd.s32 4294967184, %v6781_v23  ;;  %v2872_v32 = vrot.slane %v2564_v20, %v6848_v13 }
 0x1c4   : > { %v4866_v18 = vpop.f32.mrb[102].mxu0  ;;  %2442 = vadd.xlane.f32.xlu1 %v2441_v48  ;;  %v2191_v55 = vpop.xlane.xlu0 %2190  ;;  %v6985_v40 = vsub.s32 %v2882_v53, %v6275_v27  ;;  %v2113_v60 = vmul.f32 %v6891_v38, %v1978_v9  ;;  %v2375_v21 = vsel %vm7943_vm0, %v2105_v57, 0.0  ;;  %v2444_v48 = vsel %vm7943_vm0, %v2128_v56, 0.0 }
 0x1c5   : > { %v6975_v10 = vadd.f32 %v4866_v18, %v6326_v7  ;;  %v1459_v34 = vpop.f32.mrb[103].mxu0  ;;  %v2206_v61 = vpop.xlane.xlu1 %2205  ;;  %v2867_v44 = vsel %vm2866_vm8, %v2865_v31, %v2860_v42  ;;  %v2565_v18 = vadd.f32 %v6774_v1, %v2191_v55  ;;  %v1998_v20 = vmax.f32 %v6923_v43, 0.0 }
 0x1c6   : > { %v6981_v52 = vadd.f32 %v6326_v7, %v1459_v34  ;;  %v2874_v23 = vsel %vm2873_vm9, %v2872_v32, %v2867_v44  ;;  %v2131_v9 = vmul.f32 %v6891_v38, %v1996_v29  ;;  %v7000_v31 = vsub.s32 %v2910_v11, %v6275_v27 }
 0x1c7   : > { %v2879_v42 = vrot.slane %v2565_v18, %v6953_v41  ;;  %2376 = vadd.xlane.f32.xlu0 %v2375_v21  ;;  %v2112_v57 = vmul.f32 %v6891_v38, %v1977_v50  ;;  %v1979_v43 = vmax.f32 %v6739_v14, 0.0  ;;  %v2567_v56 = vadd.f32 %v6774_v1, %v6873_v58 }
 0x1c8   : > { %v4869_v34 = vpop.f32.mrb[104].mxu0  ;;  %2445 = vadd.xlane.f32.xlu1 %v2444_v48  ;;  %v2194_v32 = vpop.xlane.xlu0 %2193  ;;  %v2399_v55 = vsel %vm7943_vm0, %v2113_v60, 0.0  ;;  %v2568_v27 = vadd.f32 %v6774_v1, %v6909_v37  ;;  %v2569_v11 = vadd.f32 %v6774_v1, %v6934_v3  ;;  %v2000_v58 = vmax.f32 %v6947_v30, 0.0 }
 0x1c9   : > { %v6995_v53 = vadd.f32 %v4869_v34, %v6326_v7  ;;  %v1469_v22 = vpop.f32.mrb[105].mxu0  ;;  %v2215_v44 = vpop.xlane.xlu1 %2214  ;;  %v2881_v50 = vsel %vm2880_vm10, %v2879_v42, %v2874_v23  ;;  %v2566_v14 = vadd.f32 %v6774_v1, %v2194_v32  ;;  %v2453_v21 = vsel %vm7943_vm0, %v2131_v9, 0.0 }
 0x1ca   : > { %v7008_v29 = vadd.f32 %v6326_v7, %v1469_v22  ;;  %v2133_v48 = vmul.f32 %v6891_v38, %v1998_v20  ;;  %v2570_v3 = vadd.f32 %v6774_v1, %v2206_v61  ;;  %v2893_v30 = vrot.slane %v2567_v56, %v6871_v59 }
 0x1cb   : > { %v2886_v37 = vrot.slane %v2566_v14, %v6985_v40  ;;  %2400 = vadd.xlane.f32.xlu0 %v2399_v55  ;;  %v2571_v34 = vadd.f32 %v6774_v1, %v6962_v0  ;;  %v2396_v42 = vsel %vm7943_vm0, %v2112_v57, 0.0  ;;  %v2114_v32 = vmul.f32 %v6891_v38, %v1979_v43 }
 0x1cc   : > { %v4872_v18 = vpop.f32.mrb[106].mxu0  ;;  %2454 = vadd.xlane.f32.xlu1 %v2453_v21  ;;  %v7030_v9 = vpop.xlane.xlu0 %2523  ;;  %v1984_v61 = vmax.f32 %v6758_v26, 0.0  ;;  %v2900_v55 = vrot.slane %v2568_v27, %v6882_v28  ;;  %v2907_v14 = vrot.slane %v2569_v11, %v6929_v36  ;;  %v2459_v0 = vsel %vm7943_vm0, %v2133_v48, 0.0 }
 0x1cd   : > { %v7019_v60 = vadd.f32 %v4872_v18, %v6326_v7  ;;  %v1479_v22 = vpop.f32.mrb[107].mxu0  ;;  %v7033_v20 = vpop.xlane.xlu1 %2532  ;;  %v2888_v18 = vsel %vm7942_vm11, %v2886_v37, %v2881_v50  ;;  %v2914_v26 = vrot.slane %v2570_v3, %v7000_v31  ;;  %v2002_v27 = vmax.f32 %v6975_v10, 0.0 }
 0x1ce   : > { %v7025_v23 = vadd.f32 %v6326_v7, %v1479_v22  ;;  %7979 = vst [vmem:[#allocation38_spill] sm:$0xff] %v7033_v20  ;;  %v2895_v21 = vsel %vm2894_vm12, %v2893_v30, %v2888_v18  ;;  %v2135_v20 = vmul.f32 %v6891_v38, %v2000_v58  ;;  %v2573_v11 = vadd.f32 %v6774_v1, %v2215_v44 }
 0x1cf   : > { %v2902_v43 = vsel %vm2901_vm13, %v2900_v55, %v2895_v21  ;;  %2397 = vadd.xlane.f32.xlu0 %v2396_v42  ;;  %v2921_v50 = vrot.slane %v2571_v34, %v6960_v47  ;;  %v2402_v30 = vsel %vm7943_vm0, %v2114_v32, 0.0  ;;  %v1983_v3 = vmax.f32 %v6763_v15, 0.0 }
 0x1d0   : > { %v4875_v56 = vpop.f32.mrb[108].mxu0  ;;  %v2909_v37 = vsel %vm7940_vm14, %v2907_v14, %v2902_v43  ;;  %v7052_v48 = vpop.xlane.xlu0 %2526  ;;  %2460 = vadd.xlane.f32.xlu1 %v2459_v0  ;;  %v2119_v42 = vmul.f32 %v6891_v38, %v1984_v61  ;;  %v2001_v14 = vmax.f32 %v6981_v52, 0.0  ;;  %v2465_v32 = vsel %vm7943_vm0, %v2135_v20, 0.0 }
 0x1d1   : > { %v7043_v22 = vadd.f32 %v4875_v56, %v6326_v7  ;;  %v1489_v57 = vpop.f32.mrb[109].mxu0  ;;  %v2212_v18 = vpop.xlane.xlu1 %2211  ;;  %v2916_v10 = vsel %vm2915_vm15, %v2914_v26, %v2909_v37  ;;  %v2931_v15 = vrot.slane %v2573_v11, %v6821_v63  ;;  %v2137_v61 = vmul.f32 %v6891_v38, %v2002_v27 }
 0x1d2   : > { %v7056_v58 = vadd.f32 %v6326_v7, %v1489_v57  ;;  %v2572_v44 = vadd.f32 %v6774_v1, %v2212_v18  ;;  %v7063_v55 = vsel %vm2922_vm1, %v2921_v50, %v2916_v10  ;;  %v1986_v50 = vmax.f32 %v6770_v19, 0.0 }
 0x1d3   : > { %2403 = vadd.xlane.f32.xlu0 %v2402_v30  ;;  %v2417_v11 = vsel %vm7943_vm0, %v2119_v42, 0.0  ;;  %v2118_v37 = vmul.f32 %v6891_v38, %v1983_v3  ;;  %v2004_v18 = vmax.f32 %v6995_v53, 0.0  ;;  %v2471_v27 = vsel %vm7943_vm0, %v2137_v61, 0.0 }
 0x1d4   : > { %v4878_v34 = vpop.f32.mrb[110].mxu0  ;;  %v2927_v0 = vrot.slane %v2572_v44, %v6815_v12  ;;  %v7076_v43 = vpop.xlane.xlu0 %2529  ;;  %2466 = vadd.xlane.f32.xlu1 %v2465_v32  ;;  %v1985_v42 = vmax.f32 %v6777_v54, 0.0 }
 0x1d5   : > { %v7068_v56 = vadd.f32 %v4878_v34, %v6326_v7  ;;  %v1499_v21 = vpop.f32.mrb[111].mxu0  ;;  %v2221_v52 = vpop.xlane.xlu1 %2220  ;;  %v2414_v3 = vsel %vm7943_vm0, %v2118_v37, 0.0  ;;  %v2139_v53 = vmul.f32 %v6891_v38, %v2004_v18  ;;  %v1988_v18 = vmax.f32 %v6787_v4, 0.0 }
 0x1d6   : > { %v7073_v57 = vadd.f32 %v6326_v7, %v1499_v21  ;;  %v2932_v20 = vsel %vm2824_vm2, %v2931_v15, %v2927_v0  ;;  %v2136_v7 = vmul.f32 %v6891_v38, %v2001_v14  ;;  %v2575_v10 = vadd.f32 %v6774_v1, %v2221_v52 }
 0x1d7   : > { %2418 = vadd.xlane.f32.xlu0 %v2417_v11  ;;  %v2121_v14 = vmul.f32 %v6891_v38, %v1986_v50  ;;  %v2003_v15 = vmax.f32 %v7008_v29, 0.0  ;;  %v2120_v29 = vmul.f32 %v6891_v38, %v1985_v42 }
 0x1d8   : > { %v7079_v26 = vpop.f32.mrb[112].mxu0  ;;  %v2227_v44 = vpop.xlane.xlu0 %2226  ;;  %2472 = vadd.xlane.f32.xlu1 %v2471_v27  ;;  %v2468_v61 = vsel %vm7943_vm0, %v2136_v7, 0.0  ;;  %v2941_v52 = vrot.slane %v2575_v10, %v6853_v6 }
 0x1d9   : > { %v1509_v30 = vpop.f32.mrb[113].mxu0  ;;  %v2218_v34 = vpop.xlane.xlu1 %2217  ;;  %v2577_v11 = vadd.f32 %v6774_v1, %v2227_v44  ;;  %v2423_v7 = vsel %vm7943_vm0, %v2121_v14, 0.0  ;;  %v2138_v44 = vmul.f32 %v6891_v38, %v2003_v15  ;;  %v1987_v14 = vmax.f32 %v6792_v39, 0.0 }
 0x1da   : > { %v2574_v32 = vadd.f32 %v6774_v1, %v2218_v34  ;;  %v1883_v39 = vadd.f32 %v6416_v5, %v1509_v30  ;;  %v1895_v30 = vadd.f32 %v6416_v5, %v6264_v49 }
 0x1db   : > { %2415 = vadd.xlane.f32.xlu0 %v2414_v3  ;;  %v2006_v3 = vmax.f32 %v7019_v60, 0.0  ;;  %v2123_v60 = vmul.f32 %v6891_v38, %v1988_v18 }
 0x1dc   : > { %v7089_v19 = vpop.f32.mrb[114].mxu0  ;;  %v2936_v0 = vrot.slane %v2574_v32, %v6834_v35  ;;  %v2224_v54 = vpop.xlane.xlu0 %2223  ;;  %2469 = vadd.xlane.f32.xlu1 %v2468_v61  ;;  %v2951_v61 = vrot.slane %v2577_v11, %v6824_v45 }
 0x1dd   : > { %v7094_v21 = vpop.f32.mrb[115].mxu0  ;;  %v2233_v37 = vpop.xlane.xlu1 %2232  ;;  %v2576_v27 = vadd.f32 %v6774_v1, %v2224_v54 }
 0x1de   : > { %v2937_v50 = vsel %vm2831_vm3, %v2936_v0, %v2932_v20  ;;  %v2477_v0 = vsel %vm7943_vm0, %v2139_v53, 0.0  ;;  %v2579_v42 = vadd.f32 %v6774_v1, %v2233_v37  ;;  %v2420_v53 = vsel %vm7943_vm0, %v2120_v29, 0.0 }
 0x1df   : > { %v2942_v32 = vsel %vm2838_vm4, %v2941_v52, %v2937_v50  ;;  %v2946_v20 = vrot.slane %v2576_v27, %v6818_v17  ;;  %2424 = vadd.xlane.f32.xlu0 %v2423_v7  ;;  %v2005_v27 = vmax.f32 %v7025_v23, 0.0  ;;  %v2141_v7 = vmul.f32 %v6891_v38, %v2006_v3 }
 0x1e0   : > { %v7104_v34 = vpop.f32.mrb[116].mxu0  ;;  %v2239_v4 = vpop.xlane.xlu0 %2238  ;;  %2478 = vadd.xlane.f32.xlu1 %v2477_v0  ;;  %v2961_v0 = vrot.slane %v2579_v42, %v6912_v2  ;;  %v2122_v3 = vmul.f32 %v6891_v38, %v1987_v14  ;;  %v2429_v42 = vsel %vm7943_vm0, %v2123_v60, 0.0  ;;  %v1989_v60 = vmax.f32 %v6810_v62, 0.0 }
 0x1e1   : > { %v7110_v10 = vpop.f32.mrb[117].mxu0  ;;  %v2230_v52 = vpop.xlane.xlu1 %2229  ;;  %v2947_v54 = vsel %vm2845_vm5, %v2946_v20, %v2942_v32  ;;  %v2474_v20 = vsel %vm7943_vm0, %v2138_v44, 0.0  ;;  %v2581_v18 = vadd.f32 %v6774_v1, %v2239_v4  ;;  %v2140_v4 = vmul.f32 %v6891_v38, %v2005_v27 }
 0x1e2   : > { %v2578_v15 = vadd.f32 %v6774_v1, %v2230_v52  ;;  %v2952_v11 = vsel %vm2852_vm6, %v2951_v61, %v2947_v54  ;;  %v1990_v54 = vmax.f32 %v6805_v8, 0.0  ;;  %v2426_v27 = vsel %vm7943_vm0, %v2122_v3, 0.0 }
 0x1e3   : > { %2421 = vadd.xlane.f32.xlu0 %v2420_v53  ;;  %v2124_v62 = vmul.f32 %v6891_v38, %v1989_v60  ;;  %v1991_v3 = vmax.f32 %v6844_v24, 0.0  ;;  %v2010_v60 = vmax.f32 %v7068_v56, 0.0  ;;  %v1997_v56 = vmax.f32 %v6937_v51, 0.0 }
 0x1e4   : > { %v7121_v50 = vpop.f32.mrb[118].mxu0  ;;  %v2956_v32 = vrot.slane %v2578_v15, %v6879_v16  ;;  %v2236_v23 = vpop.xlane.xlu0 %2235  ;;  %2475 = vadd.xlane.f32.xlu1 %v2474_v20  ;;  %v2011_v15 = vmax.f32 %v1883_v39, 0.0  ;;  %v2125_v14 = vmul.f32 %v6891_v38, %v1990_v54 }
 0x1e5   : > { %v7127_v37 = vpop.f32.mrb[119].mxu0  ;;  %v7135_v29 = vpop.xlane.xlu1 %2262  ;;  %v2580_v52 = vadd.f32 %v6774_v1, %v2236_v23  ;;  %v2126_v24 = vmul.f32 %v6891_v38, %v1991_v3 }
 0x1e6   : > { %v2957_v61 = vsel %vm2859_vm7, %v2956_v32, %v2952_v11  ;;  %v2483_v11 = vsel %vm7943_vm0, %v2141_v7, 0.0  ;;  %v2971_v32 = vrot.slane %v2581_v18, %v6953_v41  ;;  %v2480_v7 = vsel %vm7943_vm0, %v2140_v4, 0.0 }
 0x1e7   : > { %v2962_v44 = vsel %vm2866_vm8, %v2961_v0, %v2957_v61  ;;  %v2966_v53 = vrot.slane %v2580_v52, %v6848_v13  ;;  %2430 = vadd.xlane.f32.xlu0 %v2429_v42  ;;  %v2146_v0 = vmul.f32 %v6891_v38, %v2011_v15  ;;  %v2023_v18 = vmax.f32 %v1895_v30, 0.0 }
 0x1e8   : > { %v2245_v20 = vpop.xlane.xlu0 %2244  ;;  %2484 = vadd.xlane.f32.xlu1 %v2483_v11  ;;  %v2009_v42 = vmax.f32 %v7073_v57, 0.0  ;;  %v2432_v57 = vsel %vm7943_vm0, %v2124_v62, 0.0  ;;  %v2145_v62 = vmul.f32 %v6891_v38, %v2010_v60 }
 0x1e9   : > { %v7149_v49 = vpop.xlane.xlu1 %2268  ;;  %v2967_v8 = vsel %vm2873_vm9, %v2966_v53, %v2962_v44  ;;  %v2583_v23 = vadd.f32 %v6774_v1, %v2245_v20  ;;  %v2435_v44 = vsel %vm7943_vm0, %v2125_v14, 0.0  ;;  %v2498_v30 = vsel %vm7943_vm0, %v2146_v0, 0.0 }
 0x1ea   : > { %v2972_v39 = vsel %vm2880_vm10, %v2971_v32, %v2967_v8  ;;  %v2158_v4 = vmul.f32 %v6891_v38, %v2023_v18  ;;  %v1995_v8 = vmax.f32 %v6902_v46, 0.0 }
 0x1eb   : > { %2427 = vadd.xlane.f32.xlu0 %v2426_v27  ;;  %v2981_v53 = vrot.slane %v2583_v23, %v6871_v59  ;;  %v2144_v27 = vmul.f32 %v6891_v38, %v2009_v42 }
 0x1ec   : > { %v2242_v61 = vpop.xlane.xlu0 %2241  ;;  %2481 = vadd.xlane.f32.xlu1 %v2480_v7  ;;  %v2534_v0 = vsel %vm7943_vm0, %v2158_v4, 0.0  ;;  %v1898_v7 = vadd.f32 %v6268_v25, %v6416_v5  ;;  %v1999_v4 = vmax.f32 %v6965_v33, 0.0 }
 0x1ed   : > { %v7159_v52 = vpop.xlane.xlu1 %2271  ;;  %v2582_v54 = vadd.f32 %v6774_v1, %v2242_v61  ;;  %v2130_v61 = vmul.f32 %v6891_v38, %v1995_v8  ;;  %v2492_v25 = vsel %vm7943_vm0, %v2144_v27, 0.0 }
 0x1ee   : > { %v2134_v33 = vmul.f32 %v6891_v38, %v1999_v4 }
 0x1ef   : > { %v2976_v15 = vrot.slane %v2582_v54, %v6985_v40  ;;  %2436 = vadd.xlane.f32.xlu0 %v2435_v44  ;;  %v2438_v54 = vsel %vm7943_vm0, %v2126_v24, 0.0  ;;  %v2026_v44 = vmax.f32 %v1898_v7, 0.0  ;;  %v2495_v24 = vsel %vm7943_vm0, %v2145_v62, 0.0 }
 0x1f0   : > { %v2251_v11 = vpop.xlane.xlu0 %2250  ;;  %2499 = vadd.xlane.f32.xlu1 %v2498_v30 }
 0x1f1   : > { %v7170_v32 = vpop.xlane.xlu1 %2280  ;;  %v2977_v20 = vsel %vm7942_vm11, %v2976_v15, %v2972_v39  ;;  %v2585_v39 = vadd.f32 %v6774_v1, %v2251_v11  ;;  %v2450_v11 = vsel %vm7943_vm0, %v2130_v61, 0.0  ;;  %v2161_v8 = vmul.f32 %v6891_v38, %v2026_v44 }
 0x1f2   : > { %v2982_v14 = vsel %vm2894_vm12, %v2981_v53, %v2977_v20  ;;  %v2132_v53 = vmul.f32 %v6891_v38, %v1997_v56  ;;  %v1884_v44 = vadd.f32 %v7079_v26, %v6416_v5  ;;  %v2592_v26 = vadd.f32 %v6774_v1, %v7159_v52 }
 0x1f3   : > { %2433 = vadd.xlane.f32.xlu0 %v2432_v57  ;;  %v2991_v42 = vrot.slane %v2585_v39, %v6929_v36 }
 0x1f4   : > { %v2248_v18 = vpop.xlane.xlu0 %2247  ;;  %2535 = vadd.xlane.f32.xlu1 %v2534_v0  ;;  %v2456_v7 = vsel %vm7943_vm0, %v2132_v53, 0.0 }
 0x1f5   : > { %v7183_v23 = vpop.xlane.xlu1 %2292  ;;  %v2584_v46 = vadd.f32 %v6774_v1, %v2248_v18  ;;  %v2543_v18 = vsel %vm7943_vm0, %v2161_v8, 0.0 }
 0x1f7   : > { %v2986_v3 = vrot.slane %v2584_v46, %v6882_v28  ;;  %2439 = vadd.xlane.f32.xlu0 %v2438_v54 }
 0x1f8   : > { %v2257_v15 = vpop.xlane.xlu0 %2256  ;;  %2493 = vadd.xlane.f32.xlu1 %v2492_v25  ;;  %v2007_v25 = vmax.f32 %v7056_v58, 0.0 }
 0x1f9   : > { %v7193_v30 = vpop.xlane.xlu1 %2289  ;;  %v2987_v51 = vsel %vm2901_vm13, %v2986_v3, %v2982_v14  ;;  %v2587_v57 = vadd.f32 %v6774_v1, %v2257_v15  ;;  %v2008_v14 = vmax.f32 %v7043_v22, 0.0  ;;  %v2462_v3 = vsel %vm7943_vm0, %v2134_v33, 0.0 }
 0x1fa   : > { %v2992_v20 = vsel %vm7940_vm14, %v2991_v42, %v2987_v51  ;;  %vm7941_vm14 = vcmask 1041409   ;;  %v2589_v42 = vadd.f32 %v6774_v1, %v7135_v29  ;;  %v2591_v51 = vadd.f32 %v6774_v1, %v7149_v49 }
 0x1fb   : > { %2451 = vadd.xlane.f32.xlu0 %v2450_v11  ;;  %v3001_v46 = vrot.slane %v2587_v57, %v6960_v47  ;;  %v2143_v54 = vmul.f32 %v6891_v38, %v2008_v14 }
 0x1fc   : > { %v2254_v60 = vpop.xlane.xlu0 %2253  ;;  %2496 = vadd.xlane.f32.xlu1 %v2495_v24  ;;  %v2012_v24 = vmax.f32 %v1884_v44, 0.0  ;;  %v3020_v49 = vrot.slane %v2591_v51, %v6853_v6 }
 0x1fd   : > { %v7203_v27 = vpop.xlane.xlu1 %2298  ;;  %v2586_v0 = vadd.f32 %v6774_v1, %v2254_v60  ;;  %v2489_v8 = vsel %vm7943_vm0, %v2143_v54, 0.0 }
 0x1ff   : > { %v2996_v39 = vrot.slane %v2586_v0, %v7000_v31  ;;  %2457 = vadd.xlane.f32.xlu0 %v2456_v7  ;;  %v7980_v0 = vld [vmem:[#allocation37_spill] sm:$0xff]  ;;  %v3025_v7 = vrot.slane %v2592_v26, %v6818_v17 }
 0x200   : > { %v2260_v61 = vpop.xlane.xlu0 %2259  ;;  %2544 = vadd.xlane.f32.xlu1 %v2543_v18  ;;  %v1994_v52 = vmax.f32 %v7980_v0, 0.0 }
 0x201   : > { %v7212_v56 = vpop.xlane.xlu1 %2295  ;;  %v2997_v22 = vsel %vm2915_vm15, %v2996_v39, %v2992_v20  ;;  %v2588_v62 = vadd.f32 %v6774_v1, %v2260_v61  ;;  %v2142_v20 = vmul.f32 %v6891_v38, %v2007_v25  ;;  %v1886_v61 = vadd.f32 %v7089_v19, %v6416_v5 }
 0x202   : > { %v3002_v15 = vsel %vm2922_vm1, %v3001_v46, %v2997_v22  ;;  %v2147_v46 = vmul.f32 %v6891_v38, %v2012_v24  ;;  %v2595_v25 = vadd.f32 %v6774_v1, %v7170_v32  ;;  %v2129_v19 = vmul.f32 %v6891_v38, %v1994_v52 }
 0x203   : > { %v7226_v4 = vsel %vm7941_vm14, %v3002_v15, %v7063_v55  ;;  %2463 = vadd.xlane.f32.xlu0 %v2462_v3  ;;  %v3006_v53 = vrot.slane %v2588_v62, %v6815_v12  ;;  %v3010_v55 = vrot.slane %v2589_v42, %v6821_v63  ;;  %v2486_v22 = vsel %vm7943_vm0, %v2142_v20, 0.0 }
 0x204   : > { %v2266_v11 = vpop.xlane.xlu0 %2265  ;;  %v2501_v26 = vsel %vm7943_vm0, %v2147_v46, 0.0  ;;  %v1888_v32 = vadd.f32 %v7104_v34, %v6416_v5  ;;  %v3040_v20 = vrot.slane %v2595_v25, %v6912_v2  ;;  %v1890_v25 = vadd.f32 %v7121_v50, %v6416_v5 }
 0x205   : > { %v7231_v58 = vpop.xlane.xlu1 %2304  ;;  %v2590_v29 = vadd.f32 %v6774_v1, %v2266_v11  ;;  %v3011_v60 = vsel %vm2824_vm2, %v3010_v55, %v3006_v53  ;;  %v2014_v53 = vmax.f32 %v1886_v61, 0.0  ;;  %v1885_v11 = vadd.f32 %v6416_v5, %v7094_v21 }
 0x206   : > { %v2447_v21 = vsel %vm7943_vm0, %v2129_v19, 0.0  ;;  %v2016_v0 = vmax.f32 %v1888_v32, 0.0  ;;  %v2599_v61 = vadd.f32 %v6774_v1, %v7183_v23  ;;  %v2603_v50 = vadd.f32 %v6774_v1, %v7231_v58 }
 0x207   : > { %v3015_v57 = vrot.slane %v2590_v29, %v6834_v35  ;;  %2490 = vadd.xlane.f32.xlu0 %v2489_v8  ;;  %vm3479_vm14 = vcmask 1042434  }
 0x208   : > { %v2275_v33 = vpop.xlane.xlu0 %2274 }
 0x209   : > { %v2302_v14 = vpop.xlane.xlu1 %2301  ;;  %v3016_v39 = vsel %vm2831_vm3, %v3015_v57, %v3011_v60  ;;  %v2593_v18 = vadd.f32 %v6774_v1, %v2275_v33  ;;  %v2149_v57 = vmul.f32 %v6891_v38, %v2014_v53  ;;  %v1887_v33 = vadd.f32 %v6416_v5, %v7110_v10 }
 0x20a   : > { %v3021_v54 = vsel %vm2838_vm4, %v3020_v49, %v3016_v39  ;;  %v2013_v49 = vmax.f32 %v1885_v11, 0.0  ;;  %v2598_v39 = vadd.f32 %v6774_v1, %v7193_v30  ;;  %v2600_v10 = vadd.f32 %v6774_v1, %v7212_v56 }
 0x20b   : > { %v3026_v62 = vsel %vm2845_vm5, %v3025_v7, %v3021_v54  ;;  %v3030_v3 = vrot.slane %v2593_v18, %v6824_v45  ;;  %2487 = vadd.xlane.f32.xlu0 %v2486_v22  ;;  %v2507_v54 = vsel %vm7943_vm0, %v2149_v57, 0.0  ;;  %v2015_v22 = vmax.f32 %v1887_v33, 0.0 }
 0x20c   : > { %v2278_v44 = vpop.xlane.xlu0 %2277  ;;  %v2148_v46 = vmul.f32 %v6891_v38, %v2013_v49  ;;  %v2151_v30 = vmul.f32 %v6891_v38, %v2016_v0  ;;  %v3055_v56 = vrot.slane %v2598_v39, %v6985_v40  ;;  %v3060_v11 = vrot.slane %v2599_v61, %v6871_v59 }
 0x20d   : > { %v2308_v42 = vpop.xlane.xlu1 %2307  ;;  %v3031_v15 = vsel %vm2852_vm6, %v3030_v3, %v3026_v62  ;;  %v2594_v51 = vadd.f32 %v6774_v1, %v2278_v44  ;;  %v2601_v44 = vadd.f32 %v6774_v1, %v7203_v27 }
 0x20e   : > { %v2604_v62 = vadd.f32 %v6774_v1, %v2308_v42  ;;  %v2602_v42 = vadd.f32 %v6774_v1, %v2302_v14 }
 0x20f   : > { %v3035_v29 = vrot.slane %v2594_v51, %v6879_v16  ;;  %2502 = vadd.xlane.f32.xlu0 %v2501_v26  ;;  %v2504_v26 = vsel %vm7943_vm0, %v2148_v46, 0.0 }
 0x210   : > { %v2287_v24 = vpop.xlane.xlu0 %2286  ;;  %v3085_v32 = vrot.slane %v2604_v62, %v6815_v12 }
 0x211   : > { %v7265_v55 = vpop.xlane.xlu1 %2322  ;;  %v3036_v8 = vsel %vm2859_vm7, %v3035_v29, %v3031_v15  ;;  %v2597_v34 = vadd.f32 %v6774_v1, %v2287_v24  ;;  %v3065_v29 = vrot.slane %v2600_v10, %v6882_v28  ;;  %v2150_v24 = vmul.f32 %v6891_v38, %v2015_v22 }
 0x212   : > { %v3041_v60 = vsel %vm2866_vm8, %v3040_v20, %v3036_v8  ;;  %v3070_v8 = vrot.slane %v2601_v44, %v6929_v36 }
 0x213   : > { %2448 = vadd.xlane.f32.xlu0 %v2447_v21  ;;  %v3050_v23 = vrot.slane %v2597_v34, %v6953_v41  ;;  %v1889_v21 = vadd.f32 %v6416_v5, %v7127_v37  ;;  %v2018_v34 = vmax.f32 %v1890_v25, 0.0 }
 0x214   : > { %v2284_v52 = vpop.xlane.xlu0 %2283 }
 0x215   : > { %v2320_v7 = vpop.xlane.xlu1 %2319  ;;  %v2596_v18 = vadd.f32 %v6774_v1, %v2284_v52  ;;  %v3080_v52 = vrot.slane %v2603_v50, %v6960_v47  ;;  %v2153_v44 = vmul.f32 %v6891_v38, %v2018_v34 }
 0x216   : > { %v2608_v10 = vadd.f32 %v6774_v1, %v2320_v7 }
 0x217   : > { %v3045_v3 = vrot.slane %v2596_v18, %v6848_v13  ;;  %2508 = vadd.xlane.f32.xlu0 %v2507_v54  ;;  %v2513_v18 = vsel %vm7943_vm0, %v2151_v30, 0.0 }
 0x218   : > { %v2311_v15 = vpop.xlane.xlu0 %2310 }
 0x219   : > { %v7291_v51 = vpop.xlane.xlu1 %2352  ;;  %v3046_v19 = vsel %vm2873_vm9, %v3045_v3, %v3041_v60  ;;  %v2605_v53 = vadd.f32 %v6774_v1, %v2311_v15  ;;  %v3075_v60 = vrot.slane %v2602_v42, %v7000_v31  ;;  %v7982_v3 = vld [vmem:[#allocation33_spill] sm:$0xff]  ;;  %v2609_v15 = vadd.f32 %v6774_v1, %v7265_v55 }
 0x21a   : > { %v3051_v27 = vsel %vm2880_vm10, %v3050_v23, %v3046_v19  ;;  %v1896_v25 = vadd.f32 %v7982_v3, %v6416_v5  ;;  %v2017_v23 = vmax.f32 %v1889_v21, 0.0 }
 0x21b   : > { %v3056_v20 = vsel %vm7942_vm11, %v3055_v56, %v3051_v27  ;;  %v3089_v14 = vrot.slane %v2605_v53, %v6821_v63  ;;  %2505 = vadd.xlane.f32.xlu0 %v2504_v26  ;;  %vm7981_vm11 = vcmask 917312   ;;  %v2510_v56 = vsel %vm7943_vm0, %v2150_v24, 0.0  ;;  %v7983_v27 = vld [vmem:[#allocation34_spill] sm:$0xff] }
 0x21c   : > { %v3061_v57 = vsel %vm2894_vm12, %v3060_v11, %v3056_v20  ;;  %v2317_v58 = vpop.xlane.xlu0 %2316  ;;  %v3104_v11 = vrot.slane %v2608_v10, %v6818_v17  ;;  %v2024_v50 = vmax.f32 %v1896_v25, 0.0  ;;  %v1897_v26 = vadd.f32 %v6416_v5, %v7983_v27 }
 0x21d   : > { %v7309_v49 = vpop.xlane.xlu1 %2355  ;;  %v3066_v33 = vsel %vm2901_vm13, %v3065_v29, %v3061_v57  ;;  %v3090_v0 = vsel %vm2824_vm2, %v3089_v14, %v3085_v32  ;;  %v2607_v61 = vadd.f32 %v6774_v1, %v2317_v58  ;;  %v2152_v55 = vmul.f32 %v6891_v38, %v2017_v23 }
 0x21e   : > { %v3071_v39 = vsel %vm7981_vm11, %v3070_v8, %v3066_v33  ;;  %v3109_v29 = vrot.slane %v2609_v15, %v6824_v45  ;;  %v2519_v20 = vsel %vm7943_vm0, %v2153_v44, 0.0  ;;  %v2025_v33 = vmax.f32 %v1897_v26, 0.0 }
 0x21f   : > { %2514 = vadd.xlane.f32.xlu0 %v2513_v18  ;;  %v3076_v46 = vsel %vm2915_vm15, %v3075_v60, %v3071_v39  ;;  %v3099_v7 = vrot.slane %v2607_v61, %v6853_v6  ;;  %v2516_v21 = vsel %vm7943_vm0, %v2152_v55, 0.0  ;;  %v2159_v60 = vmul.f32 %v6891_v38, %v2024_v50 }
 0x220   : > { %v2314_v54 = vpop.xlane.xlu0 %2313  ;;  %v3081_v22 = vsel %vm2922_vm1, %v3080_v52, %v3076_v46  ;;  %vm7984_vm11 = vcmask 720512  }
 0x221   : > { %v7321_v37 = vpop.xlane.xlu1 %2361  ;;  %v2606_v62 = vadd.f32 %v6774_v1, %v2314_v54  ;;  %v7330_v30 = vsel %vm3479_vm14, %v3081_v22, %v7226_v4  ;;  %v2537_v46 = vsel %vm7943_vm0, %v2159_v60, 0.0  ;;  %v2160_v54 = vmul.f32 %v6891_v38, %v2025_v33 }
 0x223   : > { %v3094_v42 = vrot.slane %v2606_v62, %v6834_v35  ;;  %2511 = vadd.xlane.f32.xlu0 %v2510_v56  ;;  %v2540_v3 = vsel %vm7943_vm0, %v2160_v54, 0.0  ;;  %vm7944_vm0 = vcmask 1043459  }
 0x224   : > { %v2329_v19 = vpop.xlane.xlu0 %2328 }
 0x225   : > { %v7338_v53 = vpop.xlane.xlu1 %2370  ;;  %v3095_v4 = vsel %vm2831_vm3, %v3094_v42, %v3090_v0  ;;  %v2611_v24 = vadd.f32 %v6774_v1, %v2329_v19 }
 0x226   : > { %v3100_v32 = vsel %vm2838_vm4, %v3099_v7, %v3095_v4 }
 0x227   : > { %2520 = vadd.xlane.f32.xlu0 %v2519_v20  ;;  %v3105_v14 = vsel %vm2845_vm5, %v3104_v11, %v3100_v32  ;;  %v3119_v34 = vrot.slane %v2611_v24, %v6912_v2 }
 0x228   : > { %v3110_v8 = vsel %vm2852_vm6, %v3109_v29, %v3105_v14  ;;  %v2326_v57 = vpop.xlane.xlu0 %2325 }
 0x229   : > { %v7351_v58 = vpop.xlane.xlu1 %2373  ;;  %v2610_v5 = vadd.f32 %v6774_v1, %v2326_v57 }
 0x22b   : > { %v3114_v0 = vrot.slane %v2610_v5, %v6879_v16  ;;  %2517 = vadd.xlane.f32.xlu0 %v2516_v21 }
 0x22c   : > { %v2335_v52 = vpop.xlane.xlu0 %2334 }
 0x22d   : > { %v3115_v39 = vsel %vm2859_vm7, %v3114_v0, %v3110_v8  ;;  %v7359_v18 = vpop.xlane.xlu1 %2382  ;;  %v2613_v22 = vadd.f32 %v6774_v1, %v2335_v52  ;;  %v2619_v8 = vadd.f32 %v6774_v1, %v7291_v51  ;;  %v2622_v51 = vadd.f32 %v6774_v1, %v7321_v37 }
 0x22e   : > { %v3120_v61 = vsel %vm2866_vm8, %v3119_v34, %v3115_v39  ;;  %v2620_v34 = vadd.f32 %v6774_v1, %v7309_v49 }
 0x22f   : > { %2538 = vadd.xlane.f32.xlu0 %v2537_v46  ;;  %v3129_v23 = vrot.slane %v2613_v22, %v6953_v41  ;;  %v3159_v39 = vrot.slane %v2619_v8, %v6960_v47 }
 0x230   : > { %v2332_v10 = vpop.xlane.xlu0 %2331 }
 0x231   : > { %v2612_v62 = vadd.f32 %v6774_v1, %v2332_v10  ;;  %v2380_v44 = vpop.xlane.xlu1 %2379  ;;  %v3164_v10 = vrot.slane %v2620_v34, %v6815_v12 }
 0x233   : > { %v3124_v25 = vrot.slane %v2612_v62, %v6848_v13  ;;  %2541 = vadd.xlane.f32.xlu0 %v2540_v3 }
 0x234   : > { %v2341_v15 = vpop.xlane.xlu0 %2340 }
 0x235   : > { %v3125_v56 = vsel %vm2873_vm9, %v3124_v25, %v3120_v61  ;;  %v2615_v38 = vadd.f32 %v6774_v1, %v2341_v15  ;;  %v2389_v11 = vpop.xlane.xlu1 %2388  ;;  %v3173_v25 = vrot.slane %v2622_v51, %v6834_v35 }
 0x236   : > { %v3130_v42 = vsel %vm2880_vm10, %v3129_v23, %v3125_v56 }
 0x237   : > { %v3139_v50 = vrot.slane %v2615_v38, %v6871_v59  ;;  %v2625_v38 = vadd.f32 %v6774_v1, %v7338_v53  ;;  %v2629_v53 = vadd.f32 %v6774_v1, %v7359_v18 }
 0x238   : > { %v2338_v7 = vpop.xlane.xlu0 %2337 }
 0x239   : > { %v2614_v19 = vadd.f32 %v6774_v1, %v2338_v7  ;;  %v2386_v29 = vpop.xlane.xlu1 %2385  ;;  %v3208_v34 = vrot.slane %v2629_v53, %v6953_v41 }
 0x23b   : > { %v3134_v4 = vrot.slane %v2614_v19, %v6985_v40 }
 0x23c   : > { %v2347_v27 = vpop.xlane.xlu0 %2346 }
 0x23d   : > { %v3135_v26 = vsel %vm7984_vm11, %v3134_v4, %v3130_v42  ;;  %v2617_v32 = vadd.f32 %v6774_v1, %v2347_v27  ;;  %v2395_v60 = vpop.xlane.xlu1 %2394  ;;  %vm7985_vm11 = vcmask 917312  }
 0x23e   : > { %v3140_v55 = vsel %vm2894_vm12, %v3139_v50, %v3135_v26  ;;  %v3188_v26 = vrot.slane %v2625_v38, %v6824_v45 }
 0x23f   : > { %v3149_v57 = vrot.slane %v2617_v32, %v6929_v36 }
 0x240   : > { %v2344_v20 = vpop.xlane.xlu0 %2343 }
 0x241   : > { %v2616_v14 = vadd.f32 %v6774_v1, %v2344_v20  ;;  %v2392_v62 = vpop.xlane.xlu1 %2391 }
 0x243   : > { %v3144_v24 = vrot.slane %v2616_v14, %v6882_v28 }
 0x244   : > { %v2350_v5 = vpop.xlane.xlu0 %2349 }
 0x245   : > { %v3145_v21 = vsel %vm2901_vm13, %v3144_v24, %v3140_v55  ;;  %v2618_v33 = vadd.f32 %v6774_v1, %v2350_v5  ;;  %v2407_v19 = vpop.xlane.xlu1 %2406  ;;  %v2628_v55 = vadd.f32 %v6774_v1, %v2380_v44  ;;  %v2630_v24 = vadd.f32 %v6774_v1, %v2386_v29 }
 0x246   : > { %v3150_v0 = vsel %vm7985_vm11, %v3149_v57, %v3145_v21  ;;  %v2631_v57 = vadd.f32 %v6774_v1, %v2389_v11  ;;  %vm7986_vm11 = vcmask 720512  }
 0x247   : > { %v3154_v52 = vrot.slane %v2618_v33, %v7000_v31  ;;  %v3203_v33 = vrot.slane %v2628_v55, %v6848_v13 }
 0x248   : > { %v2359_v46 = vpop.xlane.xlu0 %2358  ;;  %v3218_v51 = vrot.slane %v2631_v57, %v6871_v59 }
 0x249   : > { %v3155_v61 = vsel %vm2915_vm15, %v3154_v52, %v3150_v0  ;;  %v2621_v54 = vadd.f32 %v6774_v1, %v2359_v46  ;;  %v2413_v5 = vpop.xlane.xlu1 %2412  ;;  %v2632_v0 = vadd.f32 %v6774_v1, %v2392_v62  ;;  %v2633_v52 = vadd.f32 %v6774_v1, %v2395_v60 }
 0x24a   : > { %v3160_v22 = vsel %vm2922_vm1, %v3159_v39, %v3155_v61  ;;  %v3213_v39 = vrot.slane %v2630_v24, %v6985_v40 }
 0x24b   : > { %v3482_v49 = vsel %vm7944_vm0, %v3160_v22, %v7330_v30  ;;  %v3168_v3 = vrot.slane %v2621_v54, %v6821_v63  ;;  %v2626_v30 = vadd.f32 %v6774_v1, %v7351_v58  ;;  %v3223_v61 = vrot.slane %v2632_v0, %v6882_v28 }
 0x24c   : > { %v2365_v23 = vpop.xlane.xlu0 %2364  ;;  %v3228_v62 = vrot.slane %v2633_v52, %v6929_v36  ;;  %vm7987_vm0 = vcmask 917312  }
 0x24d   : > { %v3169_v37 = vsel %vm2824_vm2, %v3168_v3, %v3164_v10  ;;  %v2623_v15 = vadd.f32 %v6774_v1, %v2365_v23  ;;  %v3193_v20 = vrot.slane %v2626_v30, %v6879_v16  ;;  %v2410_v60 = vpop.xlane.xlu1 %2409 }
 0x24e   : > { %v3174_v56 = vsel %vm2831_vm3, %v3173_v25, %v3169_v37 }
 0x24f   : > { %v3178_v42 = vrot.slane %v2623_v15, %v6853_v6 }
 0x250   : > { %v2368_v7 = vpop.xlane.xlu0 %2367 }
 0x251   : > { %v3179_v4 = vsel %vm2838_vm4, %v3178_v42, %v3174_v56  ;;  %v2624_v50 = vadd.f32 %v6774_v1, %v2368_v7  ;;  %v2637_v56 = vadd.f32 %v6774_v1, %v2407_v19 }
 0x253   : > { %v3183_v27 = vrot.slane %v2624_v50, %v6818_v17  ;;  %v2638_v50 = vadd.f32 %v6774_v1, %v2410_v60  ;;  %v3247_v19 = vrot.slane %v2637_v56, %v6821_v63 }
 0x254   : > { %v2377_v32 = vpop.xlane.xlu0 %2376 }
 0x255   : > { %v3184_v14 = vsel %vm2845_vm5, %v3183_v27, %v3179_v4  ;;  %v2627_v58 = vadd.f32 %v6774_v1, %v2377_v32  ;;  %v2443_v27 = vpop.xlane.xlu1 %2442 }
 0x256   : > { %v3189_v8 = vsel %vm2852_vm6, %v3188_v26, %v3184_v14  ;;  %v3252_v14 = vrot.slane %v2638_v50, %v6834_v35 }
 0x257   : > { %v3194_v21 = vsel %vm2859_vm7, %v3193_v20, %v3189_v8  ;;  %v3198_v44 = vrot.slane %v2627_v58, %v6912_v2  ;;  %v2639_v20 = vadd.f32 %v6774_v1, %v2413_v5 }
 0x258   : > { %v2401_v18 = vpop.xlane.xlu0 %2400 }
 0x259   : > { %v3199_v29 = vsel %vm2866_vm8, %v3198_v44, %v3194_v21  ;;  %v2635_v22 = vadd.f32 %v6774_v1, %v2401_v18  ;;  %v2446_v8 = vpop.xlane.xlu1 %2445 }
 0x25a   : > { %v3204_v11 = vsel %vm2873_vm9, %v3203_v33, %v3199_v29 }
 0x25b   : > { %v3209_v46 = vsel %vm2880_vm10, %v3208_v34, %v3204_v11  ;;  %v3238_v42 = vrot.slane %v2635_v22, %v6960_v47 }
 0x25c   : > { %v3214_v54 = vsel %vm7986_vm11, %v3213_v39, %v3209_v46  ;;  %v2398_v10 = vpop.xlane.xlu0 %2397  ;;  %vm7945_vm11 = vcmask 1044484  }
 0x25d   : > { %v3219_v3 = vsel %vm2894_vm12, %v3218_v51, %v3214_v54  ;;  %v2634_v25 = vadd.f32 %v6774_v1, %v2398_v10  ;;  %v2455_v52 = vpop.xlane.xlu1 %2454 }
 0x25e   : > { %v3224_v23 = vsel %vm2901_vm13, %v3223_v61, %v3219_v3 }
 0x25f   : > { %v3229_v37 = vsel %vm7987_vm0, %v3228_v62, %v3224_v23  ;;  %v3233_v15 = vrot.slane %v2634_v25, %v7000_v31  ;;  %vm7988_vm0 = vcmask 720512  }
 0x260   : > { %v2404_v38 = vpop.xlane.xlu0 %2403 }
 0x261   : > { %v3234_v7 = vsel %vm2915_vm15, %v3233_v15, %v3229_v37  ;;  %v2636_v30 = vadd.f32 %v6774_v1, %v2404_v38  ;;  %v2461_v54 = vpop.xlane.xlu1 %2460 }
 0x262   : > { %v3239_v4 = vsel %vm2922_vm1, %v3238_v42, %v3234_v7 }
 0x263   : > { %v3243_v26 = vrot.slane %v2636_v30, %v6815_v12  ;;  %v7449_v55 = vsel %vm7945_vm11, %v3239_v4, %v3482_v49  ;;  %v3257_v49 = vrot.slane %v2639_v20, %v6853_v6  ;;  %vm3485_vm11 = vcmask 1045509  }
 0x264   : > { %v2419_v32 = vpop.xlane.xlu0 %2418 }
 0x265   : > { %v3248_v53 = vsel %vm2824_vm2, %v3247_v19, %v3243_v26  ;;  %v2641_v58 = vadd.f32 %v6774_v1, %v2419_v32  ;;  %v2467_v25 = vpop.xlane.xlu1 %2466 }
 0x266   : > { %v3253_v57 = vsel %vm2831_vm3, %v3252_v14, %v3248_v53 }
 0x267   : > { %v3267_v33 = vrot.slane %v2641_v58, %v6824_v45  ;;  %v3258_v5 = vsel %vm2838_vm4, %v3257_v49, %v3253_v57 }
 0x268   : > { %v2416_v24 = vpop.xlane.xlu0 %2415 }
 0x269   : > { %v2640_v21 = vadd.f32 %v6774_v1, %v2416_v24  ;;  %v2473_v7 = vpop.xlane.xlu1 %2472 }
 0x26b   : > { %v3262_v44 = vrot.slane %v2640_v21, %v6818_v17 }
 0x26c   : > { %v2425_v0 = vpop.xlane.xlu0 %2424 }
 0x26d   : > { %v3263_v18 = vsel %vm2845_vm5, %v3262_v44, %v3258_v5  ;;  %v2643_v29 = vadd.f32 %v6774_v1, %v2425_v0  ;;  %v2470_v4 = vpop.xlane.xlu1 %2469 }
 0x26e   : > { %v3268_v34 = vsel %vm2852_vm6, %v3267_v33, %v3263_v18  ;;  %v2653_v33 = vadd.f32 %v6774_v1, %v2455_v52  ;;  %v2655_v52 = vadd.f32 %v6774_v1, %v2461_v54  ;;  %v2657_v54 = vadd.f32 %v6774_v1, %v2467_v25 }
 0x26f   : > { %v3277_v46 = vrot.slane %v2643_v29, %v6912_v2 }
 0x270   : > { %v2422_v39 = vpop.xlane.xlu0 %2421  ;;  %v3346_v25 = vrot.slane %v2657_v54, %v6824_v45 }
 0x271   : > { %v2642_v11 = vadd.f32 %v6774_v1, %v2422_v39  ;;  %v2479_v19 = vpop.xlane.xlu1 %2478 }
 0x273   : > { %v3272_v51 = vrot.slane %v2642_v11, %v6879_v16 }
 0x274   : > { %v2431_v61 = vpop.xlane.xlu0 %2430 }
 0x275   : > { %v3273_v22 = vsel %vm2859_vm7, %v3272_v51, %v3268_v34  ;;  %v2645_v62 = vadd.f32 %v6774_v1, %v2431_v61  ;;  %v2476_v53 = vpop.xlane.xlu1 %2475  ;;  %v2649_v34 = vadd.f32 %v6774_v1, %v2443_v27  ;;  %v3326_v61 = vrot.slane %v2653_v33, %v6821_v63 }
 0x276   : > { %v3278_v10 = vsel %vm2866_vm8, %v3277_v46, %v3273_v22 }
 0x277   : > { %v3287_v37 = vrot.slane %v2645_v62, %v6953_v41  ;;  %v3307_v27 = vrot.slane %v2649_v34, %v6929_v36 }
 0x278   : > { %v2428_v60 = vpop.xlane.xlu0 %2427 }
 0x279   : > { %v2644_v3 = vadd.f32 %v6774_v1, %v2428_v60  ;;  %v2485_v5 = vpop.xlane.xlu1 %2484 }
 0x27b   : > { %v3282_v23 = vrot.slane %v2644_v3, %v6848_v13 }
 0x27c   : > { %v2437_v15 = vpop.xlane.xlu0 %2436 }
 0x27d   : > { %v3283_v56 = vsel %vm2873_vm9, %v3282_v23, %v3278_v10  ;;  %v2647_v57 = vadd.f32 %v6774_v1, %v2437_v15  ;;  %v2650_v10 = vadd.f32 %v6774_v1, %v2446_v8  ;;  %v2482_v60 = vpop.xlane.xlu1 %2481 }
 0x27e   : > { %v3288_v42 = vsel %vm2880_vm10, %v3287_v37, %v3283_v56  ;;  %v3336_v56 = vrot.slane %v2655_v52, %v6853_v6 }
 0x27f   : > { %v3297_v29 = vrot.slane %v2647_v57, %v6871_v59 }
 0x280   : > { %v2434_v38 = vpop.xlane.xlu0 %2433 }
 0x281   : > { %v2646_v20 = vadd.f32 %v6774_v1, %v2434_v38  ;;  %v3312_v38 = vrot.slane %v2650_v10, %v7000_v31 }
 0x283   : > { %v3292_v58 = vrot.slane %v2646_v20, %v6985_v40 }
 0x284   : > { %v2440_v30 = vpop.xlane.xlu0 %2439 }
 0x285   : > { %v2648_v24 = vadd.f32 %v6774_v1, %v2440_v30  ;;  %v3293_v0 = vsel %vm7988_vm0, %v3292_v58, %v3288_v42  ;;  %vm7989_vm0 = vcmask 917312  }
 0x286   : > { %v3298_v22 = vsel %vm2894_vm12, %v3297_v29, %v3293_v0 }
 0x287   : > { %v3302_v18 = vrot.slane %v2648_v24, %v6882_v28  ;;  %v2500_v24 = vpop.xlane.xlu1 %2499 }
 0x288   : > { %v2452_v50 = vpop.xlane.xlu0 %2451 }
 0x289   : > { %v2652_v21 = vadd.f32 %v6774_v1, %v2452_v50  ;;  %v3303_v62 = vsel %vm2901_vm13, %v3302_v18, %v3298_v22  ;;  %v2660_v18 = vadd.f32 %v6774_v1, %v2476_v53  ;;  %v2668_v22 = vadd.f32 %v6774_v1, %v2500_v24 }
 0x28a   : > { %v3308_v42 = vsel %vm7989_vm0, %v3307_v27, %v3303_v62  ;;  %v2662_v53 = vadd.f32 %v6774_v1, %v2482_v60  ;;  %vm7990_vm0 = vcmask 720512  }
 0x28b   : > { %v3322_v39 = vrot.slane %v2652_v21, %v6815_v12  ;;  %v3313_v20 = vsel %vm2915_vm15, %v3312_v38, %v3308_v42  ;;  %v3361_v52 = vrot.slane %v2660_v18, %v6848_v13 }
 0x28c   : > { %v2458_v26 = vpop.xlane.xlu0 %2457  ;;  %v3371_v54 = vrot.slane %v2662_v53, %v6985_v40 }
 0x28d   : > { %v2654_v49 = vadd.f32 %v6774_v1, %v2458_v26  ;;  %v3327_v3 = vsel %vm2824_vm2, %v3326_v61, %v3322_v39  ;;  %v2658_v26 = vadd.f32 %v6774_v1, %v2470_v4  ;;  %v2536_v39 = vpop.xlane.xlu1 %2535 }
 0x28f   : > { %v3331_v11 = vrot.slane %v2654_v49, %v6834_v35  ;;  %v2659_v49 = vadd.f32 %v6774_v1, %v2473_v7  ;;  %v3351_v4 = vrot.slane %v2658_v26, %v6879_v16 }
 0x290   : > { %v2464_v32 = vpop.xlane.xlu0 %2463 }
 0x291   : > { %v2656_v51 = vadd.f32 %v6774_v1, %v2464_v32  ;;  %v3332_v23 = vsel %vm2831_vm3, %v3331_v11, %v3327_v3  ;;  %v3356_v29 = vrot.slane %v2659_v49, %v6912_v2  ;;  %v2494_v3 = vpop.xlane.xlu1 %2493  ;;  %v2677_v49 = vadd.f32 %v6774_v1, %v7052_v48 }
 0x292   : > { %v3337_v30 = vsel %vm2838_vm4, %v3336_v56, %v3332_v23  ;;  %v2663_v56 = vadd.f32 %v6774_v1, %v2485_v5 }
 0x293   : > { %v3341_v37 = vrot.slane %v2656_v51, %v6818_v17 }
 0x294   : > { %v7477_v14 = vpop.xlane.xlu0 %2490 }
 0x295   : > { %v3342_v32 = vsel %vm2845_vm5, %v3341_v37, %v3337_v30  ;;  %v3401_v37 = vrot.slane %v2668_v22, %v6815_v12  ;;  %v2497_v26 = vpop.xlane.xlu1 %2496 }
 0x296   : > { %v3347_v33 = vsel %vm2852_vm6, %v3346_v25, %v3342_v32  ;;  %v2676_v32 = vadd.f32 %v6774_v1, %v7030_v9  ;;  %v2667_v22 = vadd.f32 %v6774_v1, %v2497_v26  ;;  %v7996_v26 = vld [vmem:[#allocation35_spill] sm:$0xff] }
 0x297   : > { %v3352_v34 = vsel %vm2859_vm7, %v3351_v4, %v3347_v33  ;;  %v7991_v33 = vld [vmem:[#allocation38_spill] sm:$0xff] }
 0x298   : > { %v7484_v44 = vpop.xlane.xlu0 %2487  ;;  %v3357_v61 = vsel %vm2866_vm8, %v3356_v29, %v3352_v34  ;;  %v2679_v4 = vadd.f32 %v6774_v1, %v7991_v33  ;;  %v3440_v48 = vrot.slane %v2676_v32, %v6848_v13  ;;  %v8003_v33 = vld [vmem:[#allocation12_spill] sm:$0xff] }
 0x299   : > { %v3362_v10 = vsel %vm2873_vm9, %v3361_v52, %v3357_v61 }
 0x29c   : > { %v2503_v46 = vpop.xlane.xlu0 %2502 }
 0x29d   : > { %v2669_v11 = vadd.f32 %v6774_v1, %v2503_v46 }
 0x29f   : > { %v3405_v62 = vrot.slane %v2669_v11, %v6821_v63  ;;  %v2664_v63 = vadd.f32 %v6774_v1, %v7484_v44 }
 0x2a0   : > { %v2449_v15 = vpop.xlane.xlu0 %2448 }
 0x2a1   : > { %v2651_v8 = vadd.f32 %v6774_v1, %v2449_v15  ;;  %v3406_v42 = vsel %vm2824_vm2, %v3405_v62, %v3401_v37  ;;  %v3381_v44 = vrot.slane %v2664_v63, %v6882_v28  ;;  %vm7992_vm2 = vcmask 917312  }
 0x2a3   : > { %v3317_v50 = vrot.slane %v2651_v8, %v6960_v47 }
 0x2a4   : > { %v2509_v58 = vpop.xlane.xlu0 %2508 }
 0x2a5   : > { %v3318_v57 = vsel %vm2922_vm1, %v3317_v50, %v3313_v20  ;;  %v2671_v15 = vadd.f32 %v6774_v1, %v2509_v58  ;;  %v3376_v50 = vrot.slane %v2663_v56, %v6871_v59 }
 0x2a6   : > { %v7517_v21 = vsel %vm3485_vm11, %v3318_v57, %v7449_v55  ;;  %v2661_v55 = vadd.f32 %v6774_v1, %v2479_v19 }
 0x2a7   : > { %v3415_v30 = vrot.slane %v2671_v15, %v6853_v6 }
 0x2a8   : > { %v2506_v0 = vpop.xlane.xlu0 %2505  ;;  %v3366_v46 = vrot.slane %v2661_v55, %v6953_v41  ;;  %v2545_v55 = vpop.xlane.xlu1 %2544 }
 0x2a9   : > { %v2670_v7 = vadd.f32 %v6774_v1, %v2506_v0  ;;  %v2678_v0 = vadd.f32 %v6774_v1, %v7076_v43  ;;  %v2683_v62 = vadd.f32 %v6774_v1, %v2545_v55 }
 0x2aa   : > { %v3367_v60 = vsel %vm2880_vm10, %v3366_v46, %v3362_v10 }
 0x2ab   : > { %v3410_v19 = vrot.slane %v2670_v7, %v6834_v35  ;;  %v3372_v12 = vsel %vm7990_vm0, %v3371_v54, %v3367_v60  ;;  %v3475_v60 = vrot.slane %v2683_v62, %v6960_v47  ;;  %v7995_v54 = vld [vmem:[#allocation36_spill] sm:$0xff]  ;;  %v8024_v62 = vld [vmem:[#allocation26_spill] sm:$0xff] }
 0x2ac   : > { %v2515_v51 = vpop.xlane.xlu0 %2514  ;;  %v3377_v6 = vsel %vm2894_vm12, %v3376_v50, %v3372_v12 }
 0x2ad   : > { %v3411_v35 = vsel %vm2831_vm3, %v3410_v19, %v3406_v42  ;;  %v2673_v5 = vadd.f32 %v6774_v1, %v2515_v51  ;;  %v3382_v34 = vsel %vm2901_vm13, %v3381_v44, %v3377_v6  ;;  %vm7993_vm3 = vmmov %vm7990_vm0 }
 0x2ae   : > { %v3416_v20 = vsel %vm2838_vm4, %v3415_v30, %v3411_v35  ;;  %vm3487_vm4 = vcmask 1046534  }
 0x2af   : > { %v3425_v9 = vrot.slane %v2673_v5, %v6824_v45  ;;  %v2680_v45 = vadd.f32 %v6774_v1, %v2536_v39  ;;  %v3455_v39 = vrot.slane %v2679_v4, %v6871_v59  ;;  %v3396_v59 = vrot.slane %v2667_v22, %v6960_v47  ;;  %v8004_v4 = vld [vmem:[#allocation11_spill] sm:$0xff] }
 0x2b0   : > { %v2512_v27 = vpop.xlane.xlu0 %2511 }
 0x2b1   : > { %v2672_v23 = vadd.f32 %v6774_v1, %v2512_v27  ;;  %v3460_v46 = vrot.slane %v2680_v45, %v6882_v28  ;;  %v8013_v45 = vld [vmem:[#allocation17_spill] sm:$0xff] }
 0x2b3   : > { %v3420_v38 = vrot.slane %v2672_v23, %v6818_v17  ;;  %v2665_v17 = vadd.f32 %v6774_v1, %v7477_v14  ;;  %v2666_v14 = vadd.f32 %v6774_v1, %v2494_v3 }
 0x2b4   : > { %v2521_v8 = vpop.xlane.xlu0 %2520 }
 0x2b5   : > { %v2675_v58 = vadd.f32 %v6774_v1, %v2521_v8  ;;  %v3421_v24 = vsel %vm2845_vm5, %v3420_v38, %v3416_v20  ;;  %v3386_v61 = vrot.slane %v2665_v17, %v6929_v36  ;;  %v3391_v10 = vrot.slane %v2666_v14, %v7000_v31  ;;  %vm7994_vm5 = vmmov %vm7992_vm2  ;;  %v7998_v17 = vld [vmem:[#allocation9_spill] sm:$0xff] }
 0x2b6   : > { %v3426_v11 = vsel %vm2852_vm6, %v3425_v9, %v3421_v24  ;;  %vm3489_vm6 = vcmask 1047559   ;;  %v8000_v24 = vmov 0.0   ;;  %v8007_v14 = vld [vmem:[#allocation13_spill] sm:$0xff] }
 0x2b7   : > { %v3435_v29 = vrot.slane %v2675_v58, %v6912_v2  ;;  %v3450_v2 = vrot.slane %v2678_v0, %v6985_v40  ;;  %v3387_v53 = vsel %vm7992_vm2, %v3386_v61, %v3382_v34  ;;  %v8005_v0 = vpack.c.bf16 %v8003_v33, %v8004_v4  ;;  %v8015_v61 = vld [vmem:[#allocation20_spill] sm:$0xff] }
 0x2b8   : > { %v2518_v25 = vpop.xlane.xlu0 %2517  ;;  %v3392_v37 = vsel %vm2915_vm15, %v3391_v10, %v3387_v53  ;;  %v8021_v53 = vld [vmem:[#allocation24_spill] sm:$0xff] }
 0x2b9   : > { %v2674_v57 = vadd.f32 %v6774_v1, %v2518_v25  ;;  %v7997_v25 = vld [vmem:[#allocation10_spill] sm:$0xff]  ;;  %v5476_v4 = vld [vmem:[%s5758_s25 + $0x1c0] sm:$0xff] }
 0x2ba   : > { %v7999_v6 = vpack.c.bf16 %v7997_v25, %v7998_v17  ;;  %v5472_v25 = vld [vmem:[%s5758_s25 + $0x1a0] sm:$0xff]  ;;  %v5473_v17 = vld [vmem:[%s5758_s25 + $0x1a8] sm:$0xff] }
 0x2bb   : > { %v3430_v18 = vrot.slane %v2674_v57, %v6879_v16  ;;  %v3445_v16 = vrot.slane %v2677_v49, %v6953_v41  ;;  %v8002_v57 = vmov 0.0|0.0  }
 0x2bc   : > { %v2539_v51 = vpop.xlane.xlu0 %2538 }
 0x2bd   : > { %v3431_v43 = vsel %vm2859_vm7, %v3430_v18, %v3426_v11  ;;  %v2681_v52 = vadd.f32 %v6774_v1, %v2539_v51  ;;  %vm2686_vm7 = vcmp.lt.s32.totalorder %v7995_v54, 8  ;;  %v8006_v18 = vld [vmem:[#allocation14_spill] sm:$0xff]  ;;  %v8010_v11 = vld [vmem:[#allocation15_spill] sm:$0xff] }
 0x2be   : > { %v3436_v7 = vsel %vm2866_vm8, %v3435_v29, %v3431_v43  ;;  %v8008_v34 = vpack.c.bf16 %v8006_v18, %v8007_v14  ;;  %v8009_v29 = vld [vmem:[#allocation16_spill] sm:$0xff]  ;;  %v8016_v43 = vld [vmem:[#allocation19_spill] sm:$0xff]  ;;  %vm8036_vm8 = vcmask 1041409  }
 0x2bf   : > { %v3441_v13 = vsel %vm2873_vm9, %v3440_v48, %v3436_v7  ;;  %v3465_v23 = vrot.slane %v2681_v52, %v6929_v36  ;;  %v3397_v36 = vsel %vm2922_vm1, %v3396_v59, %v3392_v37  ;;  %v8011_v51 = vpack.c.bf16 %v8009_v29, %v8010_v11  ;;  %v8012_v48 = vld [vmem:[#allocation18_spill] sm:$0xff]  ;;  %v8019_v52 = vld [vmem:[#allocation21_spill] sm:$0xff] }
 0x2c0   : > { %v3446_v41 = vsel %vm2880_vm10, %v3445_v16, %v3441_v13  ;;  %v2542_v27 = vpop.xlane.xlu0 %2541  ;;  %v3488_v42 = vsel %vm3487_vm4, %v3397_v36, %v7517_v21  ;;  %v8014_v55 = vpack.c.bf16 %v8012_v48, %v8013_v45  ;;  %v8017_v16 = vpack.c.bf16 %v8015_v61, %v8016_v43  ;;  %v8018_v7 = vld [vmem:[#allocation22_spill] sm:$0xff]  ;;  %v8022_v13 = vld [vmem:[#allocation23_spill] sm:$0xff]  ;;  %v5460_v59 = vld [vmem:[%s5758_s25 + $0x140] sm:$0xff] }
 0x2c1   : > { %v3451_v3 = vsel %vm7993_vm3, %v3450_v2, %v3446_v41  ;;  %v2682_v40 = vadd.f32 %v6774_v1, %v2542_v27  ;;  %v8020_v2 = vpack.c.bf16 %v8018_v7, %v8019_v52  ;;  %v8025_v41 = vld [vmem:[#allocation25_spill] sm:$0xff]  ;;  %v5462_v54 = vld [vmem:[%s5758_s25 + $0x150] sm:$0xff]  ;;  %v5463_v36 = vld [vmem:[%s5758_s25 + $0x158] sm:$0xff] }
 0x2c2   : > { %v3456_v19 = vsel %vm2894_vm12, %v3455_v39, %v3451_v3  ;;  %v8023_v39 = vpack.c.bf16 %v8021_v53, %v8022_v13  ;;  %v8026_v27 = vpack.c.bf16 %v8024_v62, %v8025_v41  ;;  %v8028_v3 = vld [vmem:[#allocation27_spill] sm:$0xff]  ;;  %v5480_v11 = vld [vmem:[%s5758_s25 + $0x1e0] sm:$0xff] }
 0x2c3   : > { %v3461_v15 = vsel %vm2901_vm13, %v3460_v46, %v3456_v19  ;;  %v3470_v56 = vrot.slane %v2682_v40, %v7000_v31  ;;  %v8027_v46 = vld [vmem:[#allocation28_spill] sm:$0xff]  ;;  %v8030_v19 = vld [vmem:[#allocation30_spill] sm:$0xff] }
 0x2c4   : > { %v3466_v28 = vsel %vm7994_vm5, %v3465_v23, %v3461_v15  ;;  %v8029_v40 = vpack.c.bf16 %v8027_v46, %v8028_v3  ;;  %v8031_v23 = vld [vmem:[#allocation29_spill] sm:$0xff]  ;;  %v5478_v14 = vld [vmem:[%s5758_s25 + $0x1d0] sm:$0xff]  ;;  %v5491_v41 = vld [vmem:[%s5758_s25 + $0x238] sm:$0xff] }
 0x2c5   : > { %v3471_v1 = vsel %vm2915_vm15, %v3470_v56, %v3466_v28  ;;  %v8032_v37 = vpack.c.bf16 %v8030_v19, %v8031_v23  ;;  %v5461_v15 = vld [vmem:[%s5758_s25 + $0x148] sm:$0xff]  ;;  %v8034_v28 = vld [vmem:[#allocation31_spill] sm:$0xff]  ;;  %v5484_v43 = vld [vmem:[%s5758_s25 + $0x200] sm:$0xff] }
 0x2c6   : > { %v3476_v63 = vsel %vm2922_vm1, %v3475_v60, %v3471_v1  ;;  %vm8001_vm1 = vmmov 0   ;;  %v5269_v56 = vpack.c.bf16 %v5461_v15, %v5460_v59  ;;  %v8033_v60 = vld [vmem:[#allocation32_spill] sm:$0xff]  ;;  %v5482_v45 = vld [vmem:[%s5758_s25 + $0x1f0] sm:$0xff]  ;;  %v5493_v3 = vld [vmem:[%s5758_s25 + $0x248] sm:$0xff] }
 0x2c7   : > { %v3490_v31 = vsel %vm3489_vm6, %v3476_v63, %v3488_v42  ;;  %v8035_v1 = vpack.c.bf16 %v8033_v60, %v8034_v28  ;;  %v5272_v63 = vpack.c.bf16 %v5463_v36, %v5462_v54  ;;  %v5464_v42 = vld [vmem:[%s5758_s25 + $0x160] sm:$0xff]  ;;  %v5494_v19 = vld [vmem:[%s5758_s25 + $0x250] sm:$0xff]  ;;  %v5495_v23 = vld [vmem:[%s5758_s25 + $0x258] sm:$0xff] }
 0x2c8   : > { %v3492_v8 = vsel %vm2686_vm7, %v3490_v31, -1e+30  ;;  %v5465_v31 = vld [vmem:[%s5758_s25 + $0x168] sm:$0xff]  ;;  %v5488_v13 = vld [vmem:[%s5758_s25 + $0x220] sm:$0xff]  ;;  %v5498_v60 = vld [vmem:[%s5758_s25 + $0x270] sm:$0xff] }
 0x2c9   : > { %3493 = vmax.xlane.f32.xlu0 %v3492_v8  ;;  %v5492_v46 = vld [vmem:[%s5758_s25 + $0x240] sm:$0xff]  ;;  %v5497_v15 = vld [vmem:[%s5758_s25 + $0x268] sm:$0xff]  ;;  %v5499_v28 = vld [vmem:[%s5758_s25 + $0x278] sm:$0xff] }
 0x2ca   : > { %v5496_v59 = vld [vmem:[%s5758_s25 + $0x260] sm:$0xff]  ;;  %v5501_v36 = vld [vmem:[%s5758_s25 + $0x288] sm:$0xff] }
 0x2cb   : > { %v5500_v54 = vld [vmem:[%s5758_s25 + $0x280] sm:$0xff] }
 0x356   : > { %v3494_v47 = vpop.xlane.xlu0 %3493 }
 0x357   : > { %v3495_v35 = vsub.f32 %v3492_v8, %v3494_v47  ;;  %v5275_v8 = vpack.c.bf16 %v5465_v31, %v5464_v42  ;;  %v5466_v47 = vld [vmem:[%s5758_s25 + $0x170] sm:$0xff] }
 0x358   : > { %v5502_v31 = vld [vmem:[%s5758_s25 + $0x290] sm:$0xff] }
 0x359   : > { %v3496_v38 = vmul.f32 1.442695, %v3495_v35  ;;  %v5467_v35 = vld [vmem:[%s5758_s25 + $0x178] sm:$0xff] }
 0x35b   : > { %5455 = vpow2.f32 %v3496_v38  ;;  %v5278_v38 = vpack.c.bf16 %v5467_v35, %v5466_v47  ;;  %v5504_v35 = vld [vmem:[%s5758_s25 + $0x2a0] sm:$0xff] }
 0x365   : > { %v5456_v12 = vpop.eup %5455 }
 0x366   : > { %3498 = vadd.xlane.f32.xlu1 %v5456_v12 }
 0x3f3   : > { %v3499_v30 = vpop.xlane.xlu1 %3498 }
 0x3f4   : > { %5457 = vrcp.f32 %v3499_v30  ;;  %v5469_v30 = vld [vmem:[%s5758_s25 + $0x188] sm:$0xff] }
 0x3fe   : > { %v5458_v5 = vpop.eup %5457 }
 0x3ff   : > { %v3501_v50 = vmul.f32 %v5458_v5, %v5456_v12  ;;  %v5468_v12 = vld [vmem:[%s5758_s25 + $0x180] sm:$0xff] }
 0x400   : > { %v5281_v5 = vpack.c.bf16 %v5469_v30, %v5468_v12  ;;  %v5507_v12 = vld [vmem:[%s5758_s25 + $0x2b8] sm:$0xff] }
 0x401   : > { %v3503_v21 = vcombine.high %v3501_v50, %v3501_v50  ;;  %v3510_v32 = vrot.slane %v3501_v50, %v7996_v26  ;;  %4144 = vst [vmem:[%s7613_s17] sm:$0xff] %v3501_v50 }
 0x403   : > { %v7617_v44 = vrot.slane %v3503_v21, %v7996_v26  ;;  %v3526_v20 = vrot.slane %v3510_v32, %v7996_v26  ;;  %v3518_v22 = vcombine.high %v3510_v32, %v3510_v32  ;;  %v5470_v21 = vld [vmem:[%s5758_s25 + $0x190] sm:$0xff]  ;;  %v5471_v32 = vld [vmem:[%s5758_s25 + $0x198] sm:$0xff] }
 0x405   : > { %4947 = vmatmul.mubr.f32.vlgmr.msra.gmra.mrb[10].mxu1 %v3526_v20  ;;  %v3519_v58 = vcombine.high %v7617_v44, %v7617_v44  ;;  %v7661_v10 = vrot.slane %v3518_v22, %v7996_v26  ;;  %v3548_v50 = vcombine.high %v3526_v20, %v3526_v20  ;;  %v5474_v20 = vld [vmem:[%s5758_s25 + $0x1b0] sm:$0xff]  ;;  %v5487_v22 = vld [vmem:[%s5758_s25 + $0x218] sm:$0xff]  ;;  %v7752_v42 = vrot.slane %v7617_v44, %v7996_v26 }
 0x406   : > { %5234 = vmatpush3.bf16.msra.mxu1 %v7999_v6  ;;  %4981 = vmatprep.mubr.msk.f32.mxu1 %vm8001_vm1, %v8000_v24  ;;  %v5287_v6 = vpack.c.bf16 %v5473_v17, %v5472_v25  ;;  %v5512_v17 = vld [vmem:[%s5758_s25 + $0x2e0] sm:$0xff] }
 0x407   : > { %5235 = vmatprep.subr.bf16.mxu1 %v8002_v57  ;;  %v7629_v49 = vrot.slane %v3519_v58, %v7996_v26  ;;  %v5284_v58 = vpack.c.bf16 %v5471_v32, %v5470_v21  ;;  %v3550_v52 = vcombine.high %v7661_v10, %v7661_v10  ;;  %v5505_v26 = vld [vmem:[%s5758_s25 + $0x2a8] sm:$0xff]  ;;  %v5510_v32 = vld [vmem:[%s5758_s25 + $0x2d0] sm:$0xff] }
 0x408   : > { %v5335_v44 = vpack.c.bf16 %v5505_v26, %v5504_v35 }
 0x409   : > { %v3551_v9 = vcombine.high %v7629_v49, %v7629_v49 }
 0x40a   : > { %5237 = vmatpush3.bf16.msra.mxu1 %v8005_v0  ;;  %v5477_v0 = vld [vmem:[%s5758_s25 + $0x1c8] sm:$0xff] }
 0x40b   : > { %5192 = vmatmul.mubr.f32.vlgmr.msra.gmra.mrb[120].mxu0 %v3551_v9  ;;  %5238 = vmatprep.subr.bf16.mxu1 %v8002_v57  ;;  %v5475_v9 = vld [vmem:[%s5758_s25 + $0x1b8] sm:$0xff]  ;;  %v5293_v18 = vpack.c.bf16 %v5477_v0, %v5476_v4  ;;  %v5516_v0 = vld [vmem:[%s5758_s25 + $0x300] sm:$0xff] }
 0x40c   : > { %v5290_v33 = vpack.c.bf16 %v5475_v9, %v5474_v20  ;;  %v5514_v9 = vld [vmem:[%s5758_s25 + $0x2f0] sm:$0xff] }
 0x40e   : > { %5240 = vmatpush3.bf16.msra.mxu1 %v8008_v34  ;;  %v5479_v34 = vld [vmem:[%s5758_s25 + $0x1d8] sm:$0xff] }
 0x40f   : > { %5241 = vmatprep.subr.bf16.mxu1 %v8002_v57  ;;  %v5296_v29 = vpack.c.bf16 %v5479_v34, %v5478_v14  ;;  %v5518_v34 = vld [vmem:[%s5758_s25 + $0x310] sm:$0xff] }
 0x412   : > { %5243 = vmatpush3.bf16.msra.mxu1 %v8011_v51  ;;  %v5481_v51 = vld [vmem:[%s5758_s25 + $0x1e8] sm:$0xff] }
 0x413   : > { %5244 = vmatprep.subr.bf16.mxu1 %v8002_v57  ;;  %v5299_v48 = vpack.c.bf16 %v5481_v51, %v5480_v11  ;;  %v5520_v51 = vld [vmem:[%s5758_s25 + $0x320] sm:$0xff] }
 0x416   : > { %5246 = vmatpush3.bf16.msra.mxu1 %v8014_v55  ;;  %v5483_v55 = vld [vmem:[%s5758_s25 + $0x1f8] sm:$0xff] }
 0x417   : > { %5247 = vmatprep.subr.bf16.mxu1 %v8002_v57  ;;  %v5302_v61 = vpack.c.bf16 %v5483_v55, %v5482_v45  ;;  %v5523_v55 = vld [vmem:[%s5758_s25 + $0x338] sm:$0xff] }
 0x41a   : > { %5249 = vmatpush3.bf16.msra.mxu1 %v8017_v16  ;;  %v5485_v16 = vld [vmem:[%s5758_s25 + $0x208] sm:$0xff] }
 0x41b   : > { %5250 = vmatprep.subr.bf16.mxu1 %v8002_v57  ;;  %v5305_v7 = vpack.c.bf16 %v5485_v16, %v5484_v43  ;;  %v5525_v43 = vld [vmem:[%s5758_s25 + $0x348] sm:$0xff] }
 0x41e   : > { %5252 = vmatpush3.bf16.msra.mxu1 %v8020_v2  ;;  %v5486_v2 = vld [vmem:[%s5758_s25 + $0x210] sm:$0xff] }
 0x41f   : > { %5253 = vmatprep.subr.bf16.mxu1 %v8002_v57  ;;  %v5308_v53 = vpack.c.bf16 %v5487_v22, %v5486_v2  ;;  %v5528_v22 = vld [vmem:[%s5758_s25 + $0x360] sm:$0xff] }
 0x422   : > { %5255 = vmatpush3.bf16.msra.mxu1 %v8023_v39  ;;  %v5489_v39 = vld [vmem:[%s5758_s25 + $0x228] sm:$0xff] }
 0x423   : > { %5256 = vmatprep.subr.bf16.mxu1 %v8002_v57  ;;  %v5311_v62 = vpack.c.bf16 %v5489_v39, %v5488_v13  ;;  %v5530_v39 = vld [vmem:[%s5758_s25 + $0x370] sm:$0xff] }
 0x425   : > { %4982 = vmatmul.mubr.f32.vlgmr.msra.gmra.mrb[12].mxu1 %v7661_v10  ;;  %v5490_v10 = vld [vmem:[%s5758_s25 + $0x230] sm:$0xff] }
 0x426   : > { %5258 = vmatpush3.bf16.msra.mxu1 %v8026_v27  ;;  %5016 = vmatprep.mubr.msk.f32.mxu1 %vm8001_vm1, %v8000_v24  ;;  %v5314_v27 = vpack.c.bf16 %v5491_v41, %v5490_v10  ;;  %v3549_v41 = vcombine.high %v7752_v42, %v7752_v42 }
 0x427   : > { %5259 = vmatprep.subr.bf16.mxu1 %v8002_v57 }
 0x42a   : > { %5261 = vmatpush3.bf16.msra.mxu1 %v8029_v40  ;;  %v5317_v40 = vpack.c.bf16 %v5493_v3, %v5492_v46 }
 0x42b   : > { %5262 = vmatprep.subr.bf16.mxu1 %v8002_v57 }
 0x42e   : > { %5264 = vmatpush3.bf16.msra.mxu1 %v8032_v37  ;;  %v5320_v37 = vpack.c.bf16 %v5495_v23, %v5494_v19 }
 0x42f   : > { %5265 = vmatprep.subr.bf16.mxu1 %v8002_v57 }
 0x432   : > { %5267 = vmatpush3.bf16.msra.mxu1 %v8035_v1  ;;  %v5326_v1 = vpack.c.bf16 %v5499_v28, %v5498_v60 }
 0x433   : > { %5268 = vmatprep.subr.bf16.mxu1 %v8002_v57 }
 0x436   : > { %5270 = vmatpush3.bf16.msra.mxu1 %v5269_v56  ;;  %v5323_v56 = vpack.c.bf16 %v5497_v15, %v5496_v59 }
 0x437   : > { %5271 = vmatprep.subr.bf16.mxu1 %v8002_v57 }
 0x43a   : > { %5273 = vmatpush3.bf16.msra.mxu1 %v5272_v63  ;;  %v5329_v63 = vpack.c.bf16 %v5501_v36, %v5500_v54 }
 0x43b   : > { %5274 = vmatprep.subr.bf16.mxu1 %v8002_v57 }
 0x43e   : > { %5276 = vmatpush3.bf16.msra.mxu1 %v5275_v8  ;;  %v5503_v8 = vld [vmem:[%s5758_s25 + $0x298] sm:$0xff] }
 0x43f   : > { %5277 = vmatprep.subr.bf16.mxu1 %v8002_v57  ;;  %v5332_v47 = vpack.c.bf16 %v5503_v8, %v5502_v31 }
 0x442   : > { %5279 = vmatpush3.bf16.msra.mxu1 %v5278_v38  ;;  %v5506_v38 = vld [vmem:[%s5758_s25 + $0x2b0] sm:$0xff] }
 0x443   : > { %5280 = vmatprep.subr.bf16.mxu1 %v8002_v57  ;;  %v5338_v30 = vpack.c.bf16 %v5507_v12, %v5506_v38 }
 0x445   : > { %5017 = vmatmul.mubr.f32.vlgmr.msra.gmra.mrb[14].mxu1 %v3548_v50  ;;  %v5509_v50 = vld [vmem:[%s5758_s25 + $0x2c8] sm:$0xff] }
 0x446   : > { %5282 = vmatpush3.bf16.msra.mxu1 %v5281_v5  ;;  %5051 = vmatprep.mubr.msk.f32.mxu1 %vm8001_vm1, %v8000_v24  ;;  %v5508_v5 = vld [vmem:[%s5758_s25 + $0x2c0] sm:$0xff] }
 0x447   : > { %5283 = vmatprep.subr.bf16.mxu1 %v8002_v57  ;;  %v5341_v21 = vpack.c.bf16 %v5509_v50, %v5508_v5 }
 0x44a   : > { %5285 = vmatpush3.bf16.msra.mxu1 %v5284_v58  ;;  %v5511_v58 = vld [vmem:[%s5758_s25 + $0x2d8] sm:$0xff] }
 0x44b   : > { %5286 = vmatprep.subr.bf16.mxu1 %v8002_v57  ;;  %v5344_v25 = vpack.c.bf16 %v5511_v58, %v5510_v32 }
 0x44e   : > { %5288 = vmatpush3.bf16.msra.mxu1 %v5287_v6  ;;  %v5513_v6 = vld [vmem:[%s5758_s25 + $0x2e8] sm:$0xff] }
 0x44f   : > { %5289 = vmatprep.subr.bf16.mxu1 %v8002_v57  ;;  %v5347_v20 = vpack.c.bf16 %v5513_v6, %v5512_v17 }
 0x452   : > { %5291 = vmatpush3.bf16.msra.mxu1 %v5290_v33  ;;  %v5515_v33 = vld [vmem:[%s5758_s25 + $0x2f8] sm:$0xff] }
 0x453   : > { %5292 = vmatprep.subr.bf16.mxu1 %v8002_v57  ;;  %v5350_v4 = vpack.c.bf16 %v5515_v33, %v5514_v9 }
 0x456   : > { %5294 = vmatpush3.bf16.msra.mxu1 %v5293_v18  ;;  %v5517_v18 = vld [vmem:[%s5758_s25 + $0x308] sm:$0xff] }
 0x457   : > { %5295 = vmatprep.subr.bf16.mxu1 %v8002_v57  ;;  %v5353_v14 = vpack.c.bf16 %v5517_v18, %v5516_v0 }
 0x45a   : > { %5297 = vmatpush3.bf16.msra.mxu1 %v5296_v29  ;;  %v5519_v29 = vld [vmem:[%s5758_s25 + $0x318] sm:$0xff] }
 0x45b   : > { %5298 = vmatprep.subr.bf16.mxu1 %v8002_v57  ;;  %v5356_v11 = vpack.c.bf16 %v5519_v29, %v5518_v34 }
 0x45e   : > { %5300 = vmatpush3.bf16.msra.mxu1 %v5299_v48  ;;  %v5521_v48 = vld [vmem:[%s5758_s25 + $0x328] sm:$0xff] }
 0x45f   : > { %5301 = vmatprep.subr.bf16.mxu1 %v8002_v57  ;;  %v5359_v45 = vpack.c.bf16 %v5521_v48, %v5520_v51 }
 0x462   : > { %5303 = vmatpush3.bf16.msra.mxu1 %v5302_v61 }
 0x463   : > { %5304 = vmatprep.subr.bf16.mxu1 %v8002_v57 }
 0x465   : > { %5052 = vmatmul.mubr.f32.vlgmr.msra.gmra.mrb[16].mxu1 %v3550_v52  ;;  %v5527_v52 = vld [vmem:[%s5758_s25 + $0x358] sm:$0xff] }
 0x466   : > { %5306 = vmatpush3.bf16.msra.mxu1 %v5305_v7  ;;  %5086 = vmatprep.mubr.msk.f32.mxu1 %vm8001_vm1, %v8000_v24  ;;  %v5526_v7 = vld [vmem:[%s5758_s25 + $0x350] sm:$0xff] }
 0x467   : > { %5307 = vmatprep.subr.bf16.mxu1 %v8002_v57  ;;  %v5368_v2 = vpack.c.bf16 %v5527_v52, %v5526_v7 }
 0x46a   : > { %5309 = vmatpush3.bf16.msra.mxu1 %v5308_v53  ;;  %v5529_v53 = vld [vmem:[%s5758_s25 + $0x368] sm:$0xff] }
 0x46b   : > { %5310 = vmatprep.subr.bf16.mxu1 %v8002_v57  ;;  %v5371_v13 = vpack.c.bf16 %v5529_v53, %v5528_v22 }
 0x46e   : > { %5312 = vmatpush3.bf16.msra.mxu1 %v5311_v62  ;;  %v5531_v62 = vld [vmem:[%s5758_s25 + $0x378] sm:$0xff] }
 0x46f   : > { %5313 = vmatprep.subr.bf16.mxu1 %v8002_v57  ;;  %v5374_v10 = vpack.c.bf16 %v5531_v62, %v5530_v39 }
 0x472   : > { %5315 = vmatpush3.bf16.msra.mxu1 %v5314_v27 }
 0x473   : > { %5316 = vmatprep.subr.bf16.mxu1 %v8002_v57 }
 0x476   : > { %5318 = vmatpush3.bf16.msra.mxu1 %v5317_v40 }
 0x477   : > { %5319 = vmatprep.subr.bf16.mxu1 %v8002_v57 }
 0x47a   : > { %5321 = vmatpush3.bf16.msra.mxu1 %v5320_v37 }
 0x47b   : > { %5322 = vmatprep.subr.bf16.mxu1 %v8002_v57 }
 0x47e   : > { %5324 = vmatpush3.bf16.msra.mxu1 %v5323_v56 }
 0x47f   : > { %5325 = vmatprep.subr.bf16.mxu1 %v8002_v57 }
 0x482   : > { %5327 = vmatpush3.bf16.msra.mxu1 %v5326_v1 }
 0x483   : > { %5328 = vmatprep.subr.bf16.mxu1 %v8002_v57 }
 0x485   : > { %5087 = vmatmul.mubr.f32.vlgmr.msra.gmra.mrb[18].mxu1 %v7752_v42 }
 0x486   : > { %5330 = vmatpush3.bf16.msra.mxu1 %v5329_v63  ;;  %5121 = vmatprep.mubr.msk.f32.mxu1 %vm8001_vm1, %v8000_v24 }
 0x487   : > { %5331 = vmatprep.subr.bf16.mxu1 %v8002_v57 }
 0x48a   : > { %5333 = vmatpush3.bf16.msra.mxu1 %v5332_v47 }
 0x48b   : > { %5334 = vmatprep.subr.bf16.mxu1 %v8002_v57 }
 0x48e   : > { %5336 = vmatpush3.bf16.msra.mxu1 %v5335_v44 }
 0x48f   : > { %5337 = vmatprep.subr.bf16.mxu1 %v8002_v57 }
 0x492   : > { %5339 = vmatpush3.bf16.msra.mxu1 %v5338_v30 }
 0x493   : > { %5340 = vmatprep.subr.bf16.mxu1 %v8002_v57 }
 0x496   : > { %5342 = vmatpush3.bf16.msra.mxu1 %v5341_v21 }
 0x497   : > { %5343 = vmatprep.subr.bf16.mxu1 %v8002_v57 }
 0x49a   : > { %5345 = vmatpush3.bf16.msra.mxu1 %v5344_v25 }
 0x49b   : > { %5346 = vmatprep.subr.bf16.mxu1 %v8002_v57 }
 0x49e   : > { %5348 = vmatpush3.bf16.msra.mxu1 %v5347_v20 }
 0x49f   : > { %5349 = vmatprep.subr.bf16.mxu1 %v8002_v57 }
 0x4a2   : > { %5351 = vmatpush3.bf16.msra.mxu1 %v5350_v4 }
 0x4a3   : > { %5352 = vmatprep.subr.bf16.mxu1 %v8002_v57 }
 0x4a5   : > { %5122 = vmatmul.mubr.f32.vlgmr.msra.gmra.mrb[20].mxu1 %v7629_v49  ;;  %v5522_v49 = vld [vmem:[%s5758_s25 + $0x330] sm:$0xff] }
 0x4a6   : > { %5354 = vmatpush3.bf16.msra.mxu1 %v5353_v14  ;;  %5156 = vmatprep.mubr.msk.f32.mxu1 %vm8001_vm1, %v8000_v24  ;;  %v5362_v61 = vpack.c.bf16 %v5523_v55, %v5522_v49  ;;  %v5524_v24 = vld [vmem:[%s5758_s25 + $0x340] sm:$0xff]  ;;  %s7946_s25 = sshll.u32 %s5709_s7, 7 }
 0x4a7   : > { %5355 = vmatprep.subr.bf16.mxu1 %v8002_v57  ;;  %v5365_v16 = vpack.c.bf16 %v5525_v43, %v5524_v24  ;;  %s7818_s23 = scalar_lea.hbm %s7905_s9, %s7946_s25 }
 0x4aa   : > { %5357 = vmatpush3.bf16.msra.mxu1 %v5356_v11 }
 0x4ab   : > { %5358 = vmatprep.subr.bf16.mxu1 %v8002_v57 }
 0x4ae   : > { %5360 = vmatpush3.bf16.msra.mxu1 %v5359_v45 }
 0x4af   : > { %5361 = vmatprep.subr.bf16.mxu1 %v8002_v57 }
 0x4b2   : > { %5363 = vmatpush3.bf16.msra.mxu1 %v5362_v61 }
 0x4b3   : > { %5364 = vmatprep.subr.bf16.mxu1 %v8002_v57 }
 0x4b6   : > { %5366 = vmatpush3.bf16.msra.mxu1 %v5365_v16 }
 0x4b7   : > { %5367 = vmatprep.subr.bf16.mxu1 %v8002_v57 }
 0x4ba   : > { %5369 = vmatpush3.bf16.msra.mxu1 %v5368_v2 }
 0x4bb   : > { %5370 = vmatprep.subr.bf16.mxu1 %v8002_v57 }
 0x4be   : > { %5372 = vmatpush3.bf16.msra.mxu1 %v5371_v13 }
 0x4bf   : > { %5373 = vmatprep.subr.bf16.mxu1 %v8002_v57 }
 0x4c2   : > { %5375 = vmatpush3.bf16.msra.mxu1 %v5374_v10 }
 0x4c5   : > { %5157 = vmatmul.mubr.f32.vlgmr.msra.gmra.mrb[22].mxu1 %v3549_v41 }
 0x4d8   : > { %v3626_v27 = vpop.f32.mrb[10].mxu1 }
 0x4d9   : > { %v4948_v46 = vpop.f32.mrb[11].mxu1 }
 0x4de   : > { %v7808_v3 = vpop.f32.mrb[120].mxu0 }
 0x4df   : > { %v5193_v40 = vpop.f32.mrb[121].mxu0 }
 0x4f8   : > { %v3696_v19 = vpop.f32.mrb[12].mxu1 }
 0x4f9   : > { %v4128_v23 = vrot.slane %v3696_v19, 7  ;;  %v4983_v37 = vpop.f32.mrb[13].mxu1 }
 0x4fb   : > { %v4129_v57 = vsel %vm8036_vm8, %v4128_v23, %v3626_v27 }
 0x518   : > { %v3766_v59 = vpop.f32.mrb[14].mxu1 }
 0x519   : > { %v4130_v15 = vrot.slane %v3766_v59, 6  ;;  %v5018_v56 = vpop.f32.mrb[15].mxu1 }
 0x51b   : > { %v4131_v60 = vsel %vm3479_vm14, %v4130_v15, %v4129_v57 }
 0x51c   : > { %5545 = shalt.err (!%p5542_p4)
}
 0x51d   : > { %s5546_s17 = scalar_lea.hbm %s7818_s23, 128  ;;  %s5550_s28 = scalar_lea.hbm %s7905_s9, 256 }
 0x51e   : > { %p5547_p7 = scmp.ne.s32.totalorder %s7818_s23, %s5546_s17  ;;  %p5551_p10 = scmp.lt.u32.totalorder %s7818_s23, %s7905_s9 }
 0x51f   : > { %p5552_p11 = scmp.lt.u32.totalorder %s5550_s28, %s5546_s17  ;;  %p5554_p13 = scmp.lt.u32.totalorder %s5546_s17, %s7818_s23 }
 0x520   : > { %p5548_p8 = pnand %p5547_p7, %p5726_p5 }
 0x521   : > { %p5553_p12 = por %p5552_p11, %p5551_p10 }
 0x522   : > { %p5549_p9 = pneg %p5548_p8 }
 0x523   : > { %p5555_p0 = por %p5554_p13, %p5553_p12 }
 0x525   : > { %p5556_p1 = pnand %p5555_p0, %p5549_p9 }
 0x527   : > { %5559 = shalt.err (!%p5556_p1)
}
 0x528   : > { %5405 = dma.vmem_to_hbm [thread:$0]  (%p5726_p5), %s4178_s24, 128, %s7818_s23, %s4151_s26   ;;  %vm8037_vm9 = vcmask 1043459   ;;  %vm8038_vm10 = vcmask 1044484   ;;  %v4140_v5 = vrot.slane %v7808_v3, 1  ;;  %vm8040_vm12 = vcmask 261120  }
 0x529   : > { %s347_s25 = scalar_lea.vmem [#allocation3], %s4284_s15  ;;  %s8039_s24 = sshll.u32 %s5709_s7, 7 }
 0x52a   : > { %s4164_s23 = sshll.u32 %s347_s25, 4  ;;  %s7851_s30 = scalar_lea.hbm %s7904_s8, %s8039_s24  ;;  %s7853_s23 = int_to_ptr.vmem [resolvable:$true] %s4164_s23 }
 0x52b   : > { %s4146_s15 = scalar_lea.sflag [#allocation4], %s7607_s10  ;;  %s5560_s17 = scalar_lea.vmem %s7853_s23, 128 }
 0x52c   : > { %p5561_p2 = scmp.ne.s32.totalorder %s7853_s23, %s5560_s17  ;;  %s5634_s7 = smov [#allocation3]  }
 0x52d   : > { %s5564_s18 = sshll.u32 %s5634_s7, 4  ;;  %s5565_s18 = int_to_ptr.vmem [resolvable:$false] %s5564_s18 }
 0x52e   : > { %p5562_p3 = pnand %p5561_p2, %p5726_p5  ;;  %s5566_s22 = scalar_lea.vmem %s5565_s18, 256 }
 0x52f   : > { %p5567_p7 = scmp.lt.s32.totalorder %s7853_s23, %s5565_s18  ;;  %p5568_p8 = scmp.lt.s32.totalorder %s5566_s22, %s5560_s17 }
 0x530   : > { %p5563_p4 = pneg %p5562_p3 }
 0x531   : > { %p5569_p9 = por %p5568_p8, %p5567_p7 }
 0x533   : > { %p5570_p10 = pnand %p5569_p9, %p5563_p4 }
 0x538   : > { %v3836_v28 = vpop.f32.mrb[16].mxu1 }
 0x539   : > { %v4132_v1 = vrot.slane %v3836_v28, 5  ;;  %v5053_v54 = vpop.f32.mrb[17].mxu1 }
 0x53b   : > { %v4133_v36 = vsel %vm8037_vm9, %v4132_v1, %v4131_v60 }
 0x558   : > { %v3906_v63 = vpop.f32.mrb[18].mxu1 }
 0x559   : > { %v4134_v42 = vrot.slane %v3906_v63, 4  ;;  %v5088_v31 = vpop.f32.mrb[19].mxu1 }
 0x55b   : > { %v4135_v8 = vsel %vm8038_vm10, %v4134_v42, %v4133_v36 }
 0x578   : > { %v3976_v47 = vpop.f32.mrb[20].mxu1 }
 0x579   : > { %v4136_v35 = vrot.slane %v3976_v47, 3  ;;  %v5123_v26 = vpop.f32.mrb[21].mxu1 }
 0x57b   : > { %v4137_v44 = vsel %vm3485_vm11, %v4136_v35, %v4135_v8 }
 0x598   : > { %v4046_v38 = vpop.f32.mrb[22].mxu1 }
 0x599   : > { %v4138_v12 = vrot.slane %v4046_v38, 2  ;;  %v5158_v30 = vpop.f32.mrb[23].mxu1 }
 0x59b   : > { %v4139_v50 = vsel %vm3487_vm4, %v4138_v12, %v4137_v44 }
 0x59c   : > { %v4141_v21 = vsel %vm3489_vm6, %v4140_v5, %v4139_v50 }
 0x59d   : > { %4143 = vst.msk [vmem:[%s347_s25] sm:$0xff] %vm8040_vm12, %v4141_v21 }
 0x59e   : > { %5573 = shalt.err (!%p5570_p10)
}
 0x59f   : > { %s5574_s10 = scalar_lea.hbm %s7851_s30, 128  ;;  %s5578_s25 = scalar_lea.hbm %s7904_s8, 256 }
 0x5a0   : > { %p5575_p11 = scmp.ne.s32.totalorder %s7851_s30, %s5574_s10  ;;  %p5579_p0 = scmp.lt.u32.totalorder %s7851_s30, %s7904_s8 }
 0x5a1   : > { %p5580_p1 = scmp.lt.u32.totalorder %s5578_s25, %s5574_s10  ;;  %p5582_p3 = scmp.lt.u32.totalorder %s5574_s10, %s7851_s30 }
 0x5a2   : > { %p5576_p12 = pnand %p5575_p11, %p5726_p5 }
 0x5a3   : > { %p5581_p2 = por %p5580_p1, %p5579_p0 }
 0x5a4   : > { %p5577_p13 = pneg %p5576_p12 }
 0x5a5   : > { %p5583_p4 = por %p5582_p3, %p5581_p2 }
 0x5a7   : > { %p5584_p7 = pnand %p5583_p4, %p5577_p13 }
 0x5a9   : > { %5587 = shalt.err (!%p5584_p7)
}
 0x5aa   : > { %5404 = dma.vmem_to_hbm [thread:$0]  (%p5726_p5), %s7853_s23, 128, %s7851_s30, %s4146_s15  }
 0x5ab PF: > { %p5415_p8 = scmp.ge.s32.totalorder %s5626_s14, 2  ;;  %s4189_s27 = sand.u32 1, %s5614_s11  }
 0x5ac   : > { %s4190_s17 = scalar_lea.sflag [#allocation4], %s4189_s27 }
 0x5ad   : > { %p5409_p9 = pnand %p5415_p8, %p5730_p6 }
 0x5af   : > { %5605 = dma.done.wait (!%p5409_p9), %s4190_s17, 128  }
 0x5b0   : > { %5607 = vsyncadd (!%p5409_p9), %s4190_s17, 4294967168  ;;  %s4199_s7 = scalar_lea.sflag [#allocation6], %s4189_s27 }
 0x5b1   : > { %5609 = dma.done.wait (!%p5409_p9), %s4199_s7, 128  }
 0x5b2   : > { %5611 = vsyncadd (!%p5409_p9), %s4199_s7, 4294967168  ;;  %p25_p5 = scmp.ge.s32.totalorder %s5713_s16, 4   ;;  %s8041_s11 = smov %s5618_s12 }
 0x5b3   : > { %s8042_s12 = smov %s5622_s13  ;;  %s8043_s13 = smov %s5724_s19 }
 0x5b4   : > { %s8044_s14 = smov %s5713_s16  ;;  %27 = sbr.rel (!%p25_p5) target bundleno = 8 (0x8), region = 107 }
 0x5bb   :  { %4204 = vsyncpa [#allocation4], 1 }
 0x5bc   :  { %4206 = vsyncpa [#allocation4 + $0x1], 1 }
 0x5bd   :  { %4207 = vsyncpa [#allocation6], 1 }
 0x5be   :  { %4209 = vsyncpa [#allocation6 + $0x1], 1 }

</bundles_post_ra>
